<compile_context>
chip_gen: v5e
topology: v5e:2x2
jax: 0.10.0
libtpu: 0.0.40
codegen_flags: <defaults>
</compile_context>

<pallas_src>
import functools

import jax
import jax.numpy as jnp
from jax.experimental import pallas as pl
from jax.experimental.pallas import tpu as pltpu


def _round_up(v, m):
    return ((v + m - 1) // m) * m


# ----------------------------------------------------------------------------
# Pallas kernel: all LSTM layers + final Linear in one invocation (wavefront)
# ----------------------------------------------------------------------------
def _fused_lstm_kernel(num_layers, seq_len, batch_p, hidden_p, *refs):
    """refs layout:
        inputs : x2d (T*Bp, D) bf16,
                 [w_ih^T (d_in_p,4Hp) bf16, w_hh^T (Hp,4Hp) bf16,
                  bias (1,4Hp) f32] * num_layers,
                 lin_w^T (Hp, O) bf16, lin_b (1, O) f32
        outputs: out (L*Bp, O) f32, h_out (L, Bp, Hp) f32, c_out (L, Bp, Hp) f32
        scratch: gx_sc (T*Bp, 4Hp) f32
    """
    L, T, Bp, Hp = num_layers, seq_len, batch_p, hidden_p
    n_in = 1 + 3 * L + 2

    x_ref = refs[0]
    layer_refs = [refs[1 + 3 * l: 4 + 3 * l] for l in range(L)]
    lin_w_ref, lin_b_ref = refs[n_in - 2], refs[n_in - 1]
    out_ref, h_out_ref, c_out_ref = refs[n_in], refs[n_in + 1], refs[n_in + 2]
    gx_sc = refs[n_in + 3]

    # ---- Phase 1: hoisted layer-0 input projection (one big MXU matmul) ----
    wih0_ref, _, b0_ref = layer_refs[0]
    gx_sc[...] = (jnp.dot(x_ref[...], wih0_ref[...],
                          preferred_element_type=jnp.float32)
                  + b0_ref[...])                                  # (T*Bp, 4Hp)

    h = [jnp.zeros((Bp, Hp), jnp.float32) for _ in range(L)]
    c = [jnp.zeros((Bp, Hp), jnp.float32) for _ in range(L)]

    def cell(gates, c_prev):
        # Host-side packing permuted gate columns to [i, f, o, g]:
        # one sigmoid over the first 3 gate blocks, one tanh over the last.
        sg = jax.nn.sigmoid(gates[:, :3 * Hp])
        g_g = jnp.tanh(gates[:, 3 * Hp:])
        i_g = sg[:, 0 * Hp:1 * Hp]
        f_g = sg[:, 1 * Hp:2 * Hp]
        o_g = sg[:, 2 * Hp:3 * Hp]
        c_new = f_g * c_prev + i_g * g_g
        h_new = o_g * jnp.tanh(c_new)
        return h_new, c_new

    # ---- Phase 2: wavefront over (layer, time) ----
    # Step s runs layer l at time t = s - l; layer l>0 consumes layer l-1's
    # hidden state from the PREVIOUS step, so the L cell updates inside a step
    # are independent chains the scheduler can overlap.
    # TODO(synk): for large T convert to lax.fori_loop over wavefront chunks.
    for s in range(T + L - 1):
        h_prev = list(h)
        c_prev = list(c)
        for l in range(L):
            t = s - l
            if t < 0 or t >= T:
                continue
            wih_ref, whh_ref, b_ref = layer_refs[l]
            if l == 0:
                pre = gx_sc[t * Bp:(t + 1) * Bp, :]               # (Bp, 4Hp)
            else:
                pre = (jnp.dot(h_prev[l - 1].astype(jnp.bfloat16), wih_ref[...],
                               preferred_element_type=jnp.float32)
                       + b_ref[...])
            gates = pre + jnp.dot(h_prev[l].astype(jnp.bfloat16), whh_ref[...],
                                  preferred_element_type=jnp.float32)
            h[l], c[l] = cell(gates, c_prev[l])

    # ---- Phase 3: one fused Linear over the stacked final hidden states ----
    h_stack = jnp.concatenate(h, axis=0)                          # (L*Bp, Hp)
    out_ref[...] = (jnp.dot(h_stack.astype(jnp.bfloat16), lin_w_ref[...],
                            preferred_element_type=jnp.float32)
                    + lin_b_ref[...])
    for l in range(L):
        h_out_ref[l] = h[l]
        c_out_ref[l] = c[l]


# ----------------------------------------------------------------------------
# Wrapper
# ----------------------------------------------------------------------------
@functools.partial(jax.jit, static_argnames=("hidden_size",))
def lstm_forward(x, packed_layers, lin_w_p, lin_b_p, *, hidden_size):
    """x: [batch, seq, input_size] (batch_first, like the PyTorch module).

    packed_layers: list of (w_ih^T, w_hh^T, bias) already gate-permuted,
    H-padded and bf16-cast (see pack_params).
    Returns (out [num_layers*batch, output], (h_out, c_out) [L, B, H] each).
    """
    B, T, D = x.shape
    L = len(packed_layers)
    Hp = packed_layers[0][1].shape[0]          # whh_p: (Hp, 4Hp)
    Gp = 4 * Hp
    O = lin_w_p.shape[1]
    Bp = _round_up(B, 8)                       # full-sublane tiles

    # Time-major, batch padded to 8 sublanes, flattened to (T*Bp, D), bf16
    # (its only use is as an MXU operand).
    xt = jnp.transpose(x, (1, 0, 2)).astype(jnp.float32)          # (T, B, D)
    xt = jnp.pad(xt, ((0, 0), (0, Bp - B), (0, 0)))
    x2d = xt.reshape(T * Bp, D).astype(jnp.bfloat16)

    in_arrays = [x2d]
    in_specs = [pl.BlockSpec((T * Bp, D), lambda i: (0, 0))]
    for (w_ih_p, w_hh_p, b_p) in packed_layers:
        d_in_p = w_ih_p.shape[0]
        in_arrays += [w_ih_p, w_hh_p, b_p]
        in_specs += [
            pl.BlockSpec((d_in_p, Gp), lambda i: (0, 0)),
            pl.BlockSpec((Hp, Gp), lambda i: (0, 0)),
            pl.BlockSpec((1, Gp), lambda i: (0, 0)),
        ]
    in_arrays += [lin_w_p, lin_b_p]
    in_specs += [pl.BlockSpec((Hp, O), lambda i: (0, 0)),
                 pl.BlockSpec((1, O), lambda i: (0, 0))]

    out_shape = (
        jax.ShapeDtypeStruct((L * Bp, O), jnp.float32),   # linear(h_out)
        jax.ShapeDtypeStruct((L, Bp, Hp), jnp.float32),   # h_out (padded)
        jax.ShapeDtypeStruct((L, Bp, Hp), jnp.float32),   # c_out (padded)
    )
    out_specs = (
        pl.BlockSpec((L * Bp, O), lambda i: (0, 0)),
        pl.BlockSpec((L, Bp, Hp), lambda i: (0, 0, 0)),
        pl.BlockSpec((L, Bp, Hp), lambda i: (0, 0, 0)),
    )
    scratch_shapes = [
        pltpu.VMEM((T * Bp, Gp), jnp.float32),   # hoisted layer-0 gates
    ]

    kernel = functools.partial(_fused_lstm_kernel, L, T, Bp, Hp)
    out_p, h_p, c_p = pl.pallas_call(
        kernel,
        out_shape=out_shape,
        grid=(1,),                               # single invocation; loop inside
        in_specs=in_specs,
        out_specs=out_specs,
        scratch_shapes=scratch_shapes,
        compiler_params=pltpu.CompilerParams(
            dimension_semantics=("arbitrary",)),
    )(*in_arrays)

    # Un-pad: layer-major flatten for the Linear output, slice h/c to (L, B, H).
    out = out_p.reshape(L, Bp, O)[:, :B, :].reshape(L * B, O)
    h_out = h_p[:, :B, :hidden_size]
    c_out = c_p[:, :B, :hidden_size]
    return out, (h_out, c_out)


# ----------------------------------------------------------------------------
# Host-side packing: transpose, gate-permute [i,f,g,o]->[i,f,o,g], pad, bf16
# ----------------------------------------------------------------------------
def pack_params(layer_params_raw, lin_w, lin_b, hidden_size):
    H = hidden_size
    Hp = _round_up(H, 128)
    perm = (0, 1, 3, 2)   # new block j comes from old block perm[j]

    def pack_w(w, rows_in, rows_pad):
        # w: (4H, rows_in) torch layout -> (rows_pad, 4Hp) transposed/permuted
        wt = jnp.zeros((rows_pad, 4 * Hp), jnp.float32)
        for j_new, j_old in enumerate(perm):
            blk = w[j_old * H:(j_old + 1) * H, :].T              # (rows_in, H)
            wt = wt.at[:rows_in, j_new * Hp:j_new * Hp + H].set(blk)
        return wt.astype(jnp.bfloat16)

    packed = []
    for li, (w_ih, w_hh, b_ih, b_hh) in enumerate(layer_params_raw):
        d_in = w_ih.shape[1]
        d_in_p = d_in if li == 0 else Hp
        w_ih_p = pack_w(w_ih, d_in, d_in_p)
        w_hh_p = pack_w(w_hh, H, Hp)
        b = (b_ih + b_hh).astype(jnp.float32)
        b_p = jnp.zeros((1, 4 * Hp), jnp.float32)
        for j_new, j_old in enumerate(perm):
            b_p = b_p.at[0, j_new * Hp:j_new * Hp + H].set(
                b[j_old * H:(j_old + 1) * H])
        packed.append((w_ih_p, w_hh_p, b_p))

    O = lin_w.shape[0]
    lin_w_p = jnp.zeros((Hp, O), jnp.float32).at[:H, :].set(lin_w.T)
    lin_w_p = lin_w_p.astype(jnp.bfloat16)
    lin_b_p = lin_b.reshape(1, O).astype(jnp.float32)
    return packed, lin_w_p, lin_b_p


# ----------------------------------------------------------------------------
# Pure-JAX reference (same mixed precision: bf16 matmul operands, f32 accum)
# ----------------------------------------------------------------------------
def lstm_forward_ref(x, layer_params_raw, lin_w, lin_b):
    layer_in = jnp.transpose(x, (1, 0, 2)).astype(jnp.float32)   # (T, B, D)
    h_finals, c_finals = [], []
    for (w_ih, w_hh, b_ih, b_hh) in layer_params_raw:
        H = w_hh.shape[1]
        B = layer_in.shape[1]
        wih_t = w_ih.T.astype(jnp.bfloat16)
        whh_t = w_hh.T.astype(jnp.bfloat16)
        bias = (b_ih + b_hh).astype(jnp.float32)
        h = jnp.zeros((B, H), jnp.float32)
        c = jnp.zeros((B, H), jnp.float32)
        outs = []
        for t in range(layer_in.shape[0]):
            g = (jnp.dot(layer_in[t].astype(jnp.bfloat16), wih_t,
                         preferred_element_type=jnp.float32)
                 + jnp.dot(h.astype(jnp.bfloat16), whh_t,
                           preferred_element_type=jnp.float32)
                 + bias)
            i_g = jax.nn.sigmoid(g[:, 0 * H:1 * H])
            f_g = jax.nn.sigmoid(g[:, 1 * H:2 * H])
            g_g = jnp.tanh(g[:, 2 * H:3 * H])
            o_g = jax.nn.sigmoid(g[:, 3 * H:4 * H])
            c = f_g * c + i_g * g_g
            h = o_g * jnp.tanh(c)
            outs.append(h)
        layer_in = jnp.stack(outs, axis=0)
        h_finals.append(h)
        c_finals.append(c)
    h_out = jnp.stack(h_finals, axis=0)
    c_out = jnp.stack(c_finals, axis=0)
    out = (jnp.dot(h_out.reshape(-1, h_out.shape[-1]).astype(jnp.bfloat16),
                   lin_w.T.astype(jnp.bfloat16),
                   preferred_element_type=jnp.float32)
           + lin_b)
    return out, h_out, c_out


# ----------------------------------------------------------------------------
# Deterministic parameter construction (matches nn.LSTM / nn.Linear shapes)
# ----------------------------------------------------------------------------
def init_params(key, input_size, hidden_size, num_layers, output_size):
    H = hidden_size
    bound = 1.0 / jnp.sqrt(jnp.float32(H))
    layer_params = []
    for layer in range(num_layers):
        d_in = input_size if layer == 0 else H
        key, k1, k2, k3, k4 = jax.random.split(key, 5)
        w_ih = jax.random.uniform(k1, (4 * H, d_in), jnp.float32, -bound, bound)
        w_hh = jax.random.uniform(k2, (4 * H, H), jnp.float32, -bound, bound)
        b_ih = jax.random.uniform(k3, (4 * H,), jnp.float32, -bound, bound)
        b_hh = jax.random.uniform(k4, (4 * H,), jnp.float32, -bound, bound)
        layer_params.append((w_ih, w_hh, b_ih, b_hh))
    key, k5, k6 = jax.random.split(key, 3)
    lin_w = jax.random.uniform(k5, (output_size, H), jnp.float32, -bound, bound)
    lin_b = jax.random.uniform(k6, (output_size,), jnp.float32, -bound, bound)
    return layer_params, lin_w, lin_b


if __name__ == "__main__":
    batch_size = 2
    seq_len = 8
    input_size = 4
    hidden_size = 32
    num_layers = 2
    output_size = 4

    key = jax.random.PRNGKey(0)
    key, kx = jax.random.split(key)
    x = jax.random.normal(kx, (batch_size, seq_len, input_size), jnp.float32)

    layer_params_raw, lin_w, lin_b = init_params(
        key, input_size, hidden_size, num_layers, output_size)
    packed_layers, lin_w_p, lin_b_p = pack_params(
        layer_params_raw, lin_w, lin_b, hidden_size)

    out, (h_out, c_out) = lstm_forward(
        x, packed_layers, lin_w_p, lin_b_p, hidden_size=hidden_size)
    out = jax.block_until_ready(out)

    ref_out, ref_h, ref_c = lstm_forward_ref(x, layer_params_raw, lin_w, lin_b)
    assert out.shape == (num_layers * batch_size, output_size), out.shape
    assert jnp.allclose(out, ref_out, rtol=1e-2, atol=1e-2), (
        f"max abs diff {jnp.max(jnp.abs(out - ref_out))}")
    assert jnp.allclose(h_out, ref_h, rtol=1e-2, atol=1e-2), (
        f"max abs diff {jnp.max(jnp.abs(h_out - ref_h))}")
    assert jnp.allclose(c_out, ref_c, rtol=1e-2, atol=1e-2), (
        f"max abs diff {jnp.max(jnp.abs(c_out - ref_c))}")

    print("KERNEL_OK")
</pallas_src>

<mosaic_0001>
module attributes {stable_mosaic.version = 11 : i64} {
  func.func @_fused_lstm_kernel(%arg0: i32, %arg1: memref<64x4xbf16, #tpu.memory_space<vmem>>, %arg2: memref<4x512xbf16, #tpu.memory_space<vmem>>, %arg3: memref<128x512xbf16, #tpu.memory_space<vmem>>, %arg4: memref<1x512xf32, #tpu.memory_space<vmem>>, %arg5: memref<128x512xbf16, #tpu.memory_space<vmem>>, %arg6: memref<128x512xbf16, #tpu.memory_space<vmem>>, %arg7: memref<1x512xf32, #tpu.memory_space<vmem>>, %arg8: memref<128x4xbf16, #tpu.memory_space<vmem>>, %arg9: memref<1x4xf32, #tpu.memory_space<vmem>>, %arg10: memref<16x4xf32, #tpu.memory_space<vmem>>, %arg11: memref<2x8x128xf32, #tpu.memory_space<vmem>>, %arg12: memref<2x8x128xf32, #tpu.memory_space<vmem>>, %arg13: memref<64x512xf32, #tpu.memory_space<vmem>>) attributes {dimension_semantics = [#tpu.dimension_semantics<arbitrary>], iteration_bounds = array<i64: 1>, scalar_prefetch = 0 : i64, scratch_operands = 1 : i64, tpu.core_type = #tpu.core_type<tc>, window_params = [{pipeline_mode = #tpu.pipeline_mode<synchronous>, transform_indices = @transform_0, window_bounds = array<i64: 64, 4>}, {pipeline_mode = #tpu.pipeline_mode<synchronous>, transform_indices = @transform_1, window_bounds = array<i64: 4, 512>}, {pipeline_mode = #tpu.pipeline_mode<synchronous>, transform_indices = @transform_2, window_bounds = array<i64: 128, 512>}, {pipeline_mode = #tpu.pipeline_mode<synchronous>, transform_indices = @transform_3, window_bounds = array<i64: 1, 512>}, {pipeline_mode = #tpu.pipeline_mode<synchronous>, transform_indices = @transform_4, window_bounds = array<i64: 128, 512>}, {pipeline_mode = #tpu.pipeline_mode<synchronous>, transform_indices = @transform_5, window_bounds = array<i64: 128, 512>}, {pipeline_mode = #tpu.pipeline_mode<synchronous>, transform_indices = @transform_6, window_bounds = array<i64: 1, 512>}, {pipeline_mode = #tpu.pipeline_mode<synchronous>, transform_indices = @transform_7, window_bounds = array<i64: 128, 4>}, {pipeline_mode = #tpu.pipeline_mode<synchronous>, transform_indices = @transform_8, window_bounds = array<i64: 1, 4>}, {pipeline_mode = #tpu.pipeline_mode<synchronous>, transform_indices = @transform_9, window_bounds = array<i64: 16, 4>}, {pipeline_mode = #tpu.pipeline_mode<synchronous>, transform_indices = @transform_10, window_bounds = array<i64: 2, 8, 128>}, {pipeline_mode = #tpu.pipeline_mode<synchronous>, transform_indices = @transform_11, window_bounds = array<i64: 2, 8, 128>}]} {
    %c0 = arith.constant 0 : index
    %c0_0 = arith.constant 0 : index
    %0 = vector.load %arg1[%c0, %c0_0] : memref<64x4xbf16, #tpu.memory_space<vmem>>, vector<64x4xbf16>
    %c0_1 = arith.constant 0 : index
    %c0_2 = arith.constant 0 : index
    %1 = vector.load %arg2[%c0_1, %c0_2] : memref<4x512xbf16, #tpu.memory_space<vmem>>, vector<4x512xbf16>
    %cst = arith.constant dense<0.000000e+00> : vector<64x512xf32>
    %2 = tpu.matmul %0, %1, %cst {dimension_numbers = #tpu.dot_dimension_numbers<[1], [0], [0], [1], [0, 0, 1, 1], [], []>} : vector<64x4xbf16>, vector<4x512xbf16>, vector<64x512xf32> -> vector<64x512xf32>
    %c0_3 = arith.constant 0 : index
    %c0_4 = arith.constant 0 : index
    %3 = vector.load %arg4[%c0_3, %c0_4] : memref<1x512xf32, #tpu.memory_space<vmem>>, vector<1x512xf32>
    %4 = vector.broadcast %3 : vector<1x512xf32> to vector<64x512xf32>
    %5 = arith.addf %2, %4 : vector<64x512xf32>
    %c0_5 = arith.constant 0 : index
    %c0_6 = arith.constant 0 : index
    %6 = vector.load %arg13[%c0_5, %c0_6] : memref<64x512xf32, #tpu.memory_space<vmem>>, vector<64x512xf32>
    tpu.vector_store %arg13[%c0_5, %c0_6], %5 {strides = array<i32>} : memref<64x512xf32, #tpu.memory_space<vmem>>, vector<64x512xf32>,
    %cst_7 = arith.constant 0.000000e+00 : f32
    %7 = vector.broadcast %cst_7 : f32 to vector<8x128xf32>
    %cst_8 = arith.constant 0.000000e+00 : f32
    %8 = vector.broadcast %cst_8 : f32 to vector<8x128xf32>
    %cst_9 = arith.constant 0.000000e+00 : f32
    %9 = vector.broadcast %cst_9 : f32 to vector<8x128xf32>
    %cst_10 = arith.constant 0.000000e+00 : f32
    %10 = vector.broadcast %cst_10 : f32 to vector<8x128xf32>
    %c0_11 = arith.constant 0 : index
    %c0_12 = arith.constant 0 : index
    %11 = vector.load %arg13[%c0_11, %c0_12] : memref<64x512xf32, #tpu.memory_space<vmem>>, vector<8x512xf32>
    %12 = arith.truncf %7 : vector<8x128xf32> to vector<8x128xbf16>
    %c0_13 = arith.constant 0 : index
    %c0_14 = arith.constant 0 : index
    %13 = vector.load %arg3[%c0_13, %c0_14] : memref<128x512xbf16, #tpu.memory_space<vmem>>, vector<128x512xbf16>
    %cst_15 = arith.constant dense<0.000000e+00> : vector<8x512xf32>
    %14 = tpu.matmul %12, %13, %cst_15 {dimension_numbers = #tpu.dot_dimension_numbers<[1], [0], [0], [1], [0, 0, 1, 1], [], []>} : vector<8x128xbf16>, vector<128x512xbf16>, vector<8x512xf32> -> vector<8x512xf32>
    %15 = arith.addf %11, %14 : vector<8x512xf32>
    %16 = vector.extract_strided_slice %15 {offsets = [0, 0], sizes = [8, 384], strides = [1, 1]} : vector<8x512xf32> to vector<8x384xf32>
    %17 = arith.negf %16 : vector<8x384xf32>
    %18 = math.exp %17 : vector<8x384xf32>
    %cst_16 = arith.constant 1.000000e+00 : f32
    %19 = vector.broadcast %cst_16 : f32 to vector<8x384xf32>
    %20 = arith.addf %19, %18 : vector<8x384xf32>
    %21 = arith.divf %19, %20 : vector<8x384xf32>
    %22 = vector.extract_strided_slice %15 {offsets = [0, 384], sizes = [8, 128], strides = [1, 1]} : vector<8x512xf32> to vector<8x128xf32>
    %23 = math.tanh %22 : vector<8x128xf32>
    %24 = vector.extract_strided_slice %21 {offsets = [0, 0], sizes = [8, 128], strides = [1, 1]} : vector<8x384xf32> to vector<8x128xf32>
    %25 = vector.extract_strided_slice %21 {offsets = [0, 128], sizes = [8, 128], strides = [1, 1]} : vector<8x384xf32> to vector<8x128xf32>
    %26 = vector.extract_strided_slice %21 {offsets = [0, 256], sizes = [8, 128], strides = [1, 1]} : vector<8x384xf32> to vector<8x128xf32>
    %27 = arith.mulf %25, %9 : vector<8x128xf32>
    %28 = arith.mulf %24, %23 : vector<8x128xf32>
    %29 = arith.addf %27, %28 : vector<8x128xf32>
    %30 = math.tanh %29 : vector<8x128xf32>
    %31 = arith.mulf %26, %30 : vector<8x128xf32>
    %c8 = arith.constant 8 : index
    %c0_17 = arith.constant 0 : index
    %32 = vector.load %arg13[%c8, %c0_17] : memref<64x512xf32, #tpu.memory_space<vmem>>, vector<8x512xf32>
    %33 = arith.truncf %31 : vector<8x128xf32> to vector<8x128xbf16>
    %c0_18 = arith.constant 0 : index
    %c0_19 = arith.constant 0 : index
    %34 = vector.load %arg3[%c0_18, %c0_19] : memref<128x512xbf16, #tpu.memory_space<vmem>>, vector<128x512xbf16>
    %cst_20 = arith.constant dense<0.000000e+00> : vector<8x512xf32>
    %35 = tpu.matmul %33, %34, %cst_20 {dimension_numbers = #tpu.dot_dimension_numbers<[1], [0], [0], [1], [0, 0, 1, 1], [], []>} : vector<8x128xbf16>, vector<128x512xbf16>, vector<8x512xf32> -> vector<8x512xf32>
    %36 = arith.addf %32, %35 : vector<8x512xf32>
    %37 = vector.extract_strided_slice %36 {offsets = [0, 0], sizes = [8, 384], strides = [1, 1]} : vector<8x512xf32> to vector<8x384xf32>
    %38 = arith.negf %37 : vector<8x384xf32>
    %39 = math.exp %38 : vector<8x384xf32>
    %cst_21 = arith.constant 1.000000e+00 : f32
    %40 = vector.broadcast %cst_21 : f32 to vector<8x384xf32>
    %41 = arith.addf %40, %39 : vector<8x384xf32>
    %42 = arith.divf %40, %41 : vector<8x384xf32>
    %43 = vector.extract_strided_slice %36 {offsets = [0, 384], sizes = [8, 128], strides = [1, 1]} : vector<8x512xf32> to vector<8x128xf32>
    %44 = math.tanh %43 : vector<8x128xf32>
    %45 = vector.extract_strided_slice %42 {offsets = [0, 0], sizes = [8, 128], strides = [1, 1]} : vector<8x384xf32> to vector<8x128xf32>
    %46 = vector.extract_strided_slice %42 {offsets = [0, 128], sizes = [8, 128], strides = [1, 1]} : vector<8x384xf32> to vector<8x128xf32>
    %47 = vector.extract_strided_slice %42 {offsets = [0, 256], sizes = [8, 128], strides = [1, 1]} : vector<8x384xf32> to vector<8x128xf32>
    %48 = arith.mulf %46, %29 : vector<8x128xf32>
    %49 = arith.mulf %45, %44 : vector<8x128xf32>
    %50 = arith.addf %48, %49 : vector<8x128xf32>
    %51 = math.tanh %50 : vector<8x128xf32>
    %52 = arith.mulf %47, %51 : vector<8x128xf32>
    %53 = arith.truncf %31 : vector<8x128xf32> to vector<8x128xbf16>
    %c0_22 = arith.constant 0 : index
    %c0_23 = arith.constant 0 : index
    %54 = vector.load %arg5[%c0_22, %c0_23] : memref<128x512xbf16, #tpu.memory_space<vmem>>, vector<128x512xbf16>
    %cst_24 = arith.constant dense<0.000000e+00> : vector<8x512xf32>
    %55 = tpu.matmul %53, %54, %cst_24 {dimension_numbers = #tpu.dot_dimension_numbers<[1], [0], [0], [1], [0, 0, 1, 1], [], []>} : vector<8x128xbf16>, vector<128x512xbf16>, vector<8x512xf32> -> vector<8x512xf32>
    %c0_25 = arith.constant 0 : index
    %c0_26 = arith.constant 0 : index
    %56 = vector.load %arg7[%c0_25, %c0_26] : memref<1x512xf32, #tpu.memory_space<vmem>>, vector<1x512xf32>
    %57 = vector.broadcast %56 : vector<1x512xf32> to vector<8x512xf32>
    %58 = arith.addf %55, %57 : vector<8x512xf32>
    %59 = arith.truncf %8 : vector<8x128xf32> to vector<8x128xbf16>
    %c0_27 = arith.constant 0 : index
    %c0_28 = arith.constant 0 : index
    %60 = vector.load %arg6[%c0_27, %c0_28] : memref<128x512xbf16, #tpu.memory_space<vmem>>, vector<128x512xbf16>
    %cst_29 = arith.constant dense<0.000000e+00> : vector<8x512xf32>
    %61 = tpu.matmul %59, %60, %cst_29 {dimension_numbers = #tpu.dot_dimension_numbers<[1], [0], [0], [1], [0, 0, 1, 1], [], []>} : vector<8x128xbf16>, vector<128x512xbf16>, vector<8x512xf32> -> vector<8x512xf32>
    %62 = arith.addf %58, %61 : vector<8x512xf32>
    %63 = vector.extract_strided_slice %62 {offsets = [0, 0], sizes = [8, 384], strides = [1, 1]} : vector<8x512xf32> to vector<8x384xf32>
    %64 = arith.negf %63 : vector<8x384xf32>
    %65 = math.exp %64 : vector<8x384xf32>
    %cst_30 = arith.constant 1.000000e+00 : f32
    %66 = vector.broadcast %cst_30 : f32 to vector<8x384xf32>
    %67 = arith.addf %66, %65 : vector<8x384xf32>
    %68 = arith.divf %66, %67 : vector<8x384xf32>
    %69 = vector.extract_strided_slice %62 {offsets = [0, 384], sizes = [8, 128], strides = [1, 1]} : vector<8x512xf32> to vector<8x128xf32>
    %70 = math.tanh %69 : vector<8x128xf32>
    %71 = vector.extract_strided_slice %68 {offsets = [0, 0], sizes = [8, 128], strides = [1, 1]} : vector<8x384xf32> to vector<8x128xf32>
    %72 = vector.extract_strided_slice %68 {offsets = [0, 128], sizes = [8, 128], strides = [1, 1]} : vector<8x384xf32> to vector<8x128xf32>
    %73 = vector.extract_strided_slice %68 {offsets = [0, 256], sizes = [8, 128], strides = [1, 1]} : vector<8x384xf32> to vector<8x128xf32>
    %74 = arith.mulf %72, %10 : vector<8x128xf32>
    %75 = arith.mulf %71, %70 : vector<8x128xf32>
    %76 = arith.addf %74, %75 : vector<8x128xf32>
    %77 = math.tanh %76 : vector<8x128xf32>
    %78 = arith.mulf %73, %77 : vector<8x128xf32>
    %c16 = arith.constant 16 : index
    %c0_31 = arith.constant 0 : index
    %79 = vector.load %arg13[%c16, %c0_31] : memref<64x512xf32, #tpu.memory_space<vmem>>, vector<8x512xf32>
    %80 = arith.truncf %52 : vector<8x128xf32> to vector<8x128xbf16>
    %c0_32 = arith.constant 0 : index
    %c0_33 = arith.constant 0 : index
    %81 = vector.load %arg3[%c0_32, %c0_33] : memref<128x512xbf16, #tpu.memory_space<vmem>>, vector<128x512xbf16>
    %cst_34 = arith.constant dense<0.000000e+00> : vector<8x512xf32>
    %82 = tpu.matmul %80, %81, %cst_34 {dimension_numbers = #tpu.dot_dimension_numbers<[1], [0], [0], [1], [0, 0, 1, 1], [], []>} : vector<8x128xbf16>, vector<128x512xbf16>, vector<8x512xf32> -> vector<8x512xf32>
    %83 = arith.addf %79, %82 : vector<8x512xf32>
    %84 = vector.extract_strided_slice %83 {offsets = [0, 0], sizes = [8, 384], strides = [1, 1]} : vector<8x512xf32> to vector<8x384xf32>
    %85 = arith.negf %84 : vector<8x384xf32>
    %86 = math.exp %85 : vector<8x384xf32>
    %cst_35 = arith.constant 1.000000e+00 : f32
    %87 = vector.broadcast %cst_35 : f32 to vector<8x384xf32>
    %88 = arith.addf %87, %86 : vector<8x384xf32>
    %89 = arith.divf %87, %88 : vector<8x384xf32>
    %90 = vector.extract_strided_slice %83 {offsets = [0, 384], sizes = [8, 128], strides = [1, 1]} : vector<8x512xf32> to vector<8x128xf32>
    %91 = math.tanh %90 : vector<8x128xf32>
    %92 = vector.extract_strided_slice %89 {offsets = [0, 0], sizes = [8, 128], strides = [1, 1]} : vector<8x384xf32> to vector<8x128xf32>
    %93 = vector.extract_strided_slice %89 {offsets = [0, 128], sizes = [8, 128], strides = [1, 1]} : vector<8x384xf32> to vector<8x128xf32>
    %94 = vector.extract_strided_slice %89 {offsets = [0, 256], sizes = [8, 128], strides = [1, 1]} : vector<8x384xf32> to vector<8x128xf32>
    %95 = arith.mulf %93, %50 : vector<8x128xf32>
    %96 = arith.mulf %92, %91 : vector<8x128xf32>
    %97 = arith.addf %95, %96 : vector<8x128xf32>
    %98 = math.tanh %97 : vector<8x128xf32>
    %99 = arith.mulf %94, %98 : vector<8x128xf32>
    %100 = arith.truncf %52 : vector<8x128xf32> to vector<8x128xbf16>
    %c0_36 = arith.constant 0 : index
    %c0_37 = arith.constant 0 : index
    %101 = vector.load %arg5[%c0_36, %c0_37] : memref<128x512xbf16, #tpu.memory_space<vmem>>, vector<128x512xbf16>
    %cst_38 = arith.constant dense<0.000000e+00> : vector<8x512xf32>
    %102 = tpu.matmul %100, %101, %cst_38 {dimension_numbers = #tpu.dot_dimension_numbers<[1], [0], [0], [1], [0, 0, 1, 1], [], []>} : vector<8x128xbf16>, vector<128x512xbf16>, vector<8x512xf32> -> vector<8x512xf32>
    %c0_39 = arith.constant 0 : index
    %c0_40 = arith.constant 0 : index
    %103 = vector.load %arg7[%c0_39, %c0_40] : memref<1x512xf32, #tpu.memory_space<vmem>>, vector<1x512xf32>
    %104 = vector.broadcast %103 : vector<1x512xf32> to vector<8x512xf32>
    %105 = arith.addf %102, %104 : vector<8x512xf32>
    %106 = arith.truncf %78 : vector<8x128xf32> to vector<8x128xbf16>
    %c0_41 = arith.constant 0 : index
    %c0_42 = arith.constant 0 : index
    %107 = vector.load %arg6[%c0_41, %c0_42] : memref<128x512xbf16, #tpu.memory_space<vmem>>, vector<128x512xbf16>
    %cst_43 = arith.constant dense<0.000000e+00> : vector<8x512xf32>
    %108 = tpu.matmul %106, %107, %cst_43 {dimension_numbers = #tpu.dot_dimension_numbers<[1], [0], [0], [1], [0, 0, 1, 1], [], []>} : vector<8x128xbf16>, vector<128x512xbf16>, vector<8x512xf32> -> vector<8x512xf32>
    %109 = arith.addf %105, %108 : vector<8x512xf32>
    %110 = vector.extract_strided_slice %109 {offsets = [0, 0], sizes = [8, 384], strides = [1, 1]} : vector<8x512xf32> to vector<8x384xf32>
    %111 = arith.negf %110 : vector<8x384xf32>
    %112 = math.exp %111 : vector<8x384xf32>
    %cst_44 = arith.constant 1.000000e+00 : f32
    %113 = vector.broadcast %cst_44 : f32 to vector<8x384xf32>
    %114 = arith.addf %113, %112 : vector<8x384xf32>
    %115 = arith.divf %113, %114 : vector<8x384xf32>
    %116 = vector.extract_strided_slice %109 {offsets = [0, 384], sizes = [8, 128], strides = [1, 1]} : vector<8x512xf32> to vector<8x128xf32>
    %117 = math.tanh %116 : vector<8x128xf32>
    %118 = vector.extract_strided_slice %115 {offsets = [0, 0], sizes = [8, 128], strides = [1, 1]} : vector<8x384xf32> to vector<8x128xf32>
    %119 = vector.extract_strided_slice %115 {offsets = [0, 128], sizes = [8, 128], strides = [1, 1]} : vector<8x384xf32> to vector<8x128xf32>
    %120 = vector.extract_strided_slice %115 {offsets = [0, 256], sizes = [8, 128], strides = [1, 1]} : vector<8x384xf32> to vector<8x128xf32>
    %121 = arith.mulf %119, %76 : vector<8x128xf32>
    %122 = arith.mulf %118, %117 : vector<8x128xf32>
    %123 = arith.addf %121, %122 : vector<8x128xf32>
    %124 = math.tanh %123 : vector<8x128xf32>
    %125 = arith.mulf %120, %124 : vector<8x128xf32>
    %c24 = arith.constant 24 : index
    %c0_45 = arith.constant 0 : index
    %126 = vector.load %arg13[%c24, %c0_45] : memref<64x512xf32, #tpu.memory_space<vmem>>, vector<8x512xf32>
    %127 = arith.truncf %99 : vector<8x128xf32> to vector<8x128xbf16>
    %c0_46 = arith.constant 0 : index
    %c0_47 = arith.constant 0 : index
    %128 = vector.load %arg3[%c0_46, %c0_47] : memref<128x512xbf16, #tpu.memory_space<vmem>>, vector<128x512xbf16>
    %cst_48 = arith.constant dense<0.000000e+00> : vector<8x512xf32>
    %129 = tpu.matmul %127, %128, %cst_48 {dimension_numbers = #tpu.dot_dimension_numbers<[1], [0], [0], [1], [0, 0, 1, 1], [], []>} : vector<8x128xbf16>, vector<128x512xbf16>, vector<8x512xf32> -> vector<8x512xf32>
    %130 = arith.addf %126, %129 : vector<8x512xf32>
    %131 = vector.extract_strided_slice %130 {offsets = [0, 0], sizes = [8, 384], strides = [1, 1]} : vector<8x512xf32> to vector<8x384xf32>
    %132 = arith.negf %131 : vector<8x384xf32>
    %133 = math.exp %132 : vector<8x384xf32>
    %cst_49 = arith.constant 1.000000e+00 : f32
    %134 = vector.broadcast %cst_49 : f32 to vector<8x384xf32>
    %135 = arith.addf %134, %133 : vector<8x384xf32>
    %136 = arith.divf %134, %135 : vector<8x384xf32>
    %137 = vector.extract_strided_slice %130 {offsets = [0, 384], sizes = [8, 128], strides = [1, 1]} : vector<8x512xf32> to vector<8x128xf32>
    %138 = math.tanh %137 : vector<8x128xf32>
    %139 = vector.extract_strided_slice %136 {offsets = [0, 0], sizes = [8, 128], strides = [1, 1]} : vector<8x384xf32> to vector<8x128xf32>
    %140 = vector.extract_strided_slice %136 {offsets = [0, 128], sizes = [8, 128], strides = [1, 1]} : vector<8x384xf32> to vector<8x128xf32>
    %141 = vector.extract_strided_slice %136 {offsets = [0, 256], sizes = [8, 128], strides = [1, 1]} : vector<8x384xf32> to vector<8x128xf32>
    %142 = arith.mulf %140, %97 : vector<8x128xf32>
    %143 = arith.mulf %139, %138 : vector<8x128xf32>
    %144 = arith.addf %142, %143 : vector<8x128xf32>
    %145 = math.tanh %144 : vector<8x128xf32>
    %146 = arith.mulf %141, %145 : vector<8x128xf32>
    %147 = arith.truncf %99 : vector<8x128xf32> to vector<8x128xbf16>
    %c0_50 = arith.constant 0 : index
    %c0_51 = arith.constant 0 : index
    %148 = vector.load %arg5[%c0_50, %c0_51] : memref<128x512xbf16, #tpu.memory_space<vmem>>, vector<128x512xbf16>
    %cst_52 = arith.constant dense<0.000000e+00> : vector<8x512xf32>
    %149 = tpu.matmul %147, %148, %cst_52 {dimension_numbers = #tpu.dot_dimension_numbers<[1], [0], [0], [1], [0, 0, 1, 1], [], []>} : vector<8x128xbf16>, vector<128x512xbf16>, vector<8x512xf32> -> vector<8x512xf32>
    %c0_53 = arith.constant 0 : index
    %c0_54 = arith.constant 0 : index
    %150 = vector.load %arg7[%c0_53, %c0_54] : memref<1x512xf32, #tpu.memory_space<vmem>>, vector<1x512xf32>
    %151 = vector.broadcast %150 : vector<1x512xf32> to vector<8x512xf32>
    %152 = arith.addf %149, %151 : vector<8x512xf32>
    %153 = arith.truncf %125 : vector<8x128xf32> to vector<8x128xbf16>
    %c0_55 = arith.constant 0 : index
    %c0_56 = arith.constant 0 : index
    %154 = vector.load %arg6[%c0_55, %c0_56] : memref<128x512xbf16, #tpu.memory_space<vmem>>, vector<128x512xbf16>
    %cst_57 = arith.constant dense<0.000000e+00> : vector<8x512xf32>
    %155 = tpu.matmul %153, %154, %cst_57 {dimension_numbers = #tpu.dot_dimension_numbers<[1], [0], [0], [1], [0, 0, 1, 1], [], []>} : vector<8x128xbf16>, vector<128x512xbf16>, vector<8x512xf32> -> vector<8x512xf32>
    %156 = arith.addf %152, %155 : vector<8x512xf32>
    %157 = vector.extract_strided_slice %156 {offsets = [0, 0], sizes = [8, 384], strides = [1, 1]} : vector<8x512xf32> to vector<8x384xf32>
    %158 = arith.negf %157 : vector<8x384xf32>
    %159 = math.exp %158 : vector<8x384xf32>
    %cst_58 = arith.constant 1.000000e+00 : f32
    %160 = vector.broadcast %cst_58 : f32 to vector<8x384xf32>
    %161 = arith.addf %160, %159 : vector<8x384xf32>
    %162 = arith.divf %160, %161 : vector<8x384xf32>
    %163 = vector.extract_strided_slice %156 {offsets = [0, 384], sizes = [8, 128], strides = [1, 1]} : vector<8x512xf32> to vector<8x128xf32>
    %164 = math.tanh %163 : vector<8x128xf32>
    %165 = vector.extract_strided_slice %162 {offsets = [0, 0], sizes = [8, 128], strides = [1, 1]} : vector<8x384xf32> to vector<8x128xf32>
    %166 = vector.extract_strided_slice %162 {offsets = [0, 128], sizes = [8, 128], strides = [1, 1]} : vector<8x384xf32> to vector<8x128xf32>
    %167 = vector.extract_strided_slice %162 {offsets = [0, 256], sizes = [8, 128], strides = [1, 1]} : vector<8x384xf32> to vector<8x128xf32>
    %168 = arith.mulf %166, %123 : vector<8x128xf32>
    %169 = arith.mulf %165, %164 : vector<8x128xf32>
    %170 = arith.addf %168, %169 : vector<8x128xf32>
    %171 = math.tanh %170 : vector<8x128xf32>
    %172 = arith.mulf %167, %171 : vector<8x128xf32>
    %c32 = arith.constant 32 : index
    %c0_59 = arith.constant 0 : index
    %173 = vector.load %arg13[%c32, %c0_59] : memref<64x512xf32, #tpu.memory_space<vmem>>, vector<8x512xf32>
    %174 = arith.truncf %146 : vector<8x128xf32> to vector<8x128xbf16>
    %c0_60 = arith.constant 0 : index
    %c0_61 = arith.constant 0 : index
    %175 = vector.load %arg3[%c0_60, %c0_61] : memref<128x512xbf16, #tpu.memory_space<vmem>>, vector<128x512xbf16>
    %cst_62 = arith.constant dense<0.000000e+00> : vector<8x512xf32>
    %176 = tpu.matmul %174, %175, %cst_62 {dimension_numbers = #tpu.dot_dimension_numbers<[1], [0], [0], [1], [0, 0, 1, 1], [], []>} : vector<8x128xbf16>, vector<128x512xbf16>, vector<8x512xf32> -> vector<8x512xf32>
    %177 = arith.addf %173, %176 : vector<8x512xf32>
    %178 = vector.extract_strided_slice %177 {offsets = [0, 0], sizes = [8, 384], strides = [1, 1]} : vector<8x512xf32> to vector<8x384xf32>
    %179 = arith.negf %178 : vector<8x384xf32>
    %180 = math.exp %179 : vector<8x384xf32>
    %cst_63 = arith.constant 1.000000e+00 : f32
    %181 = vector.broadcast %cst_63 : f32 to vector<8x384xf32>
    %182 = arith.addf %181, %180 : vector<8x384xf32>
    %183 = arith.divf %181, %182 : vector<8x384xf32>
    %184 = vector.extract_strided_slice %177 {offsets = [0, 384], sizes = [8, 128], strides = [1, 1]} : vector<8x512xf32> to vector<8x128xf32>
    %185 = math.tanh %184 : vector<8x128xf32>
    %186 = vector.extract_strided_slice %183 {offsets = [0, 0], sizes = [8, 128], strides = [1, 1]} : vector<8x384xf32> to vector<8x128xf32>
    %187 = vector.extract_strided_slice %183 {offsets = [0, 128], sizes = [8, 128], strides = [1, 1]} : vector<8x384xf32> to vector<8x128xf32>
    %188 = vector.extract_strided_slice %183 {offsets = [0, 256], sizes = [8, 128], strides = [1, 1]} : vector<8x384xf32> to vector<8x128xf32>
    %189 = arith.mulf %187, %144 : vector<8x128xf32>
    %190 = arith.mulf %186, %185 : vector<8x128xf32>
    %191 = arith.addf %189, %190 : vector<8x128xf32>
    %192 = math.tanh %191 : vector<8x128xf32>
    %193 = arith.mulf %188, %192 : vector<8x128xf32>
    %194 = arith.truncf %146 : vector<8x128xf32> to vector<8x128xbf16>
    %c0_64 = arith.constant 0 : index
    %c0_65 = arith.constant 0 : index
    %195 = vector.load %arg5[%c0_64, %c0_65] : memref<128x512xbf16, #tpu.memory_space<vmem>>, vector<128x512xbf16>
    %cst_66 = arith.constant dense<0.000000e+00> : vector<8x512xf32>
    %196 = tpu.matmul %194, %195, %cst_66 {dimension_numbers = #tpu.dot_dimension_numbers<[1], [0], [0], [1], [0, 0, 1, 1], [], []>} : vector<8x128xbf16>, vector<128x512xbf16>, vector<8x512xf32> -> vector<8x512xf32>
    %c0_67 = arith.constant 0 : index
    %c0_68 = arith.constant 0 : index
    %197 = vector.load %arg7[%c0_67, %c0_68] : memref<1x512xf32, #tpu.memory_space<vmem>>, vector<1x512xf32>
    %198 = vector.broadcast %197 : vector<1x512xf32> to vector<8x512xf32>
    %199 = arith.addf %196, %198 : vector<8x512xf32>
    %200 = arith.truncf %172 : vector<8x128xf32> to vector<8x128xbf16>
    %c0_69 = arith.constant 0 : index
    %c0_70 = arith.constant 0 : index
    %201 = vector.load %arg6[%c0_69, %c0_70] : memref<128x512xbf16, #tpu.memory_space<vmem>>, vector<128x512xbf16>
    %cst_71 = arith.constant dense<0.000000e+00> : vector<8x512xf32>
    %202 = tpu.matmul %200, %201, %cst_71 {dimension_numbers = #tpu.dot_dimension_numbers<[1], [0], [0], [1], [0, 0, 1, 1], [], []>} : vector<8x128xbf16>, vector<128x512xbf16>, vector<8x512xf32> -> vector<8x512xf32>
    %203 = arith.addf %199, %202 : vector<8x512xf32>
    %204 = vector.extract_strided_slice %203 {offsets = [0, 0], sizes = [8, 384], strides = [1, 1]} : vector<8x512xf32> to vector<8x384xf32>
    %205 = arith.negf %204 : vector<8x384xf32>
    %206 = math.exp %205 : vector<8x384xf32>
    %cst_72 = arith.constant 1.000000e+00 : f32
    %207 = vector.broadcast %cst_72 : f32 to vector<8x384xf32>
    %208 = arith.addf %207, %206 : vector<8x384xf32>
    %209 = arith.divf %207, %208 : vector<8x384xf32>
    %210 = vector.extract_strided_slice %203 {offsets = [0, 384], sizes = [8, 128], strides = [1, 1]} : vector<8x512xf32> to vector<8x128xf32>
    %211 = math.tanh %210 : vector<8x128xf32>
    %212 = vector.extract_strided_slice %209 {offsets = [0, 0], sizes = [8, 128], strides = [1, 1]} : vector<8x384xf32> to vector<8x128xf32>
    %213 = vector.extract_strided_slice %209 {offsets = [0, 128], sizes = [8, 128], strides = [1, 1]} : vector<8x384xf32> to vector<8x128xf32>
    %214 = vector.extract_strided_slice %209 {offsets = [0, 256], sizes = [8, 128], strides = [1, 1]} : vector<8x384xf32> to vector<8x128xf32>
    %215 = arith.mulf %213, %170 : vector<8x128xf32>
    %216 = arith.mulf %212, %211 : vector<8x128xf32>
    %217 = arith.addf %215, %216 : vector<8x128xf32>
    %218 = math.tanh %217 : vector<8x128xf32>
    %219 = arith.mulf %214, %218 : vector<8x128xf32>
    %c40 = arith.constant 40 : index
    %c0_73 = arith.constant 0 : index
    %220 = vector.load %arg13[%c40, %c0_73] : memref<64x512xf32, #tpu.memory_space<vmem>>, vector<8x512xf32>
    %221 = arith.truncf %193 : vector<8x128xf32> to vector<8x128xbf16>
    %c0_74 = arith.constant 0 : index
    %c0_75 = arith.constant 0 : index
    %222 = vector.load %arg3[%c0_74, %c0_75] : memref<128x512xbf16, #tpu.memory_space<vmem>>, vector<128x512xbf16>
    %cst_76 = arith.constant dense<0.000000e+00> : vector<8x512xf32>
    %223 = tpu.matmul %221, %222, %cst_76 {dimension_numbers = #tpu.dot_dimension_numbers<[1], [0], [0], [1], [0, 0, 1, 1], [], []>} : vector<8x128xbf16>, vector<128x512xbf16>, vector<8x512xf32> -> vector<8x512xf32>
    %224 = arith.addf %220, %223 : vector<8x512xf32>
    %225 = vector.extract_strided_slice %224 {offsets = [0, 0], sizes = [8, 384], strides = [1, 1]} : vector<8x512xf32> to vector<8x384xf32>
    %226 = arith.negf %225 : vector<8x384xf32>
    %227 = math.exp %226 : vector<8x384xf32>
    %cst_77 = arith.constant 1.000000e+00 : f32
    %228 = vector.broadcast %cst_77 : f32 to vector<8x384xf32>
    %229 = arith.addf %228, %227 : vector<8x384xf32>
    %230 = arith.divf %228, %229 : vector<8x384xf32>
    %231 = vector.extract_strided_slice %224 {offsets = [0, 384], sizes = [8, 128], strides = [1, 1]} : vector<8x512xf32> to vector<8x128xf32>
    %232 = math.tanh %231 : vector<8x128xf32>
    %233 = vector.extract_strided_slice %230 {offsets = [0, 0], sizes = [8, 128], strides = [1, 1]} : vector<8x384xf32> to vector<8x128xf32>
    %234 = vector.extract_strided_slice %230 {offsets = [0, 128], sizes = [8, 128], strides = [1, 1]} : vector<8x384xf32> to vector<8x128xf32>
    %235 = vector.extract_strided_slice %230 {offsets = [0, 256], sizes = [8, 128], strides = [1, 1]} : vector<8x384xf32> to vector<8x128xf32>
    %236 = arith.mulf %234, %191 : vector<8x128xf32>
    %237 = arith.mulf %233, %232 : vector<8x128xf32>
    %238 = arith.addf %236, %237 : vector<8x128xf32>
    %239 = math.tanh %238 : vector<8x128xf32>
    %240 = arith.mulf %235, %239 : vector<8x128xf32>
    %241 = arith.truncf %193 : vector<8x128xf32> to vector<8x128xbf16>
    %c0_78 = arith.constant 0 : index
    %c0_79 = arith.constant 0 : index
    %242 = vector.load %arg5[%c0_78, %c0_79] : memref<128x512xbf16, #tpu.memory_space<vmem>>, vector<128x512xbf16>
    %cst_80 = arith.constant dense<0.000000e+00> : vector<8x512xf32>
    %243 = tpu.matmul %241, %242, %cst_80 {dimension_numbers = #tpu.dot_dimension_numbers<[1], [0], [0], [1], [0, 0, 1, 1], [], []>} : vector<8x128xbf16>, vector<128x512xbf16>, vector<8x512xf32> -> vector<8x512xf32>
    %c0_81 = arith.constant 0 : index
    %c0_82 = arith.constant 0 : index
    %244 = vector.load %arg7[%c0_81, %c0_82] : memref<1x512xf32, #tpu.memory_space<vmem>>, vector<1x512xf32>
    %245 = vector.broadcast %244 : vector<1x512xf32> to vector<8x512xf32>
    %246 = arith.addf %243, %245 : vector<8x512xf32>
    %247 = arith.truncf %219 : vector<8x128xf32> to vector<8x128xbf16>
    %c0_83 = arith.constant 0 : index
    %c0_84 = arith.constant 0 : index
    %248 = vector.load %arg6[%c0_83, %c0_84] : memref<128x512xbf16, #tpu.memory_space<vmem>>, vector<128x512xbf16>
    %cst_85 = arith.constant dense<0.000000e+00> : vector<8x512xf32>
    %249 = tpu.matmul %247, %248, %cst_85 {dimension_numbers = #tpu.dot_dimension_numbers<[1], [0], [0], [1], [0, 0, 1, 1], [], []>} : vector<8x128xbf16>, vector<128x512xbf16>, vector<8x512xf32> -> vector<8x512xf32>
    %250 = arith.addf %246, %249 : vector<8x512xf32>
    %251 = vector.extract_strided_slice %250 {offsets = [0, 0], sizes = [8, 384], strides = [1, 1]} : vector<8x512xf32> to vector<8x384xf32>
    %252 = arith.negf %251 : vector<8x384xf32>
    %253 = math.exp %252 : vector<8x384xf32>
    %cst_86 = arith.constant 1.000000e+00 : f32
    %254 = vector.broadcast %cst_86 : f32 to vector<8x384xf32>
    %255 = arith.addf %254, %253 : vector<8x384xf32>
    %256 = arith.divf %254, %255 : vector<8x384xf32>
    %257 = vector.extract_strided_slice %250 {offsets = [0, 384], sizes = [8, 128], strides = [1, 1]} : vector<8x512xf32> to vector<8x128xf32>
    %258 = math.tanh %257 : vector<8x128xf32>
    %259 = vector.extract_strided_slice %256 {offsets = [0, 0], sizes = [8, 128], strides = [1, 1]} : vector<8x384xf32> to vector<8x128xf32>
    %260 = vector.extract_strided_slice %256 {offsets = [0, 128], sizes = [8, 128], strides = [1, 1]} : vector<8x384xf32> to vector<8x128xf32>
    %261 = vector.extract_strided_slice %256 {offsets = [0, 256], sizes = [8, 128], strides = [1, 1]} : vector<8x384xf32> to vector<8x128xf32>
    %262 = arith.mulf %260, %217 : vector<8x128xf32>
    %263 = arith.mulf %259, %258 : vector<8x128xf32>
    %264 = arith.addf %262, %263 : vector<8x128xf32>
    %265 = math.tanh %264 : vector<8x128xf32>
    %266 = arith.mulf %261, %265 : vector<8x128xf32>
    %c48 = arith.constant 48 : index
    %c0_87 = arith.constant 0 : index
    %267 = vector.load %arg13[%c48, %c0_87] : memref<64x512xf32, #tpu.memory_space<vmem>>, vector<8x512xf32>
    %268 = arith.truncf %240 : vector<8x128xf32> to vector<8x128xbf16>
    %c0_88 = arith.constant 0 : index
    %c0_89 = arith.constant 0 : index
    %269 = vector.load %arg3[%c0_88, %c0_89] : memref<128x512xbf16, #tpu.memory_space<vmem>>, vector<128x512xbf16>
    %cst_90 = arith.constant dense<0.000000e+00> : vector<8x512xf32>
    %270 = tpu.matmul %268, %269, %cst_90 {dimension_numbers = #tpu.dot_dimension_numbers<[1], [0], [0], [1], [0, 0, 1, 1], [], []>} : vector<8x128xbf16>, vector<128x512xbf16>, vector<8x512xf32> -> vector<8x512xf32>
    %271 = arith.addf %267, %270 : vector<8x512xf32>
    %272 = vector.extract_strided_slice %271 {offsets = [0, 0], sizes = [8, 384], strides = [1, 1]} : vector<8x512xf32> to vector<8x384xf32>
    %273 = arith.negf %272 : vector<8x384xf32>
    %274 = math.exp %273 : vector<8x384xf32>
    %cst_91 = arith.constant 1.000000e+00 : f32
    %275 = vector.broadcast %cst_91 : f32 to vector<8x384xf32>
    %276 = arith.addf %275, %274 : vector<8x384xf32>
    %277 = arith.divf %275, %276 : vector<8x384xf32>
    %278 = vector.extract_strided_slice %271 {offsets = [0, 384], sizes = [8, 128], strides = [1, 1]} : vector<8x512xf32> to vector<8x128xf32>
    %279 = math.tanh %278 : vector<8x128xf32>
    %280 = vector.extract_strided_slice %277 {offsets = [0, 0], sizes = [8, 128], strides = [1, 1]} : vector<8x384xf32> to vector<8x128xf32>
    %281 = vector.extract_strided_slice %277 {offsets = [0, 128], sizes = [8, 128], strides = [1, 1]} : vector<8x384xf32> to vector<8x128xf32>
    %282 = vector.extract_strided_slice %277 {offsets = [0, 256], sizes = [8, 128], strides = [1, 1]} : vector<8x384xf32> to vector<8x128xf32>
    %283 = arith.mulf %281, %238 : vector<8x128xf32>
    %284 = arith.mulf %280, %279 : vector<8x128xf32>
    %285 = arith.addf %283, %284 : vector<8x128xf32>
    %286 = math.tanh %285 : vector<8x128xf32>
    %287 = arith.mulf %282, %286 : vector<8x128xf32>
    %288 = arith.truncf %240 : vector<8x128xf32> to vector<8x128xbf16>
    %c0_92 = arith.constant 0 : index
    %c0_93 = arith.constant 0 : index
    %289 = vector.load %arg5[%c0_92, %c0_93] : memref<128x512xbf16, #tpu.memory_space<vmem>>, vector<128x512xbf16>
    %cst_94 = arith.constant dense<0.000000e+00> : vector<8x512xf32>
    %290 = tpu.matmul %288, %289, %cst_94 {dimension_numbers = #tpu.dot_dimension_numbers<[1], [0], [0], [1], [0, 0, 1, 1], [], []>} : vector<8x128xbf16>, vector<128x512xbf16>, vector<8x512xf32> -> vector<8x512xf32>
    %c0_95 = arith.constant 0 : index
    %c0_96 = arith.constant 0 : index
    %291 = vector.load %arg7[%c0_95, %c0_96] : memref<1x512xf32, #tpu.memory_space<vmem>>, vector<1x512xf32>
    %292 = vector.broadcast %291 : vector<1x512xf32> to vector<8x512xf32>
    %293 = arith.addf %290, %292 : vector<8x512xf32>
    %294 = arith.truncf %266 : vector<8x128xf32> to vector<8x128xbf16>
    %c0_97 = arith.constant 0 : index
    %c0_98 = arith.constant 0 : index
    %295 = vector.load %arg6[%c0_97, %c0_98] : memref<128x512xbf16, #tpu.memory_space<vmem>>, vector<128x512xbf16>
    %cst_99 = arith.constant dense<0.000000e+00> : vector<8x512xf32>
    %296 = tpu.matmul %294, %295, %cst_99 {dimension_numbers = #tpu.dot_dimension_numbers<[1], [0], [0], [1], [0, 0, 1, 1], [], []>} : vector<8x128xbf16>, vector<128x512xbf16>, vector<8x512xf32> -> vector<8x512xf32>
    %297 = arith.addf %293, %296 : vector<8x512xf32>
    %298 = vector.extract_strided_slice %297 {offsets = [0, 0], sizes = [8, 384], strides = [1, 1]} : vector<8x512xf32> to vector<8x384xf32>
    %299 = arith.negf %298 : vector<8x384xf32>
    %300 = math.exp %299 : vector<8x384xf32>
    %cst_100 = arith.constant 1.000000e+00 : f32
    %301 = vector.broadcast %cst_100 : f32 to vector<8x384xf32>
    %302 = arith.addf %301, %300 : vector<8x384xf32>
    %303 = arith.divf %301, %302 : vector<8x384xf32>
    %304 = vector.extract_strided_slice %297 {offsets = [0, 384], sizes = [8, 128], strides = [1, 1]} : vector<8x512xf32> to vector<8x128xf32>
    %305 = math.tanh %304 : vector<8x128xf32>
    %306 = vector.extract_strided_slice %303 {offsets = [0, 0], sizes = [8, 128], strides = [1, 1]} : vector<8x384xf32> to vector<8x128xf32>
    %307 = vector.extract_strided_slice %303 {offsets = [0, 128], sizes = [8, 128], strides = [1, 1]} : vector<8x384xf32> to vector<8x128xf32>
    %308 = vector.extract_strided_slice %303 {offsets = [0, 256], sizes = [8, 128], strides = [1, 1]} : vector<8x384xf32> to vector<8x128xf32>
    %309 = arith.mulf %307, %264 : vector<8x128xf32>
    %310 = arith.mulf %306, %305 : vector<8x128xf32>
    %311 = arith.addf %309, %310 : vector<8x128xf32>
    %312 = math.tanh %311 : vector<8x128xf32>
    %313 = arith.mulf %308, %312 : vector<8x128xf32>
    %c56 = arith.constant 56 : index
    %c0_101 = arith.constant 0 : index
    %314 = vector.load %arg13[%c56, %c0_101] : memref<64x512xf32, #tpu.memory_space<vmem>>, vector<8x512xf32>
    %315 = arith.truncf %287 : vector<8x128xf32> to vector<8x128xbf16>
    %c0_102 = arith.constant 0 : index
    %c0_103 = arith.constant 0 : index
    %316 = vector.load %arg3[%c0_102, %c0_103] : memref<128x512xbf16, #tpu.memory_space<vmem>>, vector<128x512xbf16>
    %cst_104 = arith.constant dense<0.000000e+00> : vector<8x512xf32>
    %317 = tpu.matmul %315, %316, %cst_104 {dimension_numbers = #tpu.dot_dimension_numbers<[1], [0], [0], [1], [0, 0, 1, 1], [], []>} : vector<8x128xbf16>, vector<128x512xbf16>, vector<8x512xf32> -> vector<8x512xf32>
    %318 = arith.addf %314, %317 : vector<8x512xf32>
    %319 = vector.extract_strided_slice %318 {offsets = [0, 0], sizes = [8, 384], strides = [1, 1]} : vector<8x512xf32> to vector<8x384xf32>
    %320 = arith.negf %319 : vector<8x384xf32>
    %321 = math.exp %320 : vector<8x384xf32>
    %cst_105 = arith.constant 1.000000e+00 : f32
    %322 = vector.broadcast %cst_105 : f32 to vector<8x384xf32>
    %323 = arith.addf %322, %321 : vector<8x384xf32>
    %324 = arith.divf %322, %323 : vector<8x384xf32>
    %325 = vector.extract_strided_slice %318 {offsets = [0, 384], sizes = [8, 128], strides = [1, 1]} : vector<8x512xf32> to vector<8x128xf32>
    %326 = math.tanh %325 : vector<8x128xf32>
    %327 = vector.extract_strided_slice %324 {offsets = [0, 0], sizes = [8, 128], strides = [1, 1]} : vector<8x384xf32> to vector<8x128xf32>
    %328 = vector.extract_strided_slice %324 {offsets = [0, 128], sizes = [8, 128], strides = [1, 1]} : vector<8x384xf32> to vector<8x128xf32>
    %329 = vector.extract_strided_slice %324 {offsets = [0, 256], sizes = [8, 128], strides = [1, 1]} : vector<8x384xf32> to vector<8x128xf32>
    %330 = arith.mulf %328, %285 : vector<8x128xf32>
    %331 = arith.mulf %327, %326 : vector<8x128xf32>
    %332 = arith.addf %330, %331 : vector<8x128xf32>
    %333 = math.tanh %332 : vector<8x128xf32>
    %334 = arith.mulf %329, %333 : vector<8x128xf32>
    %335 = arith.truncf %287 : vector<8x128xf32> to vector<8x128xbf16>
    %c0_106 = arith.constant 0 : index
    %c0_107 = arith.constant 0 : index
    %336 = vector.load %arg5[%c0_106, %c0_107] : memref<128x512xbf16, #tpu.memory_space<vmem>>, vector<128x512xbf16>
    %cst_108 = arith.constant dense<0.000000e+00> : vector<8x512xf32>
    %337 = tpu.matmul %335, %336, %cst_108 {dimension_numbers = #tpu.dot_dimension_numbers<[1], [0], [0], [1], [0, 0, 1, 1], [], []>} : vector<8x128xbf16>, vector<128x512xbf16>, vector<8x512xf32> -> vector<8x512xf32>
    %c0_109 = arith.constant 0 : index
    %c0_110 = arith.constant 0 : index
    %338 = vector.load %arg7[%c0_109, %c0_110] : memref<1x512xf32, #tpu.memory_space<vmem>>, vector<1x512xf32>
    %339 = vector.broadcast %338 : vector<1x512xf32> to vector<8x512xf32>
    %340 = arith.addf %337, %339 : vector<8x512xf32>
    %341 = arith.truncf %313 : vector<8x128xf32> to vector<8x128xbf16>
    %c0_111 = arith.constant 0 : index
    %c0_112 = arith.constant 0 : index
    %342 = vector.load %arg6[%c0_111, %c0_112] : memref<128x512xbf16, #tpu.memory_space<vmem>>, vector<128x512xbf16>
    %cst_113 = arith.constant dense<0.000000e+00> : vector<8x512xf32>
    %343 = tpu.matmul %341, %342, %cst_113 {dimension_numbers = #tpu.dot_dimension_numbers<[1], [0], [0], [1], [0, 0, 1, 1], [], []>} : vector<8x128xbf16>, vector<128x512xbf16>, vector<8x512xf32> -> vector<8x512xf32>
    %344 = arith.addf %340, %343 : vector<8x512xf32>
    %345 = vector.extract_strided_slice %344 {offsets = [0, 0], sizes = [8, 384], strides = [1, 1]} : vector<8x512xf32> to vector<8x384xf32>
    %346 = arith.negf %345 : vector<8x384xf32>
    %347 = math.exp %346 : vector<8x384xf32>
    %cst_114 = arith.constant 1.000000e+00 : f32
    %348 = vector.broadcast %cst_114 : f32 to vector<8x384xf32>
    %349 = arith.addf %348, %347 : vector<8x384xf32>
    %350 = arith.divf %348, %349 : vector<8x384xf32>
    %351 = vector.extract_strided_slice %344 {offsets = [0, 384], sizes = [8, 128], strides = [1, 1]} : vector<8x512xf32> to vector<8x128xf32>
    %352 = math.tanh %351 : vector<8x128xf32>
    %353 = vector.extract_strided_slice %350 {offsets = [0, 0], sizes = [8, 128], strides = [1, 1]} : vector<8x384xf32> to vector<8x128xf32>
    %354 = vector.extract_strided_slice %350 {offsets = [0, 128], sizes = [8, 128], strides = [1, 1]} : vector<8x384xf32> to vector<8x128xf32>
    %355 = vector.extract_strided_slice %350 {offsets = [0, 256], sizes = [8, 128], strides = [1, 1]} : vector<8x384xf32> to vector<8x128xf32>
    %356 = arith.mulf %354, %311 : vector<8x128xf32>
    %357 = arith.mulf %353, %352 : vector<8x128xf32>
    %358 = arith.addf %356, %357 : vector<8x128xf32>
    %359 = math.tanh %358 : vector<8x128xf32>
    %360 = arith.mulf %355, %359 : vector<8x128xf32>
    %361 = arith.truncf %334 : vector<8x128xf32> to vector<8x128xbf16>
    %c0_115 = arith.constant 0 : index
    %c0_116 = arith.constant 0 : index
    %362 = vector.load %arg5[%c0_115, %c0_116] : memref<128x512xbf16, #tpu.memory_space<vmem>>, vector<128x512xbf16>
    %cst_117 = arith.constant dense<0.000000e+00> : vector<8x512xf32>
    %363 = tpu.matmul %361, %362, %cst_117 {dimension_numbers = #tpu.dot_dimension_numbers<[1], [0], [0], [1], [0, 0, 1, 1], [], []>} : vector<8x128xbf16>, vector<128x512xbf16>, vector<8x512xf32> -> vector<8x512xf32>
    %c0_118 = arith.constant 0 : index
    %c0_119 = arith.constant 0 : index
    %364 = vector.load %arg7[%c0_118, %c0_119] : memref<1x512xf32, #tpu.memory_space<vmem>>, vector<1x512xf32>
    %365 = vector.broadcast %364 : vector<1x512xf32> to vector<8x512xf32>
    %366 = arith.addf %363, %365 : vector<8x512xf32>
    %367 = arith.truncf %360 : vector<8x128xf32> to vector<8x128xbf16>
    %c0_120 = arith.constant 0 : index
    %c0_121 = arith.constant 0 : index
    %368 = vector.load %arg6[%c0_120, %c0_121] : memref<128x512xbf16, #tpu.memory_space<vmem>>, vector<128x512xbf16>
    %cst_122 = arith.constant dense<0.000000e+00> : vector<8x512xf32>
    %369 = tpu.matmul %367, %368, %cst_122 {dimension_numbers = #tpu.dot_dimension_numbers<[1], [0], [0], [1], [0, 0, 1, 1], [], []>} : vector<8x128xbf16>, vector<128x512xbf16>, vector<8x512xf32> -> vector<8x512xf32>
    %370 = arith.addf %366, %369 : vector<8x512xf32>
    %371 = vector.extract_strided_slice %370 {offsets = [0, 0], sizes = [8, 384], strides = [1, 1]} : vector<8x512xf32> to vector<8x384xf32>
    %372 = arith.negf %371 : vector<8x384xf32>
    %373 = math.exp %372 : vector<8x384xf32>
    %cst_123 = arith.constant 1.000000e+00 : f32
    %374 = vector.broadcast %cst_123 : f32 to vector<8x384xf32>
    %375 = arith.addf %374, %373 : vector<8x384xf32>
    %376 = arith.divf %374, %375 : vector<8x384xf32>
    %377 = vector.extract_strided_slice %370 {offsets = [0, 384], sizes = [8, 128], strides = [1, 1]} : vector<8x512xf32> to vector<8x128xf32>
    %378 = math.tanh %377 : vector<8x128xf32>
    %379 = vector.extract_strided_slice %376 {offsets = [0, 0], sizes = [8, 128], strides = [1, 1]} : vector<8x384xf32> to vector<8x128xf32>
    %380 = vector.extract_strided_slice %376 {offsets = [0, 128], sizes = [8, 128], strides = [1, 1]} : vector<8x384xf32> to vector<8x128xf32>
    %381 = vector.extract_strided_slice %376 {offsets = [0, 256], sizes = [8, 128], strides = [1, 1]} : vector<8x384xf32> to vector<8x128xf32>
    %382 = arith.mulf %380, %358 : vector<8x128xf32>
    %383 = arith.mulf %379, %378 : vector<8x128xf32>
    %384 = arith.addf %382, %383 : vector<8x128xf32>
    %385 = math.tanh %384 : vector<8x128xf32>
    %386 = arith.mulf %381, %385 : vector<8x128xf32>
    %387 = tpu.concatenate %334, %386 in 0 : vector<8x128xf32>, vector<8x128xf32> -> vector<16x128xf32>
    %388 = arith.truncf %387 : vector<16x128xf32> to vector<16x128xbf16>
    %c0_124 = arith.constant 0 : index
    %c0_125 = arith.constant 0 : index
    %389 = vector.load %arg8[%c0_124, %c0_125] : memref<128x4xbf16, #tpu.memory_space<vmem>>, vector<128x4xbf16>
    %cst_126 = arith.constant dense<0.000000e+00> : vector<16x4xf32>
    %390 = tpu.matmul %388, %389, %cst_126 {dimension_numbers = #tpu.dot_dimension_numbers<[1], [0], [0], [1], [0, 0, 1, 1], [], []>} : vector<16x128xbf16>, vector<128x4xbf16>, vector<16x4xf32> -> vector<16x4xf32>
    %c0_127 = arith.constant 0 : index
    %c0_128 = arith.constant 0 : index
    %391 = vector.load %arg9[%c0_127, %c0_128] : memref<1x4xf32, #tpu.memory_space<vmem>>, vector<1x4xf32>
    %392 = vector.broadcast %391 : vector<1x4xf32> to vector<16x4xf32>
    %393 = arith.addf %390, %392 : vector<16x4xf32>
    %c0_129 = arith.constant 0 : index
    %c0_130 = arith.constant 0 : index
    %394 = vector.load %arg10[%c0_129, %c0_130] : memref<16x4xf32, #tpu.memory_space<vmem>>, vector<16x4xf32>
    tpu.vector_store %arg10[%c0_129, %c0_130], %393 {strides = array<i32>} : memref<16x4xf32, #tpu.memory_space<vmem>>, vector<16x4xf32>,
    %c0_131 = arith.constant 0 : index
    %c0_132 = arith.constant 0 : index
    %c0_133 = arith.constant 0 : index
    %395 = vector.load %arg11[%c0_131, %c0_132, %c0_133] : memref<2x8x128xf32, #tpu.memory_space<vmem>>, vector<1x8x128xf32>
    %396 = vector.shape_cast %395 : vector<1x8x128xf32> to vector<8x128xf32>
    %397 = vector.shape_cast %334 : vector<8x128xf32> to vector<1x8x128xf32>
    tpu.vector_store %arg11[%c0_131, %c0_132, %c0_133], %397 {strides = array<i32>} : memref<2x8x128xf32, #tpu.memory_space<vmem>>, vector<1x8x128xf32>,
    %c0_134 = arith.constant 0 : index
    %c0_135 = arith.constant 0 : index
    %c0_136 = arith.constant 0 : index
    %398 = vector.load %arg12[%c0_134, %c0_135, %c0_136] : memref<2x8x128xf32, #tpu.memory_space<vmem>>, vector<1x8x128xf32>
    %399 = vector.shape_cast %398 : vector<1x8x128xf32> to vector<8x128xf32>
    %400 = vector.shape_cast %332 : vector<8x128xf32> to vector<1x8x128xf32>
    tpu.vector_store %arg12[%c0_134, %c0_135, %c0_136], %400 {strides = array<i32>} : memref<2x8x128xf32, #tpu.memory_space<vmem>>, vector<1x8x128xf32>,
    %c1 = arith.constant 1 : index
    %c0_137 = arith.constant 0 : index
    %c0_138 = arith.constant 0 : index
    %401 = vector.load %arg11[%c1, %c0_137, %c0_138] : memref<2x8x128xf32, #tpu.memory_space<vmem>>, vector<1x8x128xf32>
    %402 = vector.shape_cast %401 : vector<1x8x128xf32> to vector<8x128xf32>
    %403 = vector.shape_cast %386 : vector<8x128xf32> to vector<1x8x128xf32>
    tpu.vector_store %arg11[%c1, %c0_137, %c0_138], %403 {strides = array<i32>} : memref<2x8x128xf32, #tpu.memory_space<vmem>>, vector<1x8x128xf32>,
    %c1_139 = arith.constant 1 : index
    %c0_140 = arith.constant 0 : index
    %c0_141 = arith.constant 0 : index
    %404 = vector.load %arg12[%c1_139, %c0_140, %c0_141] : memref<2x8x128xf32, #tpu.memory_space<vmem>>, vector<1x8x128xf32>
    %405 = vector.shape_cast %404 : vector<1x8x128xf32> to vector<8x128xf32>
    %406 = vector.shape_cast %384 : vector<8x128xf32> to vector<1x8x128xf32>
    tpu.vector_store %arg12[%c1_139, %c0_140, %c0_141], %406 {strides = array<i32>} : memref<2x8x128xf32, #tpu.memory_space<vmem>>, vector<1x8x128xf32>,
    return
  }
  func.func @transform_0(%arg0: i32) -> (i32, i32) {
    %c0_i32 = arith.constant 0 : i32
    %c0_i32_0 = arith.constant 0 : i32
    %c0_i32_1 = arith.constant 0 : i32
    return %c0_i32, %c0_i32_0 : i32, i32
  }
  func.func @transform_1(%arg0: i32) -> (i32, i32) {
    %c0_i32 = arith.constant 0 : i32
    %c0_i32_0 = arith.constant 0 : i32
    %c0_i32_1 = arith.constant 0 : i32
    return %c0_i32, %c0_i32_0 : i32, i32
  }
  func.func @transform_2(%arg0: i32) -> (i32, i32) {
    %c0_i32 = arith.constant 0 : i32
    %c0_i32_0 = arith.constant 0 : i32
    %c0_i32_1 = arith.constant 0 : i32
    return %c0_i32, %c0_i32_0 : i32, i32
  }
  func.func @transform_3(%arg0: i32) -> (i32, i32) {
    %c0_i32 = arith.constant 0 : i32
    %c0_i32_0 = arith.constant 0 : i32
    %c0_i32_1 = arith.constant 0 : i32
    return %c0_i32, %c0_i32_0 : i32, i32
  }
  func.func @transform_4(%arg0: i32) -> (i32, i32) {
    %c0_i32 = arith.constant 0 : i32
    %c0_i32_0 = arith.constant 0 : i32
    %c0_i32_1 = arith.constant 0 : i32
    return %c0_i32, %c0_i32_0 : i32, i32
  }
  func.func @transform_5(%arg0: i32) -> (i32, i32) {
    %c0_i32 = arith.constant 0 : i32
    %c0_i32_0 = arith.constant 0 : i32
    %c0_i32_1 = arith.constant 0 : i32
    return %c0_i32, %c0_i32_0 : i32, i32
  }
  func.func @transform_6(%arg0: i32) -> (i32, i32) {
    %c0_i32 = arith.constant 0 : i32
    %c0_i32_0 = arith.constant 0 : i32
    %c0_i32_1 = arith.constant 0 : i32
    return %c0_i32, %c0_i32_0 : i32, i32
  }
  func.func @transform_7(%arg0: i32) -> (i32, i32) {
    %c0_i32 = arith.constant 0 : i32
    %c0_i32_0 = arith.constant 0 : i32
    %c0_i32_1 = arith.constant 0 : i32
    return %c0_i32, %c0_i32_0 : i32, i32
  }
  func.func @transform_8(%arg0: i32) -> (i32, i32) {
    %c0_i32 = arith.constant 0 : i32
    %c0_i32_0 = arith.constant 0 : i32
    %c0_i32_1 = arith.constant 0 : i32
    return %c0_i32, %c0_i32_0 : i32, i32
  }
  func.func @transform_9(%arg0: i32) -> (i32, i32) {
    %c0_i32 = arith.constant 0 : i32
    %c0_i32_0 = arith.constant 0 : i32
    %c0_i32_1 = arith.constant 0 : i32
    return %c0_i32, %c0_i32_0 : i32, i32
  }
  func.func @transform_10(%arg0: i32) -> (i32, i32, i32) {
    %c0_i32 = arith.constant 0 : i32
    %c0_i32_0 = arith.constant 0 : i32
    %c0_i32_1 = arith.constant 0 : i32
    %c0_i32_2 = arith.constant 0 : i32
    return %c0_i32, %c0_i32_0, %c0_i32_1 : i32, i32, i32
  }
  func.func @transform_11(%arg0: i32) -> (i32, i32, i32) {
    %c0_i32 = arith.constant 0 : i32
    %c0_i32_0 = arith.constant 0 : i32
    %c0_i32_1 = arith.constant 0 : i32
    %c0_i32_2 = arith.constant 0 : i32
    return %c0_i32, %c0_i32_0, %c0_i32_1 : i32, i32, i32
  }
}

</mosaic_0001>

<bundles_post_ra>
// kernel: lstm_forward.1
= control target key start
LH: loop header
LB: loop body
LE: loop exit
PB: predicated region body
PF: predicated region fallthrough
CT: control target
= control target key end

     0   :  { %17 = vsyncpa [#allocation4], 0  ;;  %s5915_s0 = inlined_call_operand.vmem [shape: bf16[64,4], index: 0, kind: input, shape index: {}]   ;;  %s5916_s1 = inlined_call_operand.vmem [shape: bf16[4,512], index: 1, kind: input, shape index: {}]   ;;  %s5917_s2 = inlined_call_operand.hbm [shape: bf16[128,512], index: 2, kind: input, shape index: {}]   ;;  %s5918_s3 = inlined_call_operand.vmem [shape: f32[1,512], index: 3, kind: input, shape index: {}]   ;;  %s5919_s4 = inlined_call_operand.hbm [shape: bf16[128,512], index: 4, kind: input, shape index: {}]   ;;  %s5920_s5 = inlined_call_operand.hbm [shape: bf16[128,512], index: 5, kind: input, shape index: {}]   ;;  %s5921_s6 = inlined_call_operand.vmem [shape: f32[1,512], index: 6, kind: input, shape index: {}]   ;;  %s5922_s7 = inlined_call_operand.vmem [shape: bf16[128,4], index: 7, kind: input, shape index: {}]   ;;  %s5923_s8 = inlined_call_operand.vmem [shape: f32[1,4], index: 8, kind: input, shape index: {}]   ;;  %s5924_s9 = inlined_call_operand.vmem [shape: f32[16,4], index: 9, kind: output, shape index: {0}]   ;;  %s5925_s10 = inlined_call_operand.vmem [shape: f32[2,8,128], index: 10, kind: output, shape index: {1}]   ;;  %s5926_s11 = inlined_call_operand.vmem [shape: f32[2,8,128], index: 11, kind: output, shape index: {2}]  }
   0x1   :  { %18 = vsyncpa [#allocation6], 0  ;;  %s42_s19 = sshll.u32 %s5919_s4, 4  ;;  %s4302_s20 = smov [#allocation5]   ;;  %s43_s19 = int_to_ptr.hbm [resolvable:$true] %s42_s19 }
   0x2   :  { %s44_s21 = sshll.u32 %s4302_s20, 4  ;;  %s27_s24 = sshll.u32 %s5917_s2, 4  ;;  %s45_s21 = int_to_ptr.vmem [resolvable:$true] %s44_s21  ;;  %s28_s24 = int_to_ptr.hbm [resolvable:$true] %s27_s24 }
   0x3   :  { %s4303_s25 = smov 256   ;;  %s4304_s26 = smov 16  }
   0x4   :  { %50 = dma.hbm_to_vmem [thread:$0]  %s43_s19, 4096, %s45_s21, [#allocation6], %s4303_s25, %s4303_s25, %s4304_s26  }
   0x5   :  { %s4305_s27 = smov [#allocation3]   ;;  %s55_s12 = sshll.u32 %s5920_s5, 4  ;;  %s56_s12 = int_to_ptr.hbm [resolvable:$true] %s55_s12 }
   0x6   :  { %s29_s28 = sshll.u32 %s4305_s27, 4  ;;  %s4306_s4 = smov [#allocation7]   ;;  %s30_s28 = int_to_ptr.vmem [resolvable:$true] %s29_s28 }
   0x7   :  { %35 = dma.hbm_to_vmem [thread:$0]  %s28_s24, 4096, %s30_s28, [#allocation4], %s4303_s25, %s4303_s25, %s4304_s26  }
   0x8   :  { %s57_s13 = sshll.u32 %s4306_s4, 4  ;;  %s58_s13 = int_to_ptr.vmem [resolvable:$true] %s57_s13 }
   0x9   :  { %63 = dma.hbm_to_vmem [thread:$0]  %s56_s12, 4096, %s58_s13, [#allocation6], %s4303_s25, %s4303_s25, %s4304_s26  }
   0xa   :  { %4298 = dma.done.wait [#allocation4], 4096  }
   0xb   :  { %4299 = vsyncadd [#allocation4], 4294963200 }
   0xc   :  { %4300 = dma.done.wait [#allocation6], 8192  }
   0xd   :  { %4301 = vsyncadd [#allocation6], 4294959104  ;;  %v91_v0 = vld [vmem:[%s5916_s1] sm:$0xff]  ;;  %vm141_vm0 = vcmask 1041408   ;;  %v3502_v1 = vld [vmem:[#allocation3 + $0xe0] sm:$0xf] }
   0xe   :  { %123 = vst [vmem:[#allocation1] ss:$4 sm:$0xff] %v91_v0  ;;  %v3888_v2 = vld [vmem:[#allocation3 + $0xec] sm:$0xf0]  ;;  %v3886_v3 = vld [vmem:[#allocation3 + $0xe4] sm:$0xf] }
   0xf   :  { %v3504_v4 = vld [vmem:[#allocation3 + $0xf0] sm:$0xf0]  ;;  %v3510_v5 = vld [vmem:[#allocation3 + $0xe8] sm:$0xf]  ;;  %v3889_v6 = vld [vmem:[#allocation3 + $0xf4] sm:$0xf0]  ;;  %v4385_v14 = vor.u32 %v3888_v2, %v3502_v1 }
  0x10   :  { %v4383_v7 = vld [vmem:[%s5915_s0] sm:$0xff]  ;;  %v3486_v8 = vld [vmem:[#allocation3 + $0xc0] sm:$0xf]  ;;  %v3884_v9 = vld [vmem:[#allocation3 + $0xcc] sm:$0xf0]  ;;  %vm128_vm1 = vcmask 31744   ;;  %v4396_v22 = vor.u32 %v3886_v3, %v3504_v4  ;;  %v4398_v23 = vor.u32 %v3889_v6, %v3510_v5 }
  0x11   :  { %v3887_v10 = vld [vmem:[#allocation3 + $0xec] sm:$0xf]  ;;  %v3512_v11 = vld [vmem:[#allocation3 + $0xf8] sm:$0xf0]  ;;  %6118 = vst [vmem:[#allocation10_spill] sm:$0xff] %v4385_v14  ;;  %v4392_v18 = vld [vmem:[%s5915_s0 + $0x18] sm:$0xff]  ;;  %v4401_v25 = vor.u32 %v3884_v9, %v3486_v8 }
  0x12   :  { %6119 = vst [vmem:[#allocation11_spill] sm:$0xff] %v4396_v22  ;;  %v3882_v24 = vld [vmem:[#allocation3 + $0xc4] sm:$0xf]  ;;  %v3488_v26 = vld [vmem:[#allocation3 + $0xd0] sm:$0xf0]  ;;  %v4403_v29 = vor.u32 %v3887_v10, %v3512_v11 }
  0x13   :  { %6120 = vst [vmem:[#allocation12_spill] sm:$0xff] %v4398_v23  ;;  %v3494_v27 = vld [vmem:[#allocation3 + $0xc8] sm:$0xf]  ;;  %v3885_v28 = vld [vmem:[#allocation3 + $0xd4] sm:$0xf0]  ;;  %v4415_v32 = vor.u32 %v3882_v24, %v3488_v26  ;;  %v4452_v62 = vld [vmem:[%s5915_s0 + $0x8] sm:$0xff] }
  0x14   :  { %6121 = vst [vmem:[#allocation13_spill] sm:$0xff] %v4401_v25  ;;  %v3470_v30 = vld [vmem:[#allocation3 + $0xa0] sm:$0xf]  ;;  %v3880_v31 = vld [vmem:[#allocation3 + $0xac] sm:$0xf0]  ;;  %v4417_v33 = vor.u32 %v3885_v28, %v3494_v27 }
  0x15   :  { %v124_v12 = vld.sshfl [vmem:[#allocation1] sm:$0xff pattern:$0x73625140]  ;;  %v126_v13 = vld.sshfl [vmem:[#allocation1 + $0x10] sm:$0xff pattern:$0x73625140]  ;;  %v4420_v37 = vor.u32 %v3880_v31, %v3470_v30 }
  0x16   :  { %v142_v15 = vsel %vm141_vm0, %v124_v12, 0  ;;  %v146_v16 = vsel %vm141_vm0, %v126_v13, 0  ;;  %v127_v17 = vld.sshfl [vmem:[#allocation1 + $0x18] sm:$0xff pattern:$0x73625140]  ;;  %6122 = vst [vmem:[#allocation14_spill] sm:$0xff] %v4403_v29 }
  0x17   :  { %157 = vmatpush.bf16.msra.mxu0 %v142_v15  ;;  %3962 = vmatpush.bf16.msra.mxu1 %v142_v15  ;;  %v148_v19 = vsel %vm141_vm0, %v127_v17, 0  ;;  %v125_v20 = vld.sshfl [vmem:[#allocation1 + $0x8] sm:$0xff pattern:$0x73625140]  ;;  %6123 = vst [vmem:[#allocation15_spill] sm:$0xff] %v4415_v32 }
  0x18   :  { %215 = vmatpush.bf16.msra.mxu2 %v146_v16  ;;  %244 = vmatpush.bf16.msra.mxu3 %v148_v19  ;;  %v144_v21 = vsel %vm141_vm0, %v125_v20, 0  ;;  %6124 = vst [vmem:[#allocation16_spill] sm:$0xff] %v4417_v33  ;;  %v3878_v34 = vld [vmem:[#allocation3 + $0xa4] sm:$0xf]  ;;  %v3472_v35 = vld [vmem:[#allocation3 + $0xb0] sm:$0xf0] }
  0x19   :  { %v3478_v36 = vld [vmem:[#allocation3 + $0xa8] sm:$0xf]  ;;  %6125 = vst [vmem:[#allocation17_spill] sm:$0xff] %v4420_v37  ;;  %v3881_v38 = vld [vmem:[#allocation3 + $0xb4] sm:$0xf0]  ;;  %v4427_v46 = vor.u32 %v3878_v34, %v3472_v35 }
  0x1a   :  { %3372 = vmatmul.msk.bf16.vlgmr.msra.gmra.mxu0 %vm128_vm1, %v4383_v7  ;;  %3375 = vmatmul.msk.bf16.vlgmr.msra.gmra.mxu1 %vm128_vm1, %v4392_v18  ;;  %v3883_v39 = vld [vmem:[#allocation3 + $0xcc] sm:$0xf]  ;;  %v3496_v40 = vld [vmem:[#allocation3 + $0xd8] sm:$0xf0]  ;;  %v3454_v41 = vld [vmem:[#allocation3 + $0x80] sm:$0xf]  ;;  %v4429_v48 = vor.u32 %v3881_v38, %v3478_v36 }
  0x1b   :  { %186 = vmatpush.bf16.msrb.mxu1 %v144_v21  ;;  %494 = vmatpush.bf16.msrb.mxu0 %v4385_v14  ;;  %v3876_v42 = vld [vmem:[#allocation3 + $0x8c] sm:$0xf0]  ;;  %v4423_v43 = vor.u32 %v3883_v39, %v3496_v40  ;;  %v3879_v44 = vld [vmem:[#allocation3 + $0xac] sm:$0xf]  ;;  %v3480_v45 = vld [vmem:[#allocation3 + $0xb8] sm:$0xf0] }
  0x1c   :  { %3380 = vmatmul.msk.bf16.vlgmr.msra.gmra.mxu2 %vm128_vm1, %v4383_v7  ;;  %3384 = vmatmul.msk.bf16.vlgmr.msra.gmra.mxu3 %vm128_vm1, %v4383_v7  ;;  %6127 = vst [vmem:[#allocation19_spill] sm:$0xff] %v4427_v46  ;;  %v3438_v47 = vld [vmem:[#allocation3 + $0x60] sm:$0xf]  ;;  %v3874_v49 = vld [vmem:[#allocation3 + $0x84] sm:$0xf]  ;;  %v4432_v50 = vor.u32 %v3876_v42, %v3454_v41  ;;  %v4435_v52 = vor.u32 %v3879_v44, %v3480_v45 }
  0x1d   :  { %520 = vmatpush.bf16.msrb.mxu2 %v4398_v23  ;;  %533 = vmatpush.bf16.msrb.mxu3 %v4403_v29  ;;  %6126 = vst [vmem:[#allocation18_spill] sm:$0xff] %v4423_v43  ;;  %v3456_v51 = vld [vmem:[#allocation3 + $0x90] sm:$0xf0]  ;;  %v3462_v53 = vld [vmem:[#allocation3 + $0x88] sm:$0xf] }
  0x1e   :  { %6128 = vst [vmem:[#allocation20_spill] sm:$0xff] %v4429_v48  ;;  %v3877_v54 = vld [vmem:[#allocation3 + $0x94] sm:$0xf0]  ;;  %v3872_v55 = vld [vmem:[#allocation3 + $0x6c] sm:$0xf0]  ;;  %v4439_v58 = vor.u32 %v3874_v49, %v3456_v51  ;;  %v3856_v51 = vld [vmem:[%s5915_s0 + $0x10] sm:$0xff] }
  0x1f   :  { %507 = vmatpush.bf16.msra.mxu1 %v4396_v22  ;;  %495 = vmatpush.bf16.msrb.mxu0 %v4401_v25  ;;  %6129 = vst [vmem:[#allocation21_spill] sm:$0xff] %v4432_v50  ;;  %v3875_v56 = vld [vmem:[#allocation3 + $0x8c] sm:$0xf]  ;;  %v3464_v57 = vld [vmem:[#allocation3 + $0x98] sm:$0xf0]  ;;  %v4441_v59 = vor.u32 %v3877_v54, %v3462_v53  ;;  %v4444_v60 = vor.u32 %v3872_v55, %v3438_v47 }
  0x20   :  { %6130 = vst [vmem:[#allocation22_spill] sm:$0xff] %v4435_v52  ;;  %v4447_v61 = vor.u32 %v3875_v56, %v3464_v57  ;;  %v3422_v63 = vld [vmem:[#allocation3 + $0x40] sm:$0xf]  ;;  %v3868_v0 = vld [vmem:[#allocation3 + $0x4c] sm:$0xf0] }
  0x21   :  { %521 = vmatpush.bf16.msrb.mxu2 %v4417_v33  ;;  %534 = vmatpush.bf16.msrb.mxu3 %v4423_v43  ;;  %6131 = vst [vmem:[#allocation23_spill] sm:$0xff] %v4439_v58  ;;  %v4457_v1 = vor.u32 %v3868_v0, %v3422_v63  ;;  %v3446_v2 = vld [vmem:[#allocation3 + $0x68] sm:$0xf]  ;;  %v3873_v3 = vld [vmem:[#allocation3 + $0x74] sm:$0xf0] }
  0x22   :  { %6132 = vst [vmem:[#allocation24_spill] sm:$0xff] %v4441_v59  ;;  %v3871_v4 = vld [vmem:[#allocation3 + $0x6c] sm:$0xf]  ;;  %v3406_v5 = vld [vmem:[#allocation3 + $0x20] sm:$0xf]  ;;  %v4464_v8 = vor.u32 %v3873_v3, %v3446_v2 }
  0x23   :  { %508 = vmatpush.bf16.msra.mxu1 %v4415_v32  ;;  %496 = vmatpush.bf16.msrb.mxu0 %v4420_v37  ;;  %6133 = vst [vmem:[#allocation25_spill] sm:$0xff] %v4444_v60  ;;  %v3864_v6 = vld [vmem:[#allocation3 + $0x2c] sm:$0xf0]  ;;  %v3448_v9 = vld [vmem:[#allocation3 + $0x78] sm:$0xf0] }
  0x24   :  { %6134 = vst [vmem:[#allocation26_spill] sm:$0xff] %v4447_v61  ;;  %v3870_v10 = vld [vmem:[#allocation3 + $0x64] sm:$0xf]  ;;  %v3440_v11 = vld [vmem:[#allocation3 + $0x70] sm:$0xf0]  ;;  %v4470_v12 = vor.u32 %v3871_v4, %v3448_v9  ;;  %v4476_v21 = vor.u32 %v3864_v6, %v3406_v5 }
  0x25   :  { %522 = vmatpush.bf16.msrb.mxu2 %v4429_v48  ;;  %535 = vmatpush.bf16.msrb.mxu3 %v4435_v52  ;;  %6135 = vst [vmem:[#allocation27_spill] sm:$0xff] %v4457_v1  ;;  %v3430_v13 = vld [vmem:[#allocation3 + $0x48] sm:$0xf]  ;;  %v3390_v15 = vld [vmem:[#allocation3] sm:$0xf]  ;;  %v4472_v17 = vor.u32 %v3870_v10, %v3440_v11 }
  0x26   :  { %6136 = vst [vmem:[#allocation28_spill] sm:$0xff] %v4464_v8  ;;  %v3860_v16 = vld [vmem:[#allocation3 + $0xc] sm:$0xf0]  ;;  %v3867_v19 = vld [vmem:[#allocation3 + $0x4c] sm:$0xf] }
  0x27   :  { %509 = vmatpush.bf16.msra.mxu1 %v4427_v46  ;;  %497 = vmatpush.bf16.msrb.mxu0 %v4432_v50  ;;  %6137 = vst [vmem:[#allocation29_spill] sm:$0xff] %v4470_v12  ;;  %v3432_v20 = vld [vmem:[#allocation3 + $0x58] sm:$0xf0]  ;;  %v3866_v27 = vld [vmem:[#allocation3 + $0x44] sm:$0xf]  ;;  %v4490_v39 = vor.u32 %v3860_v16, %v3390_v15 }
  0x28   :  { %6138 = vst [vmem:[#allocation30_spill] sm:$0xff] %v4472_v17  ;;  %v4481_v26 = vor.u32 %v3867_v19, %v3432_v20  ;;  %v3424_v28 = vld [vmem:[#allocation3 + $0x50] sm:$0xf0]  ;;  %v3414_v30 = vld [vmem:[#allocation3 + $0x28] sm:$0xf] }
  0x29   :  { %523 = vmatpush.bf16.msrb.mxu2 %v4441_v59  ;;  %536 = vmatpush.bf16.msrb.mxu3 %v4447_v61  ;;  %6139 = vst [vmem:[#allocation31_spill] sm:$0xff] %v4476_v21  ;;  %v4484_v31 = vor.u32 %v3866_v27, %v3424_v28  ;;  %v3865_v34 = vld [vmem:[#allocation3 + $0x34] sm:$0xf0]  ;;  %v3863_v35 = vld [vmem:[#allocation3 + $0x2c] sm:$0xf] }
  0x2a   :  { %3373 = vmatmul.msk.bf16.gmra.mxu0 %vm128_vm1, %v4452_v62  ;;  %3376 = vmatmul.msk.bf16.vlgmr.msrb.gmra.mxu1 %vm128_vm1, %v4383_v7  ;;  %v3869_v7 = vld [vmem:[#allocation3 + $0x54] sm:$0xf0]  ;;  %6141 = vst [vmem:[#allocation33_spill] sm:$0xff] %v4481_v26  ;;  %v3416_v36 = vld [vmem:[#allocation3 + $0x38] sm:$0xf0]  ;;  %v4487_v38 = vor.u32 %v3865_v34, %v3414_v30 }
  0x2b   :  { %510 = vmatpush.bf16.msra.mxu1 %v4439_v58  ;;  %498 = vmatpush.bf16.msrb.mxu0 %v4444_v60  ;;  %v4479_v24 = vor.u32 %v3869_v7, %v3430_v13  ;;  %6142 = vst [vmem:[#allocation34_spill] sm:$0xff] %v4484_v31  ;;  %v4493_v40 = vor.u32 %v3863_v35, %v3416_v36  ;;  %v3398_v41 = vld [vmem:[#allocation3 + $0x8] sm:$0xf]  ;;  %v3861_v42 = vld [vmem:[#allocation3 + $0x14] sm:$0xf0] }
  0x2c   :  { %3381 = vmatmul.msk.bf16.gmra.mxu2 %vm128_vm1, %v4452_v62  ;;  %3385 = vmatmul.msk.bf16.gmra.mxu3 %vm128_vm1, %v4452_v62  ;;  %6143 = vst [vmem:[#allocation35_spill] sm:$0xff] %v4487_v38  ;;  %v3859_v44 = vld [vmem:[#allocation3 + $0xc] sm:$0xf]  ;;  %v3400_v45 = vld [vmem:[#allocation3 + $0x18] sm:$0xf0]  ;;  %v4497_v47 = vor.u32 %v3861_v42, %v3398_v41 }
  0x2d   :  { %524 = vmatpush.bf16.msrb.mxu2 %v4464_v8  ;;  %537 = vmatpush.bf16.msrb.mxu3 %v4470_v12  ;;  %6140 = vst [vmem:[#allocation32_spill] sm:$0xff] %v4479_v24  ;;  %v4501_v49 = vor.u32 %v3859_v44, %v3400_v45  ;;  %v3862_v53 = vld [vmem:[#allocation3 + $0x24] sm:$0xf]  ;;  %v3408_v54 = vld [vmem:[#allocation3 + $0x30] sm:$0xf0] }
  0x2e   :  { %6144 = vst [vmem:[#allocation36_spill] sm:$0xff] %v4490_v39  ;;  %v4515_v55 = vor.u32 %v3862_v53, %v3408_v54  ;;  %v3858_v56 = vld [vmem:[#allocation3 + $0x4] sm:$0xf]  ;;  %v3392_v57 = vld [vmem:[#allocation3 + $0x10] sm:$0xf0] }
  0x2f   :  { %499 = vmatpush.bf16.msrb.mxu0 %v4457_v1  ;;  %511 = vmatpush.bf16.msra.mxu1 %v4472_v17  ;;  %6145 = vst [vmem:[#allocation37_spill] sm:$0xff] %v4493_v40  ;;  %v4520_v63 = vor.u32 %v3858_v56, %v3392_v57  ;;  %v92_v0 = vld [vmem:[%s5918_s3] sm:$0xf] }
  0x30   :  { %6146 = vst [vmem:[#allocation38_spill] sm:$0xff] %v4497_v47  ;;  %v4565_v2 = vperm.slane %v92_v0, 0  ;;  %v4587_v19 = vperm.slane %v92_v0, 2  ;;  %v4589_v20 = vperm.slane %v92_v0, 3  ;;  %v4601_v41 = vperm.slane %v92_v0, 1 }
  0x31   :  { %525 = vmatpush.bf16.msrb.mxu2 %v4479_v24  ;;  %538 = vmatpush.bf16.msrb.mxu3 %v4481_v26  ;;  %6147 = vst [vmem:[#allocation39_spill] sm:$0xff] %v4501_v49 }
  0x32   :  { %6148 = vst [vmem:[#allocation40_spill] sm:$0xff] %v4515_v55 }
  0x33   :  { %500 = vmatpush.bf16.msrb.mxu0 %v4476_v21  ;;  %512 = vmatpush.bf16.msra.mxu1 %v4484_v31  ;;  %6149 = vst [vmem:[#allocation41_spill] sm:$0xff] %v4520_v63 }
  0x34   :  { %6150 = vst [vmem:[#allocation42_spill] sm:$0xff] %v4565_v2 }
  0x35   :  { %526 = vmatpush.bf16.msrb.mxu2 %v4487_v38  ;;  %539 = vmatpush.bf16.msrb.mxu3 %v4493_v40  ;;  %6157 = vst [vmem:[#allocation49_spill] sm:$0xff] %v4587_v19 }
  0x36   :  { %6158 = vst [vmem:[#allocation50_spill] sm:$0xff] %v4589_v20 }
  0x37   :  { %501 = vmatpush.bf16.msrb.mxu0 %v4490_v39  ;;  %513 = vmatpush.bf16.msra.mxu1 %v4515_v55  ;;  %6163 = vst [vmem:[#allocation55_spill] sm:$0xff] %v4601_v41 }
  0x39   :  { %527 = vmatpush.bf16.msrb.mxu2 %v4497_v47  ;;  %540 = vmatpush.bf16.msrb.mxu3 %v4501_v49 }
  0x3a   :  { %3374 = vmatmul.msk.bf16.gmra.mxu0 %vm128_vm1, %v3856_v51  ;;  %3377 = vmatmul.msk.bf16.gmra.mxu1 %vm128_vm1, %v4452_v62  ;;  %v5927_v62 = vmov 0  }
  0x3b   :  { %618 = vmatpush.bf16.msra.mxu0 %v4385_v14  ;;  %514 = vmatpush.bf16.msra.mxu1 %v4520_v63 }
  0x3c   :  { %3382 = vmatmul.msk.bf16.gmra.mxu2 %vm128_vm1, %v3856_v51  ;;  %3386 = vmatmul.msk.bf16.gmra.mxu3 %vm128_vm1, %v3856_v51 }
  0x3d   :  { %644 = vmatpush.bf16.msra.mxu2 %v4398_v23  ;;  %657 = vmatpush.bf16.msra.mxu3 %v4403_v29 }
  0x3f   :  { %619 = vmatpush.bf16.msra.mxu0 %v4401_v25  ;;  %631 = vmatpush.bf16.msrb.mxu1 %v4396_v22 }
  0x41   :  { %645 = vmatpush.bf16.msra.mxu2 %v4417_v33  ;;  %658 = vmatpush.bf16.msra.mxu3 %v4423_v43 }
  0x43   :  { %620 = vmatpush.bf16.msra.mxu0 %v4420_v37  ;;  %632 = vmatpush.bf16.msrb.mxu1 %v4415_v32 }
  0x45   :  { %646 = vmatpush.bf16.msra.mxu2 %v4429_v48  ;;  %659 = vmatpush.bf16.msra.mxu3 %v4435_v52 }
  0x47   :  { %621 = vmatpush.bf16.msra.mxu0 %v4432_v50  ;;  %633 = vmatpush.bf16.msrb.mxu1 %v4427_v46 }
  0x49   :  { %647 = vmatpush.bf16.msra.mxu2 %v4441_v59  ;;  %660 = vmatpush.bf16.msra.mxu3 %v4447_v61 }
  0x4a   :  { %3378 = vmatmul.msk.bf16.gmra.mxu1 %vm128_vm1, %v3856_v51  ;;  %502 = vmatmul.bf16.vlgmr.msrb.gmra.mxu0 %v5927_v62 }
  0x4b   :  { %622 = vmatpush.bf16.msra.mxu0 %v4444_v60  ;;  %634 = vmatpush.bf16.msrb.mxu1 %v4439_v58 }
  0x4c   :  { %3383 = vmatmul.msk.bf16.gmra.mxu2 %vm128_vm1, %v4392_v18  ;;  %3387 = vmatmul.msk.bf16.gmra.mxu3 %vm128_vm1, %v4392_v18 }
  0x4d   :  { %648 = vmatpush.bf16.msra.mxu2 %v4464_v8  ;;  %661 = vmatpush.bf16.msra.mxu3 %v4470_v12 }
  0x4f   :  { %623 = vmatpush.bf16.msra.mxu0 %v4457_v1  ;;  %635 = vmatpush.bf16.msrb.mxu1 %v4472_v17 }
  0x51   :  { %649 = vmatpush.bf16.msra.mxu2 %v4479_v24  ;;  %662 = vmatpush.bf16.msra.mxu3 %v4481_v26 }
  0x53   :  { %624 = vmatpush.bf16.msra.mxu0 %v4476_v21  ;;  %636 = vmatpush.bf16.msrb.mxu1 %v4484_v31 }
  0x55   :  { %650 = vmatpush.bf16.msra.mxu2 %v4487_v38  ;;  %663 = vmatpush.bf16.msra.mxu3 %v4493_v40 }
  0x57   :  { %625 = vmatpush.bf16.msra.mxu0 %v4490_v39  ;;  %637 = vmatpush.bf16.msrb.mxu1 %v4515_v55 }
  0x59   :  { %651 = vmatpush.bf16.msra.mxu2 %v4497_v47  ;;  %664 = vmatpush.bf16.msra.mxu3 %v4501_v49 }
  0x5a   :  { %3379 = vmatmul.msk.bf16.gmra.mxu1 %vm128_vm1, %v4392_v18 }
  0x5b   :  { %638 = vmatpush.bf16.msrb.mxu1 %v4520_v63 }
  0x5c   :  { %528 = vmatmul.bf16.vlgmr.msrb.gmra.mxu2 %v5927_v62  ;;  %541 = vmatmul.bf16.vlgmr.msrb.gmra.mxu3 %v5927_v62 }
  0x6a   :  { %515 = vmatmul.bf16.vlgmr.msra.gmra.mxu1 %v5927_v62 }
  0x97   :  { %v159_v3 = vpop.f32.mrf.mxu0  ;;  %v174_v4 = vpop.f32.mrf.mxu1 }
  0x98   :  { %v4568_v18 = vadd.f32 %v174_v4, %v4565_v2 }
  0x9a   :  { %6151 = vst [vmem:[#allocation43_spill] sm:$0xff] %v4568_v18 }
  0x9f   :  { %v4570_v5 = vpop.f32.mrf.mxu2  ;;  %v4572_v6 = vpop.f32.mrf.mxu3 }
  0xa0   :  { %v4574_v9 = vpop.f32.mrf.mxu0  ;;  %v4576_v10 = vpop.f32.mrf.mxu1 }
  0xa1   :  { %6152 = vst [vmem:[#allocation44_spill] sm:$0xff] %v4574_v9 }
  0xa2   :  { %6153 = vst [vmem:[#allocation45_spill] sm:$0xff] %v4576_v10 }
  0xa7   :  { %v4578_v11 = vpop.f32.mrf.mxu2  ;;  %v4580_v13 = vpop.f32.mrf.mxu3 }
  0xa8   :  { %6154 = vst [vmem:[#allocation46_spill] sm:$0xff] %v4578_v11  ;;  %v164_v15 = vpop.f32.mrf.mxu0  ;;  %v4582_v16 = vpop.f32.mrf.mxu1 }
  0xa9   :  { %6155 = vst [vmem:[#allocation47_spill] sm:$0xff] %v4580_v13  ;;  %v4585_v7 = vadd.f32 %v164_v15, %v4565_v2 }
  0xab   :  { %6156 = vst [vmem:[#allocation48_spill] sm:$0xff] %v4585_v7 }
  0xaf   :  { %v222_v27 = vpop.f32.mrf.mxu2  ;;  %v251_v28 = vpop.f32.mrf.mxu3 }
  0xb0   :  { %v4592_v30 = vadd.f32 %v222_v27, %v4587_v19  ;;  %v4595_v34 = vadd.f32 %v251_v28, %v4589_v20  ;;  %v4597_v35 = vpop.f32.mrf.mxu0  ;;  %v4599_v36 = vpop.f32.mrf.mxu1  ;;  %v160_v28 = vadd.f32 %v159_v3, %v4565_v2 }
  0xb1   :  { %6161 = vst [vmem:[#allocation53_spill] sm:$0xff] %v4597_v35 }
  0xb2   :  { %6159 = vst [vmem:[#allocation51_spill] sm:$0xff] %v4592_v30  ;;  %v3915_v30 = vld [vmem:[#allocation5 + $0xcc] sm:$0xf] }
  0xb3   :  { %6160 = vst [vmem:[#allocation52_spill] sm:$0xff] %v4595_v34 }
  0xb4   :  { %6162 = vst [vmem:[#allocation54_spill] sm:$0xff] %v4599_v36 }
  0xb7   :  { %v4603_v42 = vpop.f32.mrf.mxu2  ;;  %v4605_v44 = vpop.f32.mrf.mxu3 }
  0xb8   :  { %6164 = vst [vmem:[#allocation56_spill] sm:$0xff] %v4603_v42  ;;  %v169_v45 = vpop.f32.mrf.mxu0  ;;  %v193_v51 = vpop.f32.mrf.mxu1  ;;  %v3646_v42 = vld [vmem:[#allocation5 + $0xf8] sm:$0xf0] }
  0xb9   :  { %6165 = vst [vmem:[#allocation57_spill] sm:$0xff] %v4605_v44  ;;  %v4608_v53 = vadd.f32 %v169_v45, %v4565_v2  ;;  %v4611_v54 = vadd.f32 %v193_v51, %v4601_v41  ;;  %v3907_v2 = vld [vmem:[#allocation5 + $0x8c] sm:$0xf] }
  0xbb   :  { %6166 = vst [vmem:[#allocation58_spill] sm:$0xff] %v4608_v53 }
  0xbc   :  { %6167 = vst [vmem:[#allocation59_spill] sm:$0xff] %v4611_v54  ;;  %v3630_v54 = vld [vmem:[#allocation5 + $0xd8] sm:$0xf0] }
  0xbf   :  { %v227_v56 = vpop.f32.mrf.mxu2  ;;  %v256_v57 = vpop.f32.mrf.mxu3 }
  0xc0   :  { %v4614_v4 = vadd.f32 %v227_v56, %v4587_v19  ;;  %v4617_v0 = vadd.f32 %v256_v57, %v4589_v20  ;;  %v4619_v15 = vpop.f32.mrf.mxu0  ;;  %v4621_v27 = vpop.f32.mrf.mxu1 }
  0xc1   :  { %6170 = vst [vmem:[#allocation62_spill] sm:$0xff] %v4619_v15 }
  0xc2   :  { %6168 = vst [vmem:[#allocation60_spill] sm:$0xff] %v4614_v4 }
  0xc3   :  { %6169 = vst [vmem:[#allocation61_spill] sm:$0xff] %v4617_v0 }
  0xc4   :  { %6171 = vst [vmem:[#allocation63_spill] sm:$0xff] %v4621_v27 }
  0xc7   :  { %v4624_v62 = vpop.f32.mrf.mxu2  ;;  %v4626_v45 = vpop.f32.mrf.mxu3 }
  0xc8   :  { %6172 = vst [vmem:[#allocation64_spill] sm:$0xff] %v4624_v62  ;;  %v198_v51 = vpop.f32.mrf.mxu1  ;;  %v503_v10 = vpop.f32.mrf.mxu0 }
  0xc9   :  { %6173 = vst [vmem:[#allocation65_spill] sm:$0xff] %v4626_v45  ;;  %v4629_v18 = vadd.f32 %v198_v51, %v4601_v41  ;;  %v546_v56 = vadd.f32 %v503_v10, %v160_v28  ;;  %v3636_v28 = vld [vmem:[#allocation5 + $0xe0] sm:$0xf] }
  0xcb   :  { %6174 = vst [vmem:[#allocation66_spill] sm:$0xff] %v4629_v18  ;;  %v3516_v4 = vmul.f32 -1.442695, %v546_v56  ;;  %v3920_v56 = vld [vmem:[#allocation5 + $0xec] sm:$0xf0] }
  0xcc   :  { %v3919_v18 = vld [vmem:[#allocation5 + $0xec] sm:$0xf] }
  0xcd   :  { %3970 = vpow2.f32 %v3516_v4 }
  0xcf   :  { %v232_v57 = vpop.f32.mrf.mxu2  ;;  %v261_v0 = vpop.f32.mrf.mxu3 }
  0xd0   :  { %v4632_v15 = vadd.f32 %v232_v57, %v4587_v19  ;;  %v4635_v53 = vadd.f32 %v261_v0, %v4589_v20  ;;  %v4637_v3 = vpop.f32.mrf.mxu1  ;;  %v505_v62 = vpop.f32.mrf.mxu0  ;;  %v4649_v0 = vor.u32 %v3920_v56, %v3636_v28  ;;  %v3916_v28 = vld [vmem:[#allocation5 + $0xcc] sm:$0xf0]  ;;  %v3914_v56 = vld [vmem:[#allocation5 + $0xc4] sm:$0xf] }
  0xd1   :  { %6177 = vst [vmem:[#allocation69_spill] sm:$0xff] %v4637_v3  ;;  %v3644_v62 = vld [vmem:[#allocation5 + $0xe8] sm:$0xf] }
  0xd2   :  { %6175 = vst [vmem:[#allocation67_spill] sm:$0xff] %v4632_v15  ;;  %v3638_v15 = vld [vmem:[#allocation5 + $0xf0] sm:$0xf0]  ;;  %939 = vmatpush.bf16.msrb.mxu0 %v4649_v0 }
  0xd3   :  { %6176 = vst [vmem:[#allocation68_spill] sm:$0xff] %v4635_v53  ;;  %v3971_v45 = vpop.eup %3970  ;;  %v3918_v53 = vld [vmem:[#allocation5 + $0xe4] sm:$0xf] }
  0xd4   :  { %v4639_v44 = vadd.f32 1.0, %v3971_v45  ;;  %6181 = vst [vmem:[#allocation73_spill] sm:$0xff] %v4649_v0  ;;  %v4651_v3 = vor.u32 %v3918_v53, %v3638_v15  ;;  %v3921_v45 = vld [vmem:[#allocation5 + $0xf4] sm:$0xf0]  ;;  %v218_v53 = vadd.f32 %v4570_v5, %v4587_v19 }
  0xd6   :  { %3972 = vrcp.f32 %v4639_v44  ;;  %6182 = vst [vmem:[#allocation74_spill] sm:$0xff] %v4651_v3  ;;  %952 = vmatpush.bf16.msra.mxu1 %v4651_v3  ;;  %v571_v35 = vand.u32 2147483647, %v4639_v44  ;;  %vm567_vm3 = vweird.f32 %v4639_v44 }
  0xd7   :  { %v4642_v51 = vpop.f32.mrf.mxu2  ;;  %v4644_v10 = vpop.f32.mrf.mxu3 }
  0xd8   :  { %6178 = vst [vmem:[#allocation70_spill] sm:$0xff] %v4642_v51  ;;  %v203_v4 = vpop.f32.mrf.mxu1  ;;  %v4654_v51 = vor.u32 %v3921_v45, %v3644_v62  ;;  %v3917_v45 = vld [vmem:[#allocation5 + $0xd4] sm:$0xf0]  ;;  %vm4690_vm4 = vcmp.eq.f32.partialorder %v571_v35, 8.507059e+37 }
  0xd9   :  { %6179 = vst [vmem:[#allocation71_spill] sm:$0xff] %v4644_v10  ;;  %v4647_v57 = vadd.f32 %v203_v4, %v4601_v41  ;;  %v4656_v10 = vor.u32 %v3919_v18, %v3646_v42  ;;  %v3620_v4 = vld [vmem:[#allocation5 + $0xc0] sm:$0xf]  ;;  %v3622_v18 = vld [vmem:[#allocation5 + $0xd0] sm:$0xf0] }
  0xda   :  { %6183 = vst [vmem:[#allocation75_spill] sm:$0xff] %v4654_v51  ;;  %965 = vmatpush.bf16.msrb.mxu2 %v4654_v51  ;;  %v4667_v62 = vor.u32 %v3916_v28, %v3620_v4  ;;  %v3628_v42 = vld [vmem:[#allocation5 + $0xc8] sm:$0xf]  ;;  %v4672_v34 = vor.u32 %v3914_v56, %v3622_v18  ;;  %v573_v4 = vand.u32 2147483648, %v4639_v44  ;;  %v4678_v28 = vor.u32 %v3915_v30, %v3630_v54  ;;  %v3604_v56 = vld [vmem:[#allocation5 + $0xa0] sm:$0xf] }
  0xdb   :  { %6180 = vst [vmem:[#allocation72_spill] sm:$0xff] %v4647_v57  ;;  %978 = vmatpush.bf16.msrb.mxu3 %v4656_v10  ;;  %v247_v57 = vadd.f32 %v4572_v6, %v4589_v20  ;;  %v4674_v5 = vor.u32 %v3917_v45, %v3628_v42  ;;  %v3912_v18 = vld [vmem:[#allocation5 + $0xac] sm:$0xf0]  ;;  %v3910_v42 = vld [vmem:[#allocation5 + $0xa4] sm:$0xf] }
  0xdc   :  { %6184 = vst [vmem:[#allocation76_spill] sm:$0xff] %v4656_v10  ;;  %v4658_v27 = vpop.eup %3972  ;;  %940 = vmatpush.bf16.msrb.mxu0 %v4667_v62  ;;  %953 = vmatpush.bf16.msra.mxu1 %v4672_v34  ;;  %v4688_v30 = vor.u32 %v3912_v18, %v3604_v56  ;;  %v3913_v54 = vld [vmem:[#allocation5 + $0xb4] sm:$0xf0]  ;;  %v574_v35 = vor.u32 1.1754944e-38, %v573_v4  ;;  %v3588_v18 = vld [vmem:[#allocation5 + $0x80] sm:$0xf] }
  0xdd   :  { %v563_v15 = vmul.f32 %v4658_v27, %v4639_v44  ;;  %6185 = vst [vmem:[#allocation77_spill] sm:$0xff] %v4667_v62  ;;  %vm568_vm2 = vweird.f32 %v4658_v27  ;;  %v3590_v4 = vld [vmem:[#allocation5 + $0x90] sm:$0xf0] }
  0xde   :  { %6186 = vst [vmem:[#allocation78_spill] sm:$0xff] %v4672_v34  ;;  %966 = vmatpush.bf16.msrb.mxu2 %v4674_v5  ;;  %vm4703_vm5 = vmor %vm567_vm3, %vm568_vm2 }
  0xdf   :  { %6187 = vst [vmem:[#allocation79_spill] sm:$0xff] %v4674_v5  ;;  %v564_v7 = vsub.f32 1.0, %v563_v15  ;;  %v529_v13 = vpop.f32.mrf.mxu2  ;;  %v542_v11 = vpop.f32.mrf.mxu3  ;;  %979 = vmatpush.bf16.msrb.mxu3 %v4678_v28 }
  0xe0   :  { %6188 = vst [vmem:[#allocation80_spill] sm:$0xff] %v4678_v28  ;;  %v548_v19 = vadd.f32 %v529_v13, %v218_v53  ;;  %v549_v36 = vadd.f32 %v542_v11, %v247_v57  ;;  %v4681_v6 = vpop.f32.mrf.mxu1  ;;  %v3606_v11 = vld [vmem:[#allocation5 + $0xb0] sm:$0xf0]  ;;  %v3612_v13 = vld [vmem:[#allocation5 + $0xa8] sm:$0xf]  ;;  %941 = vmatpush.bf16.msrb.mxu0 %v4688_v30 }
  0xe1   :  { %6189 = vst [vmem:[#allocation81_spill] sm:$0xff] %v4681_v6  ;;  %v565_v15 = vmul.f32 %v4658_v27, %v564_v7  ;;  %v4694_v53 = vor.u32 %v3910_v42, %v3606_v11  ;;  %v4696_v45 = vor.u32 %v3913_v54, %v3612_v13  ;;  %v3911_v7 = vld [vmem:[#allocation5 + $0xac] sm:$0xf]  ;;  %v3614_v6 = vld [vmem:[#allocation5 + $0xb8] sm:$0xf0] }
  0xe2   :  { %6190 = vst [vmem:[#allocation82_spill] sm:$0xff] %v4688_v30  ;;  %3974 = vtanh.f32 %v549_v36  ;;  %v3518_v20 = vmul.f32 -1.442695, %v548_v19  ;;  %v4708_v36 = vor.u32 %v3911_v7, %v3614_v6  ;;  %v3908_v42 = vld [vmem:[#allocation5 + $0x8c] sm:$0xf0] }
  0xe3   :  { %6193 = vst [vmem:[#allocation83_spill] sm:$0xff] %v4694_v53  ;;  %v566_v9 = vadd.f32 %v4658_v27, %v565_v15  ;;  %954 = vmatpush.bf16.msra.mxu1 %v4694_v53  ;;  %v3906_v19 = vld [vmem:[#allocation5 + $0x84] sm:$0xf]  ;;  %967 = vmatpush.bf16.msrb.mxu2 %v4696_v45  ;;  %v4716_v44 = vor.u32 %v3908_v42, %v3588_v18  ;;  %v3596_v11 = vld [vmem:[#allocation5 + $0x88] sm:$0xf] }
  0xe4   :  { %6194 = vst [vmem:[#allocation84_spill] sm:$0xff] %v4696_v45  ;;  %980 = vmatpush.bf16.msrb.mxu3 %v4708_v36  ;;  %v3909_v13 = vld [vmem:[#allocation5 + $0x94] sm:$0xf0]  ;;  %v4720_v54 = vor.u32 %v3906_v19, %v3590_v4  ;;  %v3598_v53 = vld [vmem:[#allocation5 + $0x98] sm:$0xf0]  ;;  %3976 = vpow2.f32 %v3518_v20 }
  0xe5   :  { %6197 = vst [vmem:[#allocation85_spill] sm:$0xff] %v4708_v36  ;;  %v570_v15 = vsel %vm4703_vm5, %v4658_v27, %v566_v9  ;;  %v4722_v7 = vor.u32 %v3909_v13, %v3596_v11  ;;  %v189_v9 = vadd.f32 %v4582_v16, %v4601_v41  ;;  %942 = vmatpush.bf16.msrb.mxu0 %v4716_v44  ;;  %v3572_v57 = vld [vmem:[#allocation5 + $0x60] sm:$0xf]  ;;  %v3902_v19 = vld [vmem:[#allocation5 + $0x64] sm:$0xf] }
  0xe6   :  { %6198 = vst [vmem:[#allocation86_spill] sm:$0xff] %v4716_v44  ;;  %v575_v6 = vsel %vm4690_vm4, %v574_v35, %v570_v15  ;;  %v4727_v18 = vor.u32 %v3907_v2, %v3598_v53  ;;  %v3904_v35 = vld [vmem:[#allocation5 + $0x6c] sm:$0xf0]  ;;  %v3574_v11 = vld [vmem:[#allocation5 + $0x70] sm:$0xf0] }
  0xe7   :  { %6199 = vst [vmem:[#allocation87_spill] sm:$0xff] %v4720_v54  ;;  %v531_v27 = vpop.f32.mrf.mxu2  ;;  %v544_v56 = vpop.f32.mrf.mxu3  ;;  %955 = vmatpush.bf16.msra.mxu1 %v4720_v54  ;;  %968 = vmatpush.bf16.msrb.mxu2 %v4722_v7  ;;  %v4734_v16 = vor.u32 %v3904_v35, %v3572_v57  ;;  %v3580_v2 = vld [vmem:[#allocation5 + $0x68] sm:$0xf]  ;;  %v3905_v53 = vld [vmem:[#allocation5 + $0x74] sm:$0xf0]  ;;  %v4736_v13 = vor.u32 %v3902_v19, %v3574_v11 }
  0xe8   :  { %6200 = vst [vmem:[#allocation88_spill] sm:$0xff] %v4722_v7  ;;  %v3975_v42 = vpop.eup %3974  ;;  %v516_v36 = vpop.f32.mrf.mxu1  ;;  %981 = vmatpush.bf16.msrb.mxu3 %v4727_v18  ;;  %v4738_v27 = vor.u32 %v3905_v53, %v3580_v2  ;;  %v3903_v56 = vld [vmem:[#allocation5 + $0x6c] sm:$0xf]  ;;  %v3582_v41 = vld [vmem:[#allocation5 + $0x78] sm:$0xf0] }
  0xe9   :  { %6201 = vst [vmem:[#allocation89_spill] sm:$0xff] %v4727_v18  ;;  %v4730_v15 = vmul.f32 %v3975_v42, %v575_v6  ;;  %v547_v4 = vadd.f32 %v516_v36, %v189_v9  ;;  %943 = vmatpush.bf16.msrb.mxu0 %v4734_v16  ;;  %v4741_v20 = vor.u32 %v3903_v56, %v3582_v41  ;;  %v3556_v36 = vld [vmem:[#allocation5 + $0x40] sm:$0xf]  ;;  %v3900_v6 = vld [vmem:[#allocation5 + $0x4c] sm:$0xf0] }
  0xea   :  { %6202 = vst [vmem:[#allocation90_spill] sm:$0xff] %v4734_v16  ;;  %v3898_v9 = vld [vmem:[#allocation5 + $0x44] sm:$0xf]  ;;  %v3558_v42 = vld [vmem:[#allocation5 + $0x50] sm:$0xf0]  ;;  %v4746_v57 = vor.u32 %v3900_v6, %v3556_v36  ;;  %v3977_v41 = vpop.eup %3976 }
  0xeb   :  { %6203 = vst [vmem:[#allocation91_spill] sm:$0xff] %v4736_v13  ;;  %v3517_v54 = vmul.f32 -1.442695, %v547_v4  ;;  %956 = vmatpush.bf16.msra.mxu1 %v4736_v13  ;;  %969 = vmatpush.bf16.msrb.mxu2 %v4738_v27  ;;  %v4748_v35 = vor.u32 %v3898_v9, %v3558_v42  ;;  %v3564_v19 = vld [vmem:[#allocation5 + $0x48] sm:$0xf] }
  0xec   :  { %6204 = vst [vmem:[#allocation92_spill] sm:$0xff] %v4738_v27  ;;  %982 = vmatpush.bf16.msrb.mxu3 %v4741_v20  ;;  %v3901_v4 = vld [vmem:[#allocation5 + $0x54] sm:$0xf0]  ;;  %v3899_v11 = vld [vmem:[#allocation5 + $0x4c] sm:$0xf] }
  0xed   :  { %6205 = vst [vmem:[#allocation93_spill] sm:$0xff] %v4741_v20  ;;  %3978 = vpow2.f32 %v3517_v54  ;;  %v4750_v2 = vor.u32 %v3901_v4, %v3564_v19  ;;  %v3566_v53 = vld [vmem:[#allocation5 + $0x58] sm:$0xf0]  ;;  %944 = vmatpush.bf16.msrb.mxu0 %v4746_v57  ;;  %v3540_v20 = vld [vmem:[#allocation5 + $0x20] sm:$0xf]  ;;  %v561_v19 = vadd.f32 1.0, %v3977_v41 }
  0xee   :  { %6206 = vst [vmem:[#allocation94_spill] sm:$0xff] %v4746_v57  ;;  %v4754_v27 = vor.u32 %v3899_v11, %v3566_v53  ;;  %v3896_v54 = vld [vmem:[#allocation5 + $0x2c] sm:$0xf0]  ;;  %v3894_v36 = vld [vmem:[#allocation5 + $0x24] sm:$0xf] }
  0xef   :  { %6207 = vst [vmem:[#allocation95_spill] sm:$0xff] %v4748_v35  ;;  %957 = vmatpush.bf16.msra.mxu1 %v4748_v35  ;;  %970 = vmatpush.bf16.msrb.mxu2 %v4750_v2  ;;  %v4757_v6 = vor.u32 %v3896_v54, %v3540_v20  ;;  %v3542_v9 = vld [vmem:[#allocation5 + $0x30] sm:$0xf0]  ;;  %v3548_v42 = vld [vmem:[#allocation5 + $0x28] sm:$0xf]  ;;  %3980 = vrcp.f32 %v561_v19  ;;  %vm597_vm11 = vweird.f32 %v561_v19 }
  0xf0   :  { %6208 = vst [vmem:[#allocation96_spill] sm:$0xff] %v4750_v2  ;;  %v518_v56 = vpop.f32.mrf.mxu1  ;;  %v3897_v13 = vld [vmem:[#allocation5 + $0x34] sm:$0xf0]  ;;  %983 = vmatpush.bf16.msrb.mxu3 %v4754_v27  ;;  %v4760_v4 = vor.u32 %v3894_v36, %v3542_v9  ;;  %v3895_v35 = vld [vmem:[#allocation5 + $0x2c] sm:$0xf] }
  0xf1   :  { %6209 = vst [vmem:[#allocation97_spill] sm:$0xff] %v4754_v27  ;;  %v4762_v56 = vor.u32 %v3897_v13, %v3548_v42  ;;  %v3550_v11 = vld [vmem:[#allocation5 + $0x38] sm:$0xf0]  ;;  %945 = vmatpush.bf16.msrb.mxu0 %v4757_v6  ;;  %v3524_v54 = vld [vmem:[#allocation5] sm:$0xf] }
  0xf2   :  { %6210 = vst [vmem:[#allocation98_spill] sm:$0xff] %v4757_v6  ;;  %v4764_v53 = vor.u32 %v3895_v35, %v3550_v11  ;;  %v3892_v41 = vld [vmem:[#allocation5 + $0xc] sm:$0xf0]  ;;  %v3890_v13 = vld [vmem:[#allocation5 + $0x4] sm:$0xf] }
  0xf3   :  { %6211 = vst [vmem:[#allocation99_spill] sm:$0xff] %v4760_v4  ;;  %v3979_v57 = vpop.eup %3978  ;;  %958 = vmatpush.bf16.msra.mxu1 %v4760_v4  ;;  %971 = vmatpush.bf16.msrb.mxu2 %v4762_v56  ;;  %v4770_v36 = vor.u32 %v3892_v41, %v3524_v54  ;;  %v3526_v9 = vld [vmem:[#allocation5 + $0x10] sm:$0xf0]  ;;  %v3532_v35 = vld [vmem:[#allocation5 + $0x8] sm:$0xf] }
  0xf4   :  { %6212 = vst [vmem:[#allocation100_spill] sm:$0xff] %v4762_v56  ;;  %v560_v20 = vadd.f32 1.0, %v3979_v57  ;;  %984 = vmatpush.bf16.msrb.mxu3 %v4764_v53  ;;  %v4773_v42 = vor.u32 %v3890_v13, %v3526_v9  ;;  %v3893_v11 = vld [vmem:[#allocation5 + $0x14] sm:$0xf0]  ;;  %v3891_v4 = vld [vmem:[#allocation5 + $0xc] sm:$0xf] }
  0xf5   :  { %6213 = vst [vmem:[#allocation101_spill] sm:$0xff] %v4764_v53  ;;  %946 = vmatpush.bf16.msrb.mxu0 %v4770_v36  ;;  %v3534_v57 = vld [vmem:[#allocation5 + $0x18] sm:$0xf0]  ;;  %v4775_v6 = vor.u32 %v3893_v11, %v3532_v35  ;;  %v3981_v54 = vpop.eup %3980  ;;  %v3756_v7 = vld [vmem:[#allocation7 + $0xc8] sm:$0xf] }
  0xf6   :  { %6214 = vst [vmem:[#allocation102_spill] sm:$0xff] %v4770_v36  ;;  %3982 = vrcp.f32 %v560_v20  ;;  %v4777_v56 = vor.u32 %v3891_v4, %v3534_v57  ;;  %v593_v27 = vmul.f32 %v3981_v54, %v561_v19  ;;  %v588_v13 = vand.u32 2147483648, %v560_v20  ;;  %v3740_v44 = vld [vmem:[#allocation7 + $0xa8] sm:$0xf]  ;;  %v3943_v45 = vld [vmem:[#allocation7 + $0xac] sm:$0xf] }
  0xf7   :  { %6215 = vst [vmem:[#allocation103_spill] sm:$0xff] %v4773_v42  ;;  %959 = vmatpush.bf16.msra.mxu1 %v4773_v42  ;;  %972 = vmatpush.bf16.msrb.mxu2 %v4775_v6  ;;  %v586_v2 = vand.u32 2147483647, %v560_v20  ;;  %vm582_vm7 = vweird.f32 %v560_v20  ;;  %vm598_vm10 = vweird.f32 %v3981_v54 }
  0xf8   :  { %6216 = vst [vmem:[#allocation104_spill] sm:$0xff] %v4775_v6  ;;  %985 = vmatpush.bf16.msrb.mxu3 %v4777_v56  ;;  %v594_v16 = vsub.f32 1.0, %v593_v27  ;;  %v589_v4 = vor.u32 1.1754944e-38, %v588_v13  ;;  %vm599_vm12 = vmor %vm597_vm11, %vm598_vm10  ;;  %v3764_v13 = vld [vmem:[#allocation7 + $0xe0] sm:$0xf] }
  0xf9   :  { %6217 = vst [vmem:[#allocation105_spill] sm:$0xff] %v4777_v56  ;;  %vm587_vm9 = vcmp.eq.f32.partialorder %v586_v2, 8.507059e+37 }
  0xfa   :  { %v595_v57 = vmul.f32 %v3981_v54, %v594_v16 }
  0xfc   :  { %v3983_v41 = vpop.eup %3982  ;;  %v596_v18 = vadd.f32 %v3981_v54, %v595_v57 }
  0xfd   :  { %v578_v53 = vmul.f32 %v3983_v41, %v560_v20  ;;  %vm583_vm6 = vweird.f32 %v3983_v41 }
  0xfe   :  { %vm584_vm8 = vmor %vm582_vm7, %vm583_vm6  ;;  %v600_v27 = vsel %vm599_vm12, %v3981_v54, %v596_v18  ;;  %v3748_v18 = vld [vmem:[#allocation7 + $0xc0] sm:$0xf]  ;;  %v3948_v54 = vld [vmem:[#allocation7 + $0xcc] sm:$0xf0] }
  0xff   :  { %v579_v36 = vsub.f32 1.0, %v578_v53  ;;  %v603_v53 = vand.u32 2147483648, %v561_v19 }
 0x101   :  { %v580_v9 = vmul.f32 %v3983_v41, %v579_v36  ;;  %v601_v36 = vand.u32 2147483647, %v561_v19  ;;  %v604_v20 = vor.u32 1.1754944e-38, %v603_v53 }
 0x103   :  { %v581_v35 = vadd.f32 %v3983_v41, %v580_v9  ;;  %vm602_vm13 = vcmp.eq.f32.partialorder %v601_v36, 8.507059e+37  ;;  %v3950_v9 = vld [vmem:[#allocation7 + $0xe4] sm:$0xf] }
 0x104   :  { %v605_v16 = vsel %vm602_vm13, %v604_v20, %v600_v27  ;;  %v3946_v27 = vld [vmem:[#allocation7 + $0xc4] sm:$0xf]  ;;  %v3750_v20 = vld [vmem:[#allocation7 + $0xd0] sm:$0xf0] }
 0x105   :  { %v585_v11 = vsel %vm584_vm8, %v3983_v41, %v581_v35  ;;  %v3952_v41 = vld [vmem:[#allocation7 + $0xec] sm:$0xf0]  ;;  %v3772_v35 = vld [vmem:[#allocation7 + $0xe8] sm:$0xf] }
 0x106   :  { %v590_v6 = vsel %vm587_vm9, %v589_v4, %v585_v11  ;;  %v3951_v4 = vld [vmem:[#allocation7 + $0xec] sm:$0xf]  ;;  %v3774_v11 = vld [vmem:[#allocation7 + $0xf8] sm:$0xf0] }
 0x107   :  { %v608_v42 = vmul.f32 0.0, %v590_v6  ;;  %v3766_v6 = vld [vmem:[#allocation7 + $0xf0] sm:$0xf0]  ;;  %v4794_v36 = vor.u32 %v3951_v4, %v3774_v11  ;;  %v3942_v4 = vld [vmem:[#allocation7 + $0xa4] sm:$0xf] }
 0x108   :  { %v4790_v19 = vor.u32 %v3950_v9, %v3766_v6  ;;  %v3732_v9 = vld [vmem:[#allocation7 + $0xa0] sm:$0xf]  ;;  %v3944_v6 = vld [vmem:[#allocation7 + $0xac] sm:$0xf0]  ;;  %v3734_v11 = vld [vmem:[#allocation7 + $0xb0] sm:$0xf0] }
 0x109   :  { %v4783_v56 = vadd.f32 %v4730_v15, %v608_v42  ;;  %v3953_v42 = vld [vmem:[#allocation7 + $0xf4] sm:$0xf0]  ;;  %6222 = vst [vmem:[#allocation110_spill] sm:$0xff] %v4794_v36 }
 0x10a   :  { %6220 = vst [vmem:[#allocation108_spill] sm:$0xff] %v4790_v19  ;;  %v4792_v53 = vor.u32 %v3953_v42, %v3772_v35 }
 0x10b   :  { %6218 = vst [vmem:[#allocation106_spill] sm:$0xff] %v4783_v56  ;;  %3984 = vtanh.f32 %v4783_v56  ;;  %v4788_v56 = vor.u32 %v3952_v41, %v3764_v13  ;;  %v4802_v13 = vor.u32 %v3948_v54, %v3748_v18  ;;  %v4804_v41 = vor.u32 %v3946_v27, %v3750_v20  ;;  %v3716_v27 = vld [vmem:[#allocation7 + $0x80] sm:$0xf]  ;;  %v3940_v20 = vld [vmem:[#allocation7 + $0x8c] sm:$0xf0] }
 0x10c   :  { %6221 = vst [vmem:[#allocation109_spill] sm:$0xff] %v4792_v53  ;;  %v4814_v18 = vor.u32 %v3944_v6, %v3732_v9  ;;  %v4816_v54 = vor.u32 %v3942_v4, %v3734_v11  ;;  %v4826_v9 = vor.u32 %v3940_v20, %v3716_v27  ;;  %v3700_v4 = vld [vmem:[#allocation7 + $0x60] sm:$0xf]  ;;  %v3936_v11 = vld [vmem:[#allocation7 + $0x6c] sm:$0xf0] }
 0x10d   :  { %6219 = vst [vmem:[#allocation107_spill] sm:$0xff] %v4788_v56  ;;  %v4838_v27 = vor.u32 %v3936_v11, %v3700_v4  ;;  %v3933_v4 = vld [vmem:[#allocation7 + $0x54] sm:$0xf0]  ;;  %v3931_v11 = vld [vmem:[#allocation7 + $0x4c] sm:$0xf] }
 0x10e   :  { %6223 = vst [vmem:[#allocation111_spill] sm:$0xff] %v4802_v13 }
 0x10f   :  { %6224 = vst [vmem:[#allocation112_spill] sm:$0xff] %v4804_v41 }
 0x110   :  { %6227 = vst [vmem:[#allocation115_spill] sm:$0xff] %v4814_v18 }
 0x111   :  { %v3985_v2 = vpop.eup %3984  ;;  %6228 = vst [vmem:[#allocation116_spill] sm:$0xff] %v4816_v54 }
 0x112   :  { %v612_v15 = vmul.f32 %v3985_v2, %v605_v16  ;;  %v3949_v2 = vld [vmem:[#allocation7 + $0xd4] sm:$0xf0]  ;;  %v3947_v16 = vld [vmem:[#allocation7 + $0xcc] sm:$0xf]  ;;  %6231 = vst [vmem:[#allocation119_spill] sm:$0xff] %v4826_v9 }
 0x113   :  { %v4808_v35 = vor.u32 %v3949_v2, %v3756_v7  ;;  %6235 = vst [vmem:[#allocation123_spill] sm:$0xff] %v4838_v27 }
 0x114   :  { %v4786_v57 = vpack.c.bf16 %v612_v15, %v612_v15  ;;  %v3758_v15 = vld [vmem:[#allocation7 + $0xd8] sm:$0xf0] }
 0x115   :  { %6225 = vst [vmem:[#allocation113_spill] sm:$0xff] %v4808_v35  ;;  %v4810_v42 = vor.u32 %v3947_v16, %v3758_v15  ;;  %v3938_v16 = vld [vmem:[#allocation7 + $0x84] sm:$0xf]  ;;  %v3718_v15 = vld [vmem:[#allocation7 + $0x90] sm:$0xf0] }
 0x116   :  { %626 = vmatmul.bf16.vlgmr.msra.gmra.mxu0 %v4786_v57  ;;  %639 = vmatmul.bf16.vlgmr.msrb.gmra.mxu1 %v4786_v57  ;;  %v4828_v6 = vor.u32 %v3938_v16, %v3718_v15  ;;  %v3684_v16 = vld [vmem:[#allocation7 + $0x40] sm:$0xf]  ;;  %v3932_v15 = vld [vmem:[#allocation7 + $0x4c] sm:$0xf0] }
 0x117   :  { %652 = vmatmul.bf16.vlgmr.msra.gmra.mxu2 %v4786_v57  ;;  %665 = vmatmul.bf16.vlgmr.msra.gmra.mxu3 %v4786_v57  ;;  %6226 = vst [vmem:[#allocation114_spill] sm:$0xff] %v4810_v42 }
 0x118   :  { %1183 = vmatpush.bf16.msra.mxu0 %v4788_v56  ;;  %1196 = vmatpush.bf16.msrb.mxu1 %v4790_v19  ;;  %v3945_v56 = vld [vmem:[#allocation7 + $0xb4] sm:$0xf0]  ;;  %v3742_v19 = vld [vmem:[#allocation7 + $0xb8] sm:$0xf0]  ;;  %6232 = vst [vmem:[#allocation120_spill] sm:$0xff] %v4828_v6 }
 0x119   :  { %1209 = vmatpush.bf16.msra.mxu2 %v4792_v53  ;;  %1222 = vmatpush.bf16.msra.mxu3 %v4794_v36  ;;  %v4820_v7 = vor.u32 %v3945_v56, %v3740_v44  ;;  %v4822_v2 = vor.u32 %v3943_v45, %v3742_v19  ;;  %v3724_v36 = vld [vmem:[#allocation7 + $0x88] sm:$0xf]  ;;  %v3939_v53 = vld [vmem:[#allocation7 + $0x8c] sm:$0xf]  ;;  %v3934_v56 = vld [vmem:[#allocation7 + $0x64] sm:$0xf] }
 0x11a   :  { %v3702_v19 = vld [vmem:[#allocation7 + $0x70] sm:$0xf0] }
 0x11b   :  { %6229 = vst [vmem:[#allocation117_spill] sm:$0xff] %v4820_v7  ;;  %v4840_v20 = vor.u32 %v3934_v56, %v3702_v19  ;;  %v3694_v56 = vld [vmem:[#allocation7 + $0x58] sm:$0xf0] }
 0x11c   :  { %1184 = vmatpush.bf16.msra.mxu0 %v4802_v13  ;;  %1197 = vmatpush.bf16.msrb.mxu1 %v4804_v41  ;;  %6230 = vst [vmem:[#allocation118_spill] sm:$0xff] %v4822_v2  ;;  %v3941_v13 = vld [vmem:[#allocation7 + $0x94] sm:$0xf0]  ;;  %v3726_v41 = vld [vmem:[#allocation7 + $0x98] sm:$0xf0] }
 0x11d   :  { %1210 = vmatpush.bf16.msra.mxu2 %v4808_v35  ;;  %1223 = vmatpush.bf16.msra.mxu3 %v4810_v42  ;;  %v4832_v45 = vor.u32 %v3941_v13, %v3724_v36  ;;  %v4834_v44 = vor.u32 %v3939_v53, %v3726_v41  ;;  %v3708_v42 = vld [vmem:[#allocation7 + $0x68] sm:$0xf]  ;;  %v3935_v35 = vld [vmem:[#allocation7 + $0x6c] sm:$0xf]  ;;  %6236 = vst [vmem:[#allocation124_spill] sm:$0xff] %v4840_v20 }
 0x11e   :  { %v3930_v13 = vld [vmem:[#allocation7 + $0x44] sm:$0xf]  ;;  %v3686_v41 = vld [vmem:[#allocation7 + $0x50] sm:$0xf0] }
 0x11f   :  { %6233 = vst [vmem:[#allocation121_spill] sm:$0xff] %v4832_v45 }
 0x120   :  { %1185 = vmatpush.bf16.msra.mxu0 %v4814_v18  ;;  %1198 = vmatpush.bf16.msrb.mxu1 %v4816_v54  ;;  %6234 = vst [vmem:[#allocation122_spill] sm:$0xff] %v4834_v44  ;;  %v3937_v18 = vld [vmem:[#allocation7 + $0x74] sm:$0xf0]  ;;  %v3710_v54 = vld [vmem:[#allocation7 + $0x78] sm:$0xf0] }
 0x121   :  { %1211 = vmatpush.bf16.msra.mxu2 %v4820_v7  ;;  %1224 = vmatpush.bf16.msra.mxu3 %v4822_v2  ;;  %v4844_v53 = vor.u32 %v3937_v18, %v3708_v42  ;;  %v4846_v36 = vor.u32 %v3935_v35, %v3710_v54  ;;  %v3692_v2 = vld [vmem:[#allocation7 + $0x48] sm:$0xf]  ;;  %v4854_v35 = vor.u32 %v3932_v15, %v3684_v16  ;;  %v3668_v18 = vld [vmem:[#allocation7 + $0x20] sm:$0xf]  ;;  %v3928_v54 = vld [vmem:[#allocation7 + $0x2c] sm:$0xf0] }
 0x122   :  { %v4856_v42 = vor.u32 %v3930_v13, %v3686_v41  ;;  %v4860_v19 = vor.u32 %v3933_v4, %v3692_v2  ;;  %v4866_v16 = vor.u32 %v3928_v54, %v3668_v18  ;;  %v3652_v13 = vld [vmem:[#allocation7] sm:$0xf]  ;;  %v3924_v41 = vld [vmem:[#allocation7 + $0xc] sm:$0xf0] }
 0x123   :  { %6237 = vst [vmem:[#allocation125_spill] sm:$0xff] %v4844_v53  ;;  %v6251_v54 = vld [vmem:[#allocation88_spill] sm:$0xff] }
 0x124   :  { %1186 = vmatpush.bf16.msra.mxu0 %v4826_v9  ;;  %1199 = vmatpush.bf16.msrb.mxu1 %v4828_v6  ;;  %6238 = vst [vmem:[#allocation126_spill] sm:$0xff] %v4846_v36  ;;  %v3676_v6 = vld [vmem:[#allocation7 + $0x28] sm:$0xf]  ;;  %v3927_v9 = vld [vmem:[#allocation7 + $0x2c] sm:$0xf] }
 0x125   :  { %1212 = vmatpush.bf16.msra.mxu2 %v4832_v45  ;;  %1225 = vmatpush.bf16.msra.mxu3 %v4834_v44  ;;  %6239 = vst [vmem:[#allocation127_spill] sm:$0xff] %v4854_v35  ;;  %v4862_v44 = vor.u32 %v3931_v11, %v3694_v56  ;;  %v3926_v45 = vld [vmem:[#allocation7 + $0x24] sm:$0xf]  ;;  %v3654_v56 = vld [vmem:[#allocation7 + $0x10] sm:$0xf0] }
 0x126   :  { %947 = vmatmul.bf16.vlgmr.msrb.gmra.mxu0 %v4786_v57  ;;  %960 = vmatmul.bf16.vlgmr.msra.gmra.mxu1 %v4786_v57  ;;  %6240 = vst [vmem:[#allocation128_spill] sm:$0xff] %v4856_v42  ;;  %v3922_v11 = vld [vmem:[#allocation7 + $0x4] sm:$0xf] }
 0x127   :  { %973 = vmatmul.bf16.vlgmr.msrb.gmra.mxu2 %v4786_v57  ;;  %986 = vmatmul.bf16.vlgmr.msrb.gmra.mxu3 %v4786_v57  ;;  %v3670_v57 = vld [vmem:[#allocation7 + $0x30] sm:$0xf0]  ;;  %v4880_v18 = vor.u32 %v3922_v11, %v3654_v56  ;;  %v6256_v56 = vld [vmem:[#allocation93_spill] sm:$0xff] }
 0x128   :  { %1187 = vmatpush.bf16.msra.mxu0 %v4838_v27  ;;  %1200 = vmatpush.bf16.msrb.mxu1 %v4840_v20  ;;  %v3929_v27 = vld [vmem:[#allocation7 + $0x34] sm:$0xf0]  ;;  %v3678_v20 = vld [vmem:[#allocation7 + $0x38] sm:$0xf0]  ;;  %v4868_v15 = vor.u32 %v3926_v45, %v3670_v57  ;;  %v4878_v45 = vor.u32 %v3924_v41, %v3652_v13  ;;  %v6253_v13 = vld [vmem:[#allocation90_spill] sm:$0xff] }
 0x129   :  { %1213 = vmatpush.bf16.msra.mxu2 %v4844_v53  ;;  %1226 = vmatpush.bf16.msra.mxu3 %v4846_v36  ;;  %v4872_v2 = vor.u32 %v3929_v27, %v3676_v6  ;;  %v4874_v4 = vor.u32 %v3927_v9, %v3678_v20  ;;  %v3660_v36 = vld [vmem:[#allocation7 + $0x8] sm:$0xf]  ;;  %v3923_v53 = vld [vmem:[#allocation7 + $0xc] sm:$0xf]  ;;  %6242 = vst [vmem:[#allocation130_spill] sm:$0xff] %v4880_v18  ;;  %v6245_v27 = vmov 0  }
 0x12a   :  { %6241 = vst [vmem:[#allocation129_spill] sm:$0xff] %v4878_v45  ;;  %v6246_v20 = vld [vmem:[#allocation83_spill] sm:$0xff]  ;;  %v6252_v57 = vld [vmem:[#allocation89_spill] sm:$0xff]  ;;  %v6255_v11 = vld [vmem:[#allocation92_spill] sm:$0xff] }
 0x12b   :  { %v6254_v41 = vld [vmem:[#allocation91_spill] sm:$0xff] }
 0x12c   :  { %1188 = vmatpush.bf16.msra.mxu0 %v4854_v35  ;;  %1201 = vmatpush.bf16.msrb.mxu1 %v4856_v42  ;;  %v3925_v35 = vld [vmem:[#allocation7 + $0x14] sm:$0xf0]  ;;  %v3662_v42 = vld [vmem:[#allocation7 + $0x18] sm:$0xf0] }
 0x12d   :  { %1214 = vmatpush.bf16.msra.mxu2 %v4860_v19  ;;  %1227 = vmatpush.bf16.msra.mxu3 %v4862_v44  ;;  %v4884_v9 = vor.u32 %v3925_v35, %v3660_v36  ;;  %v4886_v6 = vor.u32 %v3923_v53, %v3662_v42  ;;  %v6247_v53 = vld [vmem:[#allocation84_spill] sm:$0xff]  ;;  %v6248_v36 = vld [vmem:[#allocation85_spill] sm:$0xff]  ;;  %v6249_v35 = vld [vmem:[#allocation86_spill] sm:$0xff] }
 0x12e   :  { %v6250_v42 = vld [vmem:[#allocation87_spill] sm:$0xff] }
 0x12f   :  { %6243 = vst [vmem:[#allocation131_spill] sm:$0xff] %v4884_v9 }
 0x130   :  { %1189 = vmatpush.bf16.msra.mxu0 %v4866_v16  ;;  %1202 = vmatpush.bf16.msrb.mxu1 %v4868_v15  ;;  %6244 = vst [vmem:[#allocation132_spill] sm:$0xff] %v4886_v6 }
 0x131   :  { %1215 = vmatpush.bf16.msra.mxu2 %v4872_v2  ;;  %1228 = vmatpush.bf16.msra.mxu3 %v4874_v4 }
 0x134   :  { %1190 = vmatpush.bf16.msra.mxu0 %v4878_v45  ;;  %1203 = vmatpush.bf16.msrb.mxu1 %v4880_v18 }
 0x135   :  { %1216 = vmatpush.bf16.msra.mxu2 %v4884_v9  ;;  %1229 = vmatpush.bf16.msra.mxu3 %v4886_v6 }
 0x137   :  { %1191 = vmatmul.bf16.vlgmr.msra.gmra.mxu0 %v6245_v27  ;;  %1204 = vmatmul.bf16.vlgmr.msrb.gmra.mxu1 %v6245_v27 }
 0x138   :  { %1307 = vmatpush.bf16.msrb.mxu0 %v4385_v14  ;;  %1320 = vmatpush.bf16.msra.mxu1 %v4396_v22 }
 0x139   :  { %1217 = vmatmul.bf16.vlgmr.msra.gmra.mxu2 %v6245_v27  ;;  %1230 = vmatmul.bf16.vlgmr.msra.gmra.mxu3 %v6245_v27  ;;  %v6257_v27 = vld [vmem:[#allocation94_spill] sm:$0xff] }
 0x13a   :  { %1333 = vmatpush.bf16.msrb.mxu2 %v4398_v23  ;;  %1346 = vmatpush.bf16.msrb.mxu3 %v4403_v29 }
 0x13c   :  { %1308 = vmatpush.bf16.msrb.mxu0 %v4401_v25  ;;  %1321 = vmatpush.bf16.msra.mxu1 %v4415_v32 }
 0x13e   :  { %1334 = vmatpush.bf16.msrb.mxu2 %v4417_v33  ;;  %1347 = vmatpush.bf16.msrb.mxu3 %v4423_v43 }
 0x140   :  { %1309 = vmatpush.bf16.msrb.mxu0 %v4420_v37  ;;  %1322 = vmatpush.bf16.msra.mxu1 %v4427_v46 }
 0x142   :  { %1335 = vmatpush.bf16.msrb.mxu2 %v4429_v48  ;;  %1348 = vmatpush.bf16.msrb.mxu3 %v4435_v52 }
 0x144   :  { %1310 = vmatpush.bf16.msrb.mxu0 %v4432_v50  ;;  %1323 = vmatpush.bf16.msra.mxu1 %v4439_v58 }
 0x146   :  { %1336 = vmatpush.bf16.msrb.mxu2 %v4441_v59  ;;  %1349 = vmatpush.bf16.msrb.mxu3 %v4447_v61 }
 0x148   :  { %1311 = vmatpush.bf16.msrb.mxu0 %v4444_v60  ;;  %1324 = vmatpush.bf16.msra.mxu1 %v4472_v17 }
 0x14a   :  { %1337 = vmatpush.bf16.msrb.mxu2 %v4464_v8  ;;  %1350 = vmatpush.bf16.msrb.mxu3 %v4470_v12 }
 0x14c   :  { %1312 = vmatpush.bf16.msrb.mxu0 %v4457_v1  ;;  %1325 = vmatpush.bf16.msra.mxu1 %v4484_v31 }
 0x14e   :  { %1338 = vmatpush.bf16.msrb.mxu2 %v4479_v24  ;;  %1351 = vmatpush.bf16.msrb.mxu3 %v4481_v26 }
 0x150   :  { %1313 = vmatpush.bf16.msrb.mxu0 %v4476_v21  ;;  %1326 = vmatpush.bf16.msra.mxu1 %v4515_v55 }
 0x152   :  { %1339 = vmatpush.bf16.msrb.mxu2 %v4487_v38  ;;  %1352 = vmatpush.bf16.msrb.mxu3 %v4493_v40 }
 0x154   :  { %1314 = vmatpush.bf16.msrb.mxu0 %v4490_v39  ;;  %1327 = vmatpush.bf16.msra.mxu1 %v4520_v63 }
 0x156   :  { %1340 = vmatpush.bf16.msrb.mxu2 %v4497_v47  ;;  %1353 = vmatpush.bf16.msrb.mxu3 %v4501_v49 }
 0x158   :  { %1426 = vmatpush.bf16.msra.mxu0 %v4649_v0  ;;  %1439 = vmatpush.bf16.msrb.mxu1 %v4651_v3 }
 0x15a   :  { %1452 = vmatpush.bf16.msra.mxu2 %v4654_v51  ;;  %1465 = vmatpush.bf16.msra.mxu3 %v4656_v10 }
 0x15c   :  { %1427 = vmatpush.bf16.msra.mxu0 %v4667_v62  ;;  %1440 = vmatpush.bf16.msrb.mxu1 %v4672_v34  ;;  %v6274_v62 = vld [vmem:[#allocation46_spill] sm:$0xff] }
 0x15e   :  { %1453 = vmatpush.bf16.msra.mxu2 %v4674_v5  ;;  %1466 = vmatpush.bf16.msra.mxu3 %v4678_v28 }
 0x160   :  { %1428 = vmatpush.bf16.msra.mxu0 %v4688_v30  ;;  %1441 = vmatpush.bf16.msrb.mxu1 %v6246_v20  ;;  %v6272_v30 = vld [vmem:[#allocation54_spill] sm:$0xff] }
 0x162   :  { %1454 = vmatpush.bf16.msra.mxu2 %v6247_v53  ;;  %1467 = vmatpush.bf16.msra.mxu3 %v6248_v36  ;;  %v6258_v53 = vld [vmem:[#allocation95_spill] sm:$0xff]  ;;  %v6259_v36 = vld [vmem:[#allocation96_spill] sm:$0xff] }
 0x164   :  { %1429 = vmatpush.bf16.msra.mxu0 %v6249_v35  ;;  %1442 = vmatpush.bf16.msrb.mxu1 %v6250_v42  ;;  %v6260_v35 = vld [vmem:[#allocation97_spill] sm:$0xff]  ;;  %v6261_v42 = vld [vmem:[#allocation98_spill] sm:$0xff] }
 0x166   :  { %1455 = vmatpush.bf16.msra.mxu2 %v6251_v54  ;;  %1468 = vmatpush.bf16.msra.mxu3 %v6252_v57  ;;  %v6262_v54 = vld [vmem:[#allocation99_spill] sm:$0xff]  ;;  %v6263_v57 = vld [vmem:[#allocation100_spill] sm:$0xff] }
 0x168   :  { %1430 = vmatpush.bf16.msra.mxu0 %v6253_v13  ;;  %1443 = vmatpush.bf16.msrb.mxu1 %v6254_v41  ;;  %v6264_v13 = vld [vmem:[#allocation101_spill] sm:$0xff]  ;;  %v6265_v41 = vld [vmem:[#allocation102_spill] sm:$0xff] }
 0x16a   :  { %1456 = vmatpush.bf16.msra.mxu2 %v6255_v11  ;;  %1469 = vmatpush.bf16.msra.mxu3 %v6256_v56  ;;  %v6266_v11 = vld [vmem:[#allocation103_spill] sm:$0xff]  ;;  %v6267_v56 = vld [vmem:[#allocation104_spill] sm:$0xff] }
 0x16c   :  { %1431 = vmatpush.bf16.msra.mxu0 %v6257_v27  ;;  %1444 = vmatpush.bf16.msrb.mxu1 %v6258_v53  ;;  %v6268_v27 = vld [vmem:[#allocation105_spill] sm:$0xff]  ;;  %v6269_v53 = vld [vmem:[#allocation42_spill] sm:$0xff] }
 0x16e   :  { %1457 = vmatpush.bf16.msra.mxu2 %v6259_v36  ;;  %1470 = vmatpush.bf16.msra.mxu3 %v6260_v35  ;;  %v6270_v36 = vld [vmem:[#allocation44_spill] sm:$0xff]  ;;  %v6271_v35 = vld [vmem:[#allocation55_spill] sm:$0xff] }
 0x16f   :  { %v162_v20 = vadd.f32 %v6270_v36, %v6269_v53 }
 0x170   :  { %1432 = vmatpush.bf16.msra.mxu0 %v6261_v42  ;;  %1445 = vmatpush.bf16.msrb.mxu1 %v6262_v54  ;;  %v191_v42 = vadd.f32 %v6272_v30, %v6271_v35 }
 0x172   :  { %1458 = vmatpush.bf16.msra.mxu2 %v6263_v57  ;;  %1471 = vmatpush.bf16.msra.mxu3 %v6264_v13 }
 0x174   :  { %1433 = vmatpush.bf16.msra.mxu0 %v6265_v41  ;;  %1446 = vmatpush.bf16.msrb.mxu1 %v6266_v11  ;;  %v6273_v41 = vld [vmem:[#allocation49_spill] sm:$0xff] }
 0x175   :  { %v220_v11 = vadd.f32 %v6274_v62, %v6273_v41  ;;  %v6275_v62 = vld [vmem:[#allocation50_spill] sm:$0xff] }
 0x176   :  { %1459 = vmatpush.bf16.msra.mxu2 %v6267_v56  ;;  %1472 = vmatpush.bf16.msra.mxu3 %v6268_v27 }
 0x193   :  { %v627_v28 = vpop.f32.mrf.mxu0  ;;  %v640_v54 = vpop.f32.mrf.mxu1 }
 0x194   :  { %v670_v5 = vadd.f32 %v627_v28, %v162_v20  ;;  %v671_v57 = vadd.f32 %v640_v54, %v191_v42  ;;  %v6276_v54 = vld [vmem:[#allocation47_spill] sm:$0xff] }
 0x196   :  { %v3519_v34 = vmul.f32 -1.442695, %v670_v5  ;;  %v3520_v13 = vmul.f32 -1.442695, %v671_v57  ;;  %v249_v57 = vadd.f32 %v6276_v54, %v6275_v62  ;;  %v4976_v54 = vld [vmem:[%s5921_s6] sm:$0xf] }
 0x198   :  { %3986 = vpow2.f32 %v3519_v34 }
 0x199   :  { %3988 = vpow2.f32 %v3520_v13 }
 0x19a   :  { %v653_v56 = vpop.f32.mrf.mxu2  ;;  %v666_v10 = vpop.f32.mrf.mxu3 }
 0x19b   :  { %v672_v27 = vadd.f32 %v653_v56, %v220_v11  ;;  %v629_v51 = vpop.f32.mrf.mxu0  ;;  %v642_v49 = vpop.f32.mrf.mxu1 }
 0x19c   :  { %v673_v49 = vadd.f32 %v666_v10, %v249_v57 }
 0x19d   :  { %v3521_v36 = vmul.f32 -1.442695, %v672_v27 }
 0x19e   :  { %v3987_v53 = vpop.eup %3986 }
 0x19f   :  { %v3989_v47 = vpop.eup %3988  ;;  %v683_v30 = vadd.f32 1.0, %v3987_v53  ;;  %3990 = vpow2.f32 %v3521_v36 }
 0x1a0   :  { %v684_v35 = vadd.f32 1.0, %v3989_v47 }
 0x1a1   :  { %3992 = vrcp.f32 %v683_v30  ;;  %v695_v41 = vand.u32 2147483647, %v683_v30  ;;  %vm691_vm0 = vweird.f32 %v683_v30 }
 0x1a2   :  { %3994 = vrcp.f32 %v684_v35  ;;  %v655_v5 = vpop.f32.mrf.mxu2  ;;  %v668_v28 = vpop.f32.mrf.mxu3  ;;  %v712_v10 = vand.u32 2147483648, %v684_v35  ;;  %vm706_vm2 = vweird.f32 %v684_v35 }
 0x1a3   :  { %v948_v34 = vpop.f32.mrf.mxu0  ;;  %v961_v20 = vpop.f32.mrf.mxu1  ;;  %v697_v28 = vand.u32 2147483648, %v683_v30  ;;  %vm696_vm5 = vcmp.eq.f32.partialorder %v695_v41, 8.507059e+37 }
 0x1a4   :  { %v713_v39 = vor.u32 1.1754944e-38, %v712_v10 }
 0x1a5   :  { %v3991_v42 = vpop.eup %3990 }
 0x1a6   :  { %v4968_v13 = vadd.f32 1.0, %v3991_v42 }
 0x1a7   :  { %v3993_v51 = vpop.eup %3992 }
 0x1a8   :  { %v3995_v11 = vpop.eup %3994  ;;  %v687_v56 = vmul.f32 %v3993_v51, %v683_v30  ;;  %3996 = vrcp.f32 %v4968_v13  ;;  %vm692_vm14 = vweird.f32 %v3993_v51  ;;  %vm721_vm8 = vweird.f32 %v4968_v13 }
 0x1a9   :  { %v702_v53 = vmul.f32 %v3995_v11, %v684_v35  ;;  %3998 = vtanh.f32 %v673_v49  ;;  %vm707_vm15 = vweird.f32 %v3995_v11  ;;  %v4982_v49 = vperm.slane %v4976_v54, 1  ;;  %vm693_vm3 = vmor %vm691_vm0, %vm692_vm14 }
 0x1aa   :  { %v688_v47 = vsub.f32 1.0, %v687_v56  ;;  %v974_v27 = vpop.f32.mrf.mxu2  ;;  %v4971_v36 = vpop.f32.mrf.mxu3  ;;  %v710_v56 = vand.u32 2147483647, %v684_v35  ;;  %vm708_vm4 = vmor %vm706_vm2, %vm707_vm15  ;;  %v6277_v35 = vld [vmem:[#allocation106_spill] sm:$0xff] }
 0x1ab   :  { %v703_v5 = vsub.f32 1.0, %v702_v53  ;;  %v950_v42 = vpop.f32.mrf.mxu0  ;;  %v963_v62 = vpop.f32.mrf.mxu1  ;;  %v4979_v53 = vperm.slane %v4976_v54, 0 }
 0x1ac   :  { %v689_v57 = vmul.f32 %v3993_v51, %v688_v47  ;;  %v698_v62 = vor.u32 1.1754944e-38, %v697_v28  ;;  %vm711_vm6 = vcmp.eq.f32.partialorder %v710_v56, 8.507059e+37 }
 0x1ad   :  { %v704_v3 = vmul.f32 %v3995_v11, %v703_v5  ;;  %v949_v12 = vadd.f32 %v948_v34, %v4979_v53 }
 0x1ae   :  { %v3997_v0 = vpop.eup %3996  ;;  %v690_v63 = vadd.f32 %v3993_v51, %v689_v57 }
 0x1af   :  { %v717_v42 = vmul.f32 %v3997_v0, %v4968_v13  ;;  %v705_v47 = vadd.f32 %v3995_v11, %v704_v3  ;;  %v3999_v40 = vpop.eup %3998  ;;  %v962_v3 = vadd.f32 %v961_v20, %v4982_v49  ;;  %vm722_vm7 = vweird.f32 %v3997_v0 }
 0x1b0   :  { %v694_v5 = vsel %vm693_vm3, %v3993_v51, %v690_v63  ;;  %vm723_vm9 = vmor %vm721_vm8, %vm722_vm7 }
 0x1b1   :  { %v718_v38 = vsub.f32 1.0, %v717_v42  ;;  %v699_v57 = vsel %vm696_vm5, %v698_v62, %v694_v5  ;;  %v709_v30 = vsel %vm708_vm4, %v3995_v11, %v705_v47 }
 0x1b2   :  { %v714_v55 = vsel %vm711_vm6, %v713_v39, %v709_v30  ;;  %v733_v21 = vmul.f32 %v3999_v40, %v699_v57  ;;  %v976_v26 = vpop.f32.mrf.mxu2  ;;  %v989_v24 = vpop.f32.mrf.mxu3  ;;  %v4991_v39 = vperm.slane %v4976_v54, 2  ;;  %v725_v40 = vand.u32 2147483647, %v4968_v13 }
 0x1b3   :  { %v719_v31 = vmul.f32 %v3997_v0, %v718_v38  ;;  %v732_v1 = vmul.f32 %v714_v55, %v6277_v35  ;;  %v727_v24 = vand.u32 2147483648, %v4968_v13 }
 0x1b4   :  { %v1192_v28 = vpop.f32.mrf.mxu0  ;;  %v1205_v10 = vpop.f32.mrf.mxu1  ;;  %vm726_vm10 = vcmp.eq.f32.partialorder %v725_v40, 8.507059e+37 }
 0x1b5   :  { %v4988_v63 = vadd.f32 %v733_v21, %v732_v1  ;;  %v1235_v41 = vadd.f32 %v1192_v28, %v949_v12  ;;  %v1236_v51 = vadd.f32 %v1205_v10, %v962_v3  ;;  %v720_v42 = vadd.f32 %v3997_v0, %v719_v31  ;;  %v6278_v10 = vld [vmem:[#allocation107_spill] sm:$0xff] }
 0x1b6   :  { %v975_v12 = vadd.f32 %v974_v27, %v4991_v39  ;;  %v728_v21 = vor.u32 1.1754944e-38, %v727_v24  ;;  %v5003_v27 = vperm.slane %v4976_v54, 3  ;;  %v6281_v54 = vld [vmem:[#allocation110_spill] sm:$0xff] }
 0x1b7   :  { %4000 = vtanh.f32 %v4988_v63  ;;  %v3778_v26 = vmul.f32 -1.442695, %v1235_v41  ;;  %v3779_v38 = vmul.f32 -1.442695, %v1236_v51  ;;  %v724_v1 = vsel %vm723_vm9, %v3997_v0, %v720_v42  ;;  %v6279_v41 = vld [vmem:[#allocation108_spill] sm:$0xff]  ;;  %v6280_v51 = vld [vmem:[#allocation109_spill] sm:$0xff] }
 0x1b8   :  { %v729_v62 = vsel %vm726_vm10, %v728_v21, %v724_v1  ;;  %v988_v24 = vadd.f32 %v4971_v36, %v5003_v27  ;;  %v6282_v1 = vld [vmem:[#allocation111_spill] sm:$0xff] }
 0x1b9   :  { %4002 = vpow2.f32 %v3778_v26 }
 0x1ba   :  { %4004 = vpow2.f32 %v3779_v38 }
 0x1bc   :  { %v1218_v31 = vpop.f32.mrf.mxu2  ;;  %v1231_v55 = vpop.f32.mrf.mxu3 }
 0x1bd   :  { %v1237_v34 = vadd.f32 %v1218_v31, %v975_v12  ;;  %v1194_v20 = vpop.f32.mrf.mxu0  ;;  %v1207_v11 = vpop.f32.mrf.mxu1  ;;  %v1238_v40 = vadd.f32 %v1231_v55, %v988_v24  ;;  %v6283_v12 = vld [vmem:[#allocation112_spill] sm:$0xff] }
 0x1be   :  { %v4001_v56 = vpop.eup %4000  ;;  %v6285_v20 = vld [vmem:[#allocation114_spill] sm:$0xff]  ;;  %v6287_v55 = vld [vmem:[#allocation116_spill] sm:$0xff] }
 0x1bf   :  { %v736_v47 = vmul.f32 %v4001_v56, %v729_v62  ;;  %v3780_v5 = vmul.f32 -1.442695, %v1237_v34  ;;  %v4003_v57 = vpop.eup %4002  ;;  %v6284_v34 = vld [vmem:[#allocation113_spill] sm:$0xff] }
 0x1c0   :  { %v4005_v30 = vpop.eup %4004  ;;  %v1248_v35 = vadd.f32 1.0, %v4003_v57 }
 0x1c1   :  { %v4998_v13 = vpack.c.bf16 %v736_v47, %v736_v47  ;;  %4006 = vpow2.f32 %v3780_v5  ;;  %v5000_v0 = vadd.f32 1.0, %v4005_v30  ;;  %v6286_v47 = vld [vmem:[#allocation115_spill] sm:$0xff] }
 0x1c2   :  { %4008 = vrcp.f32 %v1248_v35  ;;  %v1262_v62 = vand.u32 2147483648, %v1248_v35  ;;  %v1260_v30 = vand.u32 2147483647, %v1248_v35  ;;  %vm1256_vm13 = vweird.f32 %v1248_v35 }
 0x1c3   :  { %1315 = vmatmul.bf16.vlgmr.msrb.gmra.mxu0 %v4998_v13  ;;  %1328 = vmatmul.bf16.vlgmr.msra.gmra.mxu1 %v4998_v13  ;;  %4010 = vrcp.f32 %v5000_v0  ;;  %v1277_v5 = vand.u32 2147483648, %v5000_v0  ;;  %vm1271_vm14 = vweird.f32 %v5000_v0 }
 0x1c4   :  { %v1220_v3 = vpop.f32.mrf.mxu2  ;;  %1341 = vmatmul.bf16.vlgmr.msrb.gmra.mxu2 %v4998_v13  ;;  %1354 = vmatmul.bf16.vlgmr.msrb.gmra.mxu3 %v4998_v13  ;;  %v1233_v28 = vpop.f32.mrf.mxu3  ;;  %vm1261_vm0 = vcmp.eq.f32.partialorder %v1260_v30, 8.507059e+37  ;;  %v6294_v30 = vld [vmem:[#allocation124_spill] sm:$0xff] }
 0x1c5   :  { %1479 = vmatpush.bf16.msrb.mxu0 %v6278_v10  ;;  %1492 = vmatpush.bf16.msra.mxu1 %v6279_v41  ;;  %v6288_v3 = vld [vmem:[#allocation118_spill] sm:$0xff] }
 0x1c6   :  { %1505 = vmatpush.bf16.msrb.mxu2 %v6280_v51  ;;  %1518 = vmatpush.bf16.msrb.mxu3 %v6281_v54 }
 0x1c7   :  { %v4007_v42 = vpop.eup %4006 }
 0x1c8   :  { %v5016_v26 = vadd.f32 1.0, %v4007_v42  ;;  %v4009_v38 = vpop.eup %4008  ;;  %v1275_v42 = vand.u32 2147483647, %v5000_v0 }
 0x1c9   :  { %1480 = vmatpush.bf16.msrb.mxu0 %v6282_v1  ;;  %1493 = vmatpush.bf16.msra.mxu1 %v6283_v12  ;;  %v4011_v21 = vpop.eup %4010  ;;  %v1252_v31 = vmul.f32 %v4009_v38, %v1248_v35  ;;  %vm1257_vm11 = vweird.f32 %v4009_v38 }
 0x1ca   :  { %4012 = vrcp.f32 %v5016_v26  ;;  %1506 = vmatpush.bf16.msrb.mxu2 %v6284_v34  ;;  %1519 = vmatpush.bf16.msrb.mxu3 %v6285_v20  ;;  %v1267_v11 = vmul.f32 %v4011_v21, %v5000_v0  ;;  %vm1272_vm12 = vweird.f32 %v4011_v21  ;;  %vm1258_vm15 = vmor %vm1256_vm13, %vm1257_vm11  ;;  %vm1276_vm3 = vcmp.eq.f32.partialorder %v1275_v42, 8.507059e+37 }
 0x1cb   :  { %v1253_v56 = vsub.f32 1.0, %v1252_v31  ;;  %4014 = vtanh.f32 %v1238_v40  ;;  %vm1273_vm2 = vmor %vm1271_vm14, %vm1272_vm12  ;;  %vm1286_vm5 = vweird.f32 %v5016_v26 }
 0x1cc   :  { %v1268_v36 = vsub.f32 1.0, %v1267_v11  ;;  %v1263_v11 = vor.u32 1.1754944e-38, %v1262_v62 }
 0x1cd   :  { %1481 = vmatpush.bf16.msrb.mxu0 %v6286_v47  ;;  %1494 = vmatpush.bf16.msra.mxu1 %v6287_v55  ;;  %v1254_v57 = vmul.f32 %v4009_v38, %v1253_v56  ;;  %v6289_v55 = vld [vmem:[#allocation119_spill] sm:$0xff]  ;;  %v6290_v47 = vld [vmem:[#allocation120_spill] sm:$0xff] }
 0x1ce   :  { %1507 = vmatpush.bf16.msrb.mxu2 %v4820_v7  ;;  %1520 = vmatpush.bf16.msrb.mxu3 %v6288_v3  ;;  %v1269_v28 = vmul.f32 %v4011_v21, %v1268_v36  ;;  %v1278_v7 = vor.u32 1.1754944e-38, %v1277_v5  ;;  %v6291_v36 = vld [vmem:[#allocation121_spill] sm:$0xff]  ;;  %v6293_v5 = vld [vmem:[#allocation123_spill] sm:$0xff] }
 0x1cf   :  { %v1255_v31 = vadd.f32 %v4009_v38, %v1254_v57  ;;  %v6292_v57 = vld [vmem:[#allocation122_spill] sm:$0xff] }
 0x1d0   :  { %v4013_v24 = vpop.eup %4012  ;;  %v1270_v56 = vadd.f32 %v4011_v21, %v1269_v28 }
 0x1d1   :  { %v1282_v40 = vmul.f32 %v4013_v24, %v5016_v26  ;;  %1482 = vmatpush.bf16.msrb.mxu0 %v6289_v55  ;;  %1495 = vmatpush.bf16.msra.mxu1 %v6290_v47  ;;  %v1259_v3 = vsel %vm1258_vm15, %v4009_v38, %v1255_v31  ;;  %v4015_v35 = vpop.eup %4014  ;;  %vm1287_vm4 = vweird.f32 %v4013_v24 }
 0x1d2   :  { %1508 = vmatpush.bf16.msrb.mxu2 %v6291_v36  ;;  %1521 = vmatpush.bf16.msrb.mxu3 %v6292_v57  ;;  %v1264_v20 = vsel %vm1261_vm0, %v1263_v11, %v1259_v3  ;;  %v1274_v34 = vsel %vm1273_vm2, %v4011_v21, %v1270_v56  ;;  %v6296_v21 = vld [vmem:[#allocation126_spill] sm:$0xff]  ;;  %vm1288_vm6 = vmor %vm1286_vm5, %vm1287_vm4 }
 0x1d3   :  { %v1283_v0 = vsub.f32 1.0, %v1282_v40  ;;  %1434 = vmatmul.bf16.vlgmr.msra.gmra.mxu0 %v4998_v13  ;;  %1447 = vmatmul.bf16.vlgmr.msrb.gmra.mxu1 %v4998_v13  ;;  %v1279_v62 = vsel %vm1276_vm3, %v1278_v7, %v1274_v34  ;;  %v1298_v28 = vmul.f32 %v4015_v35, %v1264_v20  ;;  %v6295_v40 = vld [vmem:[#allocation125_spill] sm:$0xff]  ;;  %v6297_v7 = vld [vmem:[#allocation127_spill] sm:$0xff]  ;;  %v6298_v34 = vld [vmem:[#allocation128_spill] sm:$0xff]  ;;  %v1290_v20 = vand.u32 2147483647, %v5016_v26 }
 0x1d4   :  { %1460 = vmatmul.bf16.vlgmr.msra.gmra.mxu2 %v4998_v13  ;;  %1473 = vmatmul.bf16.vlgmr.msra.gmra.mxu3 %v4998_v13  ;;  %v1297_v38 = vmul.f32 0.0, %v1279_v62  ;;  %v1292_v13 = vand.u32 2147483648, %v5016_v26 }
 0x1d5   :  { %1483 = vmatpush.bf16.msrb.mxu0 %v6293_v5  ;;  %1496 = vmatpush.bf16.msra.mxu1 %v6294_v30  ;;  %v1284_v31 = vmul.f32 %v4013_v24, %v1283_v0  ;;  %vm1291_vm7 = vcmp.eq.f32.partialorder %v1290_v20, 8.507059e+37  ;;  %v6305_v20 = vld [vmem:[#allocation40_spill] sm:$0xff] }
 0x1d6   :  { %1509 = vmatpush.bf16.msrb.mxu2 %v6295_v40  ;;  %1522 = vmatpush.bf16.msrb.mxu3 %v6296_v21  ;;  %v5045_v3 = vadd.f32 %v1298_v28, %v1297_v38  ;;  %v1293_v56 = vor.u32 1.1754944e-38, %v1292_v13  ;;  %v6300_v28 = vld [vmem:[#allocation27_spill] sm:$0xff]  ;;  %v6301_v38 = vld [vmem:[#allocation34_spill] sm:$0xff] }
 0x1d7   :  { %v1285_v42 = vadd.f32 %v4013_v24, %v1284_v31  ;;  %v6302_v31 = vld [vmem:[#allocation32_spill] sm:$0xff]  ;;  %v6304_v13 = vld [vmem:[#allocation31_spill] sm:$0xff] }
 0x1d8   :  { %4016 = vtanh.f32 %v5045_v3 }
 0x1d9   :  { %1484 = vmatpush.bf16.msrb.mxu0 %v6297_v7  ;;  %1497 = vmatpush.bf16.msra.mxu1 %v6298_v34  ;;  %v1289_v11 = vsel %vm1288_vm6, %v4013_v24, %v1285_v42  ;;  %v6299_v24 = vld [vmem:[#allocation29_spill] sm:$0xff] }
 0x1da   :  { %1510 = vmatpush.bf16.msrb.mxu2 %v4860_v19  ;;  %1523 = vmatpush.bf16.msrb.mxu3 %v4862_v44  ;;  %v1294_v0 = vsel %vm1291_vm7, %v1293_v56, %v1289_v11  ;;  %v6303_v42 = vld [vmem:[#allocation33_spill] sm:$0xff]  ;;  %v6306_v11 = vld [vmem:[#allocation35_spill] sm:$0xff] }
 0x1db   :  { %v6307_v56 = vld [vmem:[#allocation37_spill] sm:$0xff] }
 0x1dd   :  { %1485 = vmatpush.bf16.msrb.mxu0 %v4866_v16  ;;  %1498 = vmatpush.bf16.msra.mxu1 %v4868_v15 }
 0x1de   :  { %1511 = vmatpush.bf16.msrb.mxu2 %v4872_v2  ;;  %1524 = vmatpush.bf16.msrb.mxu3 %v4874_v4  ;;  %v4017_v35 = vpop.eup %4016 }
 0x1df   :  { %v1301_v62 = vmul.f32 %v4017_v35, %v1294_v0  ;;  %v6308_v35 = vld [vmem:[#allocation36_spill] sm:$0xff]  ;;  %v6309_v0 = vld [vmem:[#allocation41_spill] sm:$0xff] }
 0x1e1   :  { %1486 = vmatpush.bf16.msrb.mxu0 %v4878_v45  ;;  %1499 = vmatpush.bf16.msra.mxu1 %v4880_v18  ;;  %v1478_v26 = vpack.c.bf16 %v1301_v62, %v1301_v62  ;;  %v6310_v62 = vld [vmem:[#allocation73_spill] sm:$0xff] }
 0x1e2   :  { %1512 = vmatpush.bf16.msrb.mxu2 %v4884_v9  ;;  %1525 = vmatpush.bf16.msrb.mxu3 %v4886_v6 }
 0x1e4   :  { %1487 = vmatmul.bf16.vlgmr.msrb.gmra.mxu0 %v1478_v26  ;;  %1500 = vmatmul.bf16.vlgmr.msra.gmra.mxu1 %v1478_v26 }
 0x1e5   :  { %1603 = vmatpush.bf16.msra.mxu0 %v4385_v14  ;;  %1616 = vmatpush.bf16.msrb.mxu1 %v4396_v22 }
 0x1e6   :  { %1513 = vmatmul.bf16.vlgmr.msrb.gmra.mxu2 %v1478_v26  ;;  %1526 = vmatmul.bf16.vlgmr.msrb.gmra.mxu3 %v1478_v26  ;;  %v6311_v26 = vld [vmem:[#allocation74_spill] sm:$0xff] }
 0x1e7   :  { %1629 = vmatpush.bf16.msra.mxu2 %v4398_v23  ;;  %1642 = vmatpush.bf16.msra.mxu3 %v4403_v29 }
 0x1e9   :  { %1604 = vmatpush.bf16.msra.mxu0 %v4401_v25  ;;  %1617 = vmatpush.bf16.msrb.mxu1 %v4415_v32 }
 0x1eb   :  { %1630 = vmatpush.bf16.msra.mxu2 %v4417_v33  ;;  %1643 = vmatpush.bf16.msra.mxu3 %v4423_v43 }
 0x1ed   :  { %1605 = vmatpush.bf16.msra.mxu0 %v4420_v37  ;;  %1618 = vmatpush.bf16.msrb.mxu1 %v4427_v46 }
 0x1ef   :  { %1631 = vmatpush.bf16.msra.mxu2 %v4429_v48  ;;  %1644 = vmatpush.bf16.msra.mxu3 %v4435_v52 }
 0x1f1   :  { %1606 = vmatpush.bf16.msra.mxu0 %v4432_v50  ;;  %1619 = vmatpush.bf16.msrb.mxu1 %v4439_v58 }
 0x1f3   :  { %1632 = vmatpush.bf16.msra.mxu2 %v4441_v59  ;;  %1645 = vmatpush.bf16.msra.mxu3 %v4447_v61 }
 0x1f5   :  { %1607 = vmatpush.bf16.msra.mxu0 %v4444_v60  ;;  %1620 = vmatpush.bf16.msrb.mxu1 %v4472_v17  ;;  %v6346_v17 = vld [vmem:[#allocation51_spill] sm:$0xff] }
 0x1f7   :  { %1633 = vmatpush.bf16.msra.mxu2 %v4464_v8  ;;  %1646 = vmatpush.bf16.msra.mxu3 %v6299_v24  ;;  %v6345_v24 = vld [vmem:[#allocation59_spill] sm:$0xff] }
 0x1f9   :  { %1608 = vmatpush.bf16.msra.mxu0 %v6300_v28  ;;  %1621 = vmatpush.bf16.msrb.mxu1 %v6301_v38  ;;  %v6312_v38 = vld [vmem:[#allocation38_spill] sm:$0xff]  ;;  %v6344_v28 = vld [vmem:[#allocation48_spill] sm:$0xff] }
 0x1fb   :  { %1634 = vmatpush.bf16.msra.mxu2 %v6302_v31  ;;  %1647 = vmatpush.bf16.msra.mxu3 %v6303_v42  ;;  %v6313_v31 = vld [vmem:[#allocation39_spill] sm:$0xff] }
 0x1fc   :  { %v6314_v42 = vld [vmem:[#allocation75_spill] sm:$0xff] }
 0x1fd   :  { %1609 = vmatpush.bf16.msra.mxu0 %v6304_v13  ;;  %1622 = vmatpush.bf16.msrb.mxu1 %v6305_v20  ;;  %v6315_v13 = vld [vmem:[#allocation76_spill] sm:$0xff]  ;;  %v6316_v20 = vld [vmem:[#allocation77_spill] sm:$0xff] }
 0x1ff   :  { %1635 = vmatpush.bf16.msra.mxu2 %v6306_v11  ;;  %1648 = vmatpush.bf16.msra.mxu3 %v6307_v56  ;;  %v6317_v11 = vld [vmem:[#allocation78_spill] sm:$0xff]  ;;  %v6318_v56 = vld [vmem:[#allocation79_spill] sm:$0xff] }
 0x201   :  { %1610 = vmatpush.bf16.msra.mxu0 %v6308_v35  ;;  %1623 = vmatpush.bf16.msrb.mxu1 %v6309_v0  ;;  %v6319_v35 = vld [vmem:[#allocation80_spill] sm:$0xff]  ;;  %v6320_v0 = vld [vmem:[#allocation82_spill] sm:$0xff] }
 0x203   :  { %1636 = vmatpush.bf16.msra.mxu2 %v6312_v38  ;;  %1649 = vmatpush.bf16.msra.mxu3 %v6313_v31  ;;  %v6323_v38 = vld [vmem:[#allocation85_spill] sm:$0xff]  ;;  %v6324_v31 = vld [vmem:[#allocation86_spill] sm:$0xff] }
 0x205   :  { %1722 = vmatpush.bf16.msrb.mxu0 %v6310_v62  ;;  %1735 = vmatpush.bf16.msra.mxu1 %v6311_v26  ;;  %v6321_v62 = vld [vmem:[#allocation83_spill] sm:$0xff]  ;;  %v6322_v26 = vld [vmem:[#allocation84_spill] sm:$0xff] }
 0x207   :  { %1748 = vmatpush.bf16.msrb.mxu2 %v6314_v42  ;;  %1761 = vmatpush.bf16.msrb.mxu3 %v6315_v13  ;;  %v6325_v42 = vld [vmem:[#allocation87_spill] sm:$0xff]  ;;  %v6326_v13 = vld [vmem:[#allocation88_spill] sm:$0xff] }
 0x209   :  { %1723 = vmatpush.bf16.msrb.mxu0 %v6316_v20  ;;  %1736 = vmatpush.bf16.msra.mxu1 %v6317_v11  ;;  %v6327_v20 = vld [vmem:[#allocation89_spill] sm:$0xff]  ;;  %v6328_v11 = vld [vmem:[#allocation90_spill] sm:$0xff] }
 0x20b   :  { %1749 = vmatpush.bf16.msrb.mxu2 %v6318_v56  ;;  %1762 = vmatpush.bf16.msrb.mxu3 %v6319_v35  ;;  %v6329_v56 = vld [vmem:[#allocation91_spill] sm:$0xff]  ;;  %v6330_v35 = vld [vmem:[#allocation92_spill] sm:$0xff] }
 0x20d   :  { %1724 = vmatpush.bf16.msrb.mxu0 %v6320_v0  ;;  %1737 = vmatpush.bf16.msra.mxu1 %v6321_v62  ;;  %v6331_v0 = vld [vmem:[#allocation93_spill] sm:$0xff]  ;;  %v6332_v62 = vld [vmem:[#allocation94_spill] sm:$0xff] }
 0x20f   :  { %1750 = vmatpush.bf16.msrb.mxu2 %v6322_v26  ;;  %1763 = vmatpush.bf16.msrb.mxu3 %v6323_v38  ;;  %v6333_v26 = vld [vmem:[#allocation95_spill] sm:$0xff]  ;;  %v6334_v38 = vld [vmem:[#allocation96_spill] sm:$0xff] }
 0x211   :  { %1725 = vmatpush.bf16.msrb.mxu0 %v6324_v31  ;;  %1738 = vmatpush.bf16.msra.mxu1 %v6325_v42  ;;  %v6335_v31 = vld [vmem:[#allocation97_spill] sm:$0xff]  ;;  %v6336_v42 = vld [vmem:[#allocation98_spill] sm:$0xff] }
 0x213   :  { %1751 = vmatpush.bf16.msrb.mxu2 %v6326_v13  ;;  %1764 = vmatpush.bf16.msrb.mxu3 %v6327_v20  ;;  %v6337_v13 = vld [vmem:[#allocation99_spill] sm:$0xff]  ;;  %v6338_v20 = vld [vmem:[#allocation100_spill] sm:$0xff] }
 0x215   :  { %1726 = vmatpush.bf16.msrb.mxu0 %v6328_v11  ;;  %1739 = vmatpush.bf16.msra.mxu1 %v6329_v56  ;;  %v6339_v11 = vld [vmem:[#allocation101_spill] sm:$0xff]  ;;  %v6340_v56 = vld [vmem:[#allocation102_spill] sm:$0xff] }
 0x217   :  { %1752 = vmatpush.bf16.msrb.mxu2 %v6330_v35  ;;  %1765 = vmatpush.bf16.msrb.mxu3 %v6331_v0  ;;  %v6341_v35 = vld [vmem:[#allocation103_spill] sm:$0xff]  ;;  %v6342_v0 = vld [vmem:[#allocation104_spill] sm:$0xff] }
 0x219   :  { %1727 = vmatpush.bf16.msrb.mxu0 %v6332_v62  ;;  %1740 = vmatpush.bf16.msra.mxu1 %v6333_v26  ;;  %v6343_v62 = vld [vmem:[#allocation105_spill] sm:$0xff] }
 0x21b   :  { %1753 = vmatpush.bf16.msrb.mxu2 %v6334_v38  ;;  %1766 = vmatpush.bf16.msrb.mxu3 %v6335_v31 }
 0x21d   :  { %1728 = vmatpush.bf16.msrb.mxu0 %v6336_v42  ;;  %1741 = vmatpush.bf16.msra.mxu1 %v6337_v13 }
 0x21f   :  { %1754 = vmatpush.bf16.msrb.mxu2 %v6338_v20  ;;  %1767 = vmatpush.bf16.msrb.mxu3 %v6339_v11 }
 0x221   :  { %1729 = vmatpush.bf16.msrb.mxu0 %v6340_v56  ;;  %1742 = vmatpush.bf16.msra.mxu1 %v6341_v35 }
 0x223   :  { %1755 = vmatpush.bf16.msrb.mxu2 %v6342_v0  ;;  %1768 = vmatpush.bf16.msrb.mxu3 %v6343_v62 }
 0x240   :  { %v1316_v26 = vpop.f32.mrf.mxu0  ;;  %v1329_v38 = vpop.f32.mrf.mxu1 }
 0x241   :  { %v1359_v31 = vadd.f32 %v1316_v26, %v6344_v28  ;;  %v1360_v42 = vadd.f32 %v1329_v38, %v6345_v24  ;;  %v6347_v26 = vld [vmem:[#allocation52_spill] sm:$0xff] }
 0x243   :  { %v3781_v8 = vmul.f32 -1.442695, %v1359_v31  ;;  %v3782_v13 = vmul.f32 -1.442695, %v1360_v42 }
 0x245   :  { %4018 = vpow2.f32 %v3781_v8 }
 0x246   :  { %4020 = vpow2.f32 %v3782_v13 }
 0x247   :  { %v1342_v20 = vpop.f32.mrf.mxu2  ;;  %v1355_v11 = vpop.f32.mrf.mxu3 }
 0x248   :  { %v1361_v56 = vadd.f32 %v1342_v20, %v6346_v17  ;;  %v1318_v60 = vpop.f32.mrf.mxu0  ;;  %v1331_v35 = vpop.f32.mrf.mxu1  ;;  %v1362_v17 = vadd.f32 %v1355_v11, %v6347_v26 }
 0x24a   :  { %v3783_v61 = vmul.f32 -1.442695, %v1361_v56 }
 0x24b   :  { %v4019_v0 = vpop.eup %4018 }
 0x24c   :  { %v4021_v59 = vpop.eup %4020  ;;  %v1372_v62 = vadd.f32 1.0, %v4019_v0  ;;  %4022 = vpow2.f32 %v3783_v61 }
 0x24d   :  { %v1373_v58 = vadd.f32 1.0, %v4021_v59 }
 0x24e   :  { %4024 = vrcp.f32 %v1372_v62  ;;  %v1384_v48 = vand.u32 2147483647, %v1372_v62  ;;  %vm1380_vm10 = vweird.f32 %v1372_v62 }
 0x24f   :  { %4026 = vrcp.f32 %v1373_v58  ;;  %v1344_v28 = vpop.f32.mrf.mxu2  ;;  %v1357_v24 = vpop.f32.mrf.mxu3  ;;  %v1401_v52 = vand.u32 2147483648, %v1373_v58  ;;  %v1399_v11 = vand.u32 2147483647, %v1373_v58  ;;  %vm1395_vm11 = vweird.f32 %v1373_v58 }
 0x250   :  { %v1435_v38 = vpop.f32.mrf.mxu0  ;;  %v1448_v31 = vpop.f32.mrf.mxu1  ;;  %v1386_v28 = vand.u32 2147483648, %v1372_v62  ;;  %vm1385_vm14 = vcmp.eq.f32.partialorder %v1384_v48, 8.507059e+37 }
 0x251   :  { %vm1400_vm15 = vcmp.eq.f32.partialorder %v1399_v11, 8.507059e+37  ;;  %v1436_v23 = vadd.f32 %v1435_v38, %v4979_v53 }
 0x252   :  { %v4023_v8 = vpop.eup %4022  ;;  %v1387_v43 = vor.u32 1.1754944e-38, %v1386_v28 }
 0x253   :  { %v5130_v42 = vadd.f32 1.0, %v4023_v8 }
 0x254   :  { %v4025_v13 = vpop.eup %4024 }
 0x255   :  { %v4027_v60 = vpop.eup %4026  ;;  %v1376_v20 = vmul.f32 %v4025_v13, %v1372_v62  ;;  %4028 = vrcp.f32 %v5130_v42  ;;  %vm1381_vm8 = vweird.f32 %v4025_v13  ;;  %vm1410_vm2 = vweird.f32 %v5130_v42 }
 0x256   :  { %v1391_v56 = vmul.f32 %v4027_v60, %v1373_v58  ;;  %4030 = vtanh.f32 %v1362_v17  ;;  %vm1396_vm9 = vweird.f32 %v4027_v60  ;;  %vm1382_vm12 = vmor %vm1380_vm10, %vm1381_vm8  ;;  %v1402_v17 = vor.u32 1.1754944e-38, %v1401_v52 }
 0x257   :  { %v1377_v35 = vsub.f32 1.0, %v1376_v20  ;;  %v1461_v61 = vpop.f32.mrf.mxu2  ;;  %v5134_v59 = vpop.f32.mrf.mxu3  ;;  %vm1397_vm13 = vmor %vm1395_vm11, %vm1396_vm9 }
 0x258   :  { %v1392_v0 = vsub.f32 1.0, %v1391_v56  ;;  %v1437_v24 = vpop.f32.mrf.mxu0  ;;  %v1450_v50 = vpop.f32.mrf.mxu1 }
 0x259   :  { %v1378_v8 = vmul.f32 %v4025_v13, %v1377_v35 }
 0x25a   :  { %v1393_v46 = vmul.f32 %v4027_v60, %v1392_v0 }
 0x25b   :  { %v4029_v26 = vpop.eup %4028  ;;  %v1379_v37 = vadd.f32 %v4025_v13, %v1378_v8 }
 0x25c   :  { %v1406_v20 = vmul.f32 %v4029_v26, %v5130_v42  ;;  %v1394_v56 = vadd.f32 %v4027_v60, %v1393_v46  ;;  %v4031_v50 = vpop.eup %4030  ;;  %v1449_v46 = vadd.f32 %v1448_v31, %v4982_v49  ;;  %vm1411_vm0 = vweird.f32 %v4029_v26 }
 0x25d   :  { %v1383_v24 = vsel %vm1382_vm12, %v4025_v13, %v1379_v37  ;;  %vm1412_vm3 = vmor %vm1410_vm2, %vm1411_vm0 }
 0x25e   :  { %v1407_v35 = vsub.f32 1.0, %v1406_v20  ;;  %v1388_v33 = vsel %vm1385_vm14, %v1387_v43, %v1383_v24  ;;  %v1398_v32 = vsel %vm1397_vm13, %v4027_v60, %v1394_v56 }
 0x25f   :  { %v1403_v0 = vsel %vm1400_vm15, %v1402_v17, %v1398_v32  ;;  %v1422_v25 = vmul.f32 %v4031_v50, %v1388_v33  ;;  %v1463_v29 = vpop.f32.mrf.mxu2  ;;  %v1476_v8 = vpop.f32.mrf.mxu3  ;;  %v1416_v32 = vand.u32 2147483648, %v5130_v42 }
 0x260   :  { %v1408_v62 = vmul.f32 %v4029_v26, %v1407_v35  ;;  %v1421_v58 = vmul.f32 %v1403_v0, %v4988_v63  ;;  %v1414_v63 = vand.u32 2147483647, %v5130_v42 }
 0x261   :  { %v1488_v28 = vpop.f32.mrf.mxu0  ;;  %v1501_v52 = vpop.f32.mrf.mxu1 }
 0x262   :  { %v5140_v37 = vadd.f32 %v1422_v25, %v1421_v58  ;;  %v1531_v48 = vadd.f32 %v1488_v28, %v1436_v23  ;;  %v1532_v13 = vadd.f32 %v1501_v52, %v1449_v46  ;;  %v1409_v43 = vadd.f32 %v4029_v26, %v1408_v62 }
 0x263   :  { %v1462_v25 = vadd.f32 %v1461_v61, %v4991_v39  ;;  %v1417_v23 = vor.u32 1.1754944e-38, %v1416_v32  ;;  %vm1415_vm4 = vcmp.eq.f32.partialorder %v1414_v63, 8.507059e+37  ;;  %v1475_v28 = vadd.f32 %v5134_v59, %v5003_v27 }
 0x264   :  { %4032 = vtanh.f32 %v5140_v37  ;;  %v3784_v29 = vmul.f32 -1.442695, %v1531_v48  ;;  %v3785_v33 = vmul.f32 -1.442695, %v1532_v13  ;;  %v1413_v38 = vsel %vm1412_vm3, %v4029_v26, %v1409_v43 }
 0x265   :  { %v1418_v24 = vsel %vm1415_vm4, %v1417_v23, %v1413_v38  ;;  %v6350_v23 = vld [vmem:[#allocation115_spill] sm:$0xff] }
 0x266   :  { %4034 = vpow2.f32 %v3784_v29  ;;  %v6348_v29 = vld [vmem:[#allocation113_spill] sm:$0xff] }
 0x267   :  { %4036 = vpow2.f32 %v3785_v33  ;;  %v6349_v33 = vld [vmem:[#allocation114_spill] sm:$0xff] }
 0x269   :  { %v1514_v31 = vpop.f32.mrf.mxu2  ;;  %v1527_v60 = vpop.f32.mrf.mxu3 }
 0x26a   :  { %v1533_v11 = vadd.f32 %v1514_v31, %v1462_v25  ;;  %v1490_v20 = vpop.f32.mrf.mxu0  ;;  %v1503_v56 = vpop.f32.mrf.mxu1  ;;  %v1534_v13 = vadd.f32 %v1527_v60, %v1475_v28  ;;  %v6351_v31 = vld [vmem:[#allocation116_spill] sm:$0xff] }
 0x26b   :  { %v4033_v17 = vpop.eup %4032  ;;  %v6352_v56 = vld [vmem:[#allocation117_spill] sm:$0xff] }
 0x26c   :  { %v1425_v50 = vmul.f32 %v4033_v17, %v1418_v24  ;;  %v3786_v35 = vmul.f32 -1.442695, %v1533_v11  ;;  %v4035_v0 = vpop.eup %4034  ;;  %v6353_v17 = vld [vmem:[#allocation118_spill] sm:$0xff] }
 0x26d   :  { %v4037_v8 = vpop.eup %4036  ;;  %v1544_v62 = vadd.f32 1.0, %v4035_v0 }
 0x26e   :  { %v5147_v42 = vpack.c.bf16 %v1425_v50, %v1425_v50  ;;  %4038 = vpow2.f32 %v3786_v35  ;;  %v1545_v26 = vadd.f32 1.0, %v4037_v8 }
 0x26f   :  { %4040 = vrcp.f32 %v1544_v62  ;;  %v1558_v59 = vand.u32 2147483648, %v1544_v62  ;;  %v1556_v20 = vand.u32 2147483647, %v1544_v62  ;;  %vm1552_vm7 = vweird.f32 %v1544_v62 }
 0x270   :  { %1611 = vmatmul.bf16.vlgmr.msra.gmra.mxu0 %v5147_v42  ;;  %1624 = vmatmul.bf16.vlgmr.msrb.gmra.mxu1 %v5147_v42  ;;  %4042 = vrcp.f32 %v1545_v26  ;;  %v1573_v60 = vand.u32 2147483648, %v1545_v26  ;;  %v1571_v50 = vand.u32 2147483647, %v1545_v26  ;;  %vm1567_vm8 = vweird.f32 %v1545_v26 }
 0x271   :  { %v1516_v61 = vpop.f32.mrf.mxu2  ;;  %v1529_v58 = vpop.f32.mrf.mxu3  ;;  %1637 = vmatmul.bf16.vlgmr.msra.gmra.mxu2 %v5147_v42  ;;  %1650 = vmatmul.bf16.vlgmr.msra.gmra.mxu3 %v5147_v42  ;;  %vm1557_vm11 = vcmp.eq.f32.partialorder %v1556_v20, 8.507059e+37 }
 0x272   :  { %1775 = vmatpush.bf16.msra.mxu0 %v6278_v10  ;;  %1788 = vmatpush.bf16.msrb.mxu1 %v6279_v41  ;;  %v1559_v61 = vor.u32 1.1754944e-38, %v1558_v59  ;;  %vm1572_vm12 = vcmp.eq.f32.partialorder %v1571_v50, 8.507059e+37 }
 0x273   :  { %1801 = vmatpush.bf16.msra.mxu2 %v6280_v51  ;;  %1814 = vmatpush.bf16.msra.mxu3 %v6281_v54 }
 0x274   :  { %v4039_v46 = vpop.eup %4038 }
 0x275   :  { %v5159_v52 = vadd.f32 1.0, %v4039_v46  ;;  %v4041_v48 = vpop.eup %4040  ;;  %v1574_v46 = vor.u32 1.1754944e-38, %v1573_v60 }
 0x276   :  { %1776 = vmatpush.bf16.msra.mxu0 %v6282_v1  ;;  %1789 = vmatpush.bf16.msrb.mxu1 %v6283_v12  ;;  %v4043_v43 = vpop.eup %4042  ;;  %v1548_v32 = vmul.f32 %v4041_v48, %v1544_v62  ;;  %vm1553_vm5 = vweird.f32 %v4041_v48 }
 0x277   :  { %4044 = vrcp.f32 %v5159_v52  ;;  %1802 = vmatpush.bf16.msra.mxu2 %v6348_v29  ;;  %1815 = vmatpush.bf16.msra.mxu3 %v6349_v33  ;;  %v1563_v63 = vmul.f32 %v4043_v43, %v1545_v26  ;;  %vm1568_vm6 = vweird.f32 %v4043_v43  ;;  %vm1554_vm9 = vmor %vm1552_vm7, %vm1553_vm5  ;;  %v1588_v60 = vand.u32 2147483648, %v5159_v52 }
 0x278   :  { %v1549_v38 = vsub.f32 1.0, %v1548_v32  ;;  %4046 = vtanh.f32 %v1534_v13  ;;  %vm1569_vm10 = vmor %vm1567_vm8, %vm1568_vm6  ;;  %vm1582_vm14 = vweird.f32 %v5159_v52 }
 0x279   :  { %v1564_v25 = vsub.f32 1.0, %v1563_v63 }
 0x27a   :  { %1777 = vmatpush.bf16.msra.mxu0 %v6350_v23  ;;  %1790 = vmatpush.bf16.msrb.mxu1 %v6351_v31  ;;  %v1550_v11 = vmul.f32 %v4041_v48, %v1549_v38 }
 0x27b   :  { %1803 = vmatpush.bf16.msra.mxu2 %v6352_v56  ;;  %1816 = vmatpush.bf16.msra.mxu3 %v6353_v17  ;;  %v1565_v24 = vmul.f32 %v4043_v43, %v1564_v25 }
 0x27c   :  { %v1551_v0 = vadd.f32 %v4041_v48, %v1550_v11  ;;  %v1589_v11 = vor.u32 1.1754944e-38, %v1588_v60  ;;  %v6370_v60 = vld [vmem:[#allocation28_spill] sm:$0xff] }
 0x27d   :  { %v4045_v35 = vpop.eup %4044  ;;  %v1566_v58 = vadd.f32 %v4043_v43, %v1565_v24 }
 0x27e   :  { %v1578_v8 = vmul.f32 %v4045_v35, %v5159_v52  ;;  %1778 = vmatpush.bf16.msra.mxu0 %v6289_v55  ;;  %1791 = vmatpush.bf16.msrb.mxu1 %v6290_v47  ;;  %v1555_v28 = vsel %vm1554_vm9, %v4041_v48, %v1551_v0  ;;  %v4047_v13 = vpop.eup %4046  ;;  %vm1583_vm13 = vweird.f32 %v4045_v35  ;;  %v6355_v0 = vld [vmem:[#allocation14_spill] sm:$0xff] }
 0x27f   :  { %1804 = vmatpush.bf16.msra.mxu2 %v6291_v36  ;;  %1817 = vmatpush.bf16.msra.mxu3 %v6292_v57  ;;  %v1560_v26 = vsel %vm1557_vm11, %v1559_v61, %v1555_v28  ;;  %v1570_v32 = vsel %vm1569_vm10, %v4043_v43, %v1566_v58  ;;  %vm1584_vm15 = vmor %vm1582_vm14, %vm1583_vm13  ;;  %v6357_v61 = vld [vmem:[#allocation15_spill] sm:$0xff]  ;;  %v6358_v58 = vld [vmem:[#allocation16_spill] sm:$0xff] }
 0x280   :  { %v1579_v62 = vsub.f32 1.0, %v1578_v8  ;;  %1730 = vmatmul.bf16.vlgmr.msrb.gmra.mxu0 %v5147_v42  ;;  %1743 = vmatmul.bf16.vlgmr.msra.gmra.mxu1 %v5147_v42  ;;  %v1575_v63 = vsel %vm1572_vm12, %v1574_v46, %v1570_v32  ;;  %v1594_v38 = vmul.f32 %v4047_v13, %v1560_v26  ;;  %v6356_v8 = vld [vmem:[#allocation13_spill] sm:$0xff]  ;;  %v6359_v46 = vld [vmem:[#allocation18_spill] sm:$0xff]  ;;  %v6361_v13 = vld [vmem:[#allocation19_spill] sm:$0xff] }
 0x281   :  { %1756 = vmatmul.bf16.vlgmr.msrb.gmra.mxu2 %v5147_v42  ;;  %1769 = vmatmul.bf16.vlgmr.msrb.gmra.mxu3 %v5147_v42  ;;  %v1593_v25 = vmul.f32 %v1575_v63, %v5045_v3  ;;  %v1586_v3 = vand.u32 2147483647, %v5159_v52  ;;  %v6360_v28 = vld [vmem:[#allocation17_spill] sm:$0xff]  ;;  %v6363_v26 = vld [vmem:[#allocation22_spill] sm:$0xff]  ;;  %v6365_v63 = vld [vmem:[#allocation23_spill] sm:$0xff] }
 0x282   :  { %v1580_v48 = vmul.f32 %v4045_v35, %v1579_v62  ;;  %1779 = vmatpush.bf16.msra.mxu0 %v6293_v5  ;;  %1792 = vmatpush.bf16.msrb.mxu1 %v6294_v30  ;;  %v6362_v62 = vld [vmem:[#allocation20_spill] sm:$0xff]  ;;  %v6364_v32 = vld [vmem:[#allocation21_spill] sm:$0xff] }
 0x283   :  { %1805 = vmatpush.bf16.msra.mxu2 %v6295_v40  ;;  %1818 = vmatpush.bf16.msra.mxu3 %v6296_v21  ;;  %v5184_v43 = vadd.f32 %v1594_v38, %v1593_v25  ;;  %vm1587_vm0 = vcmp.eq.f32.partialorder %v1586_v3, 8.507059e+37  ;;  %v6366_v38 = vld [vmem:[#allocation24_spill] sm:$0xff]  ;;  %v6368_v25 = vld [vmem:[#allocation25_spill] sm:$0xff] }
 0x284   :  { %v1581_v59 = vadd.f32 %v4045_v35, %v1580_v48  ;;  %v6367_v48 = vld [vmem:[#allocation26_spill] sm:$0xff]  ;;  %v6371_v3 = vld [vmem:[#allocation29_spill] sm:$0xff] }
 0x285   :  { %4048 = vtanh.f32 %v5184_v43 }
 0x286   :  { %1780 = vmatpush.bf16.msra.mxu0 %v6297_v7  ;;  %1793 = vmatpush.bf16.msrb.mxu1 %v6298_v34  ;;  %v1585_v42 = vsel %vm1584_vm15, %v4045_v35, %v1581_v59  ;;  %v6354_v35 = vld [vmem:[#allocation12_spill] sm:$0xff]  ;;  %v6369_v59 = vld [vmem:[#allocation30_spill] sm:$0xff] }
 0x287   :  { %1806 = vmatpush.bf16.msra.mxu2 %v4860_v19  ;;  %1819 = vmatpush.bf16.msra.mxu3 %v4862_v44  ;;  %v1590_v24 = vsel %vm1587_vm0, %v1589_v11, %v1585_v42  ;;  %v6372_v42 = vld [vmem:[#allocation27_spill] sm:$0xff]  ;;  %v6373_v11 = vld [vmem:[#allocation34_spill] sm:$0xff] }
 0x28a   :  { %1781 = vmatpush.bf16.msra.mxu0 %v4866_v16  ;;  %1794 = vmatpush.bf16.msrb.mxu1 %v4868_v15 }
 0x28b   :  { %1807 = vmatpush.bf16.msra.mxu2 %v4872_v2  ;;  %1820 = vmatpush.bf16.msra.mxu3 %v4874_v4  ;;  %v4049_v20 = vpop.eup %4048 }
 0x28c   :  { %v1597_v50 = vmul.f32 %v4049_v20, %v1590_v24  ;;  %v6374_v20 = vld [vmem:[#allocation32_spill] sm:$0xff]  ;;  %v6375_v24 = vld [vmem:[#allocation33_spill] sm:$0xff] }
 0x28e   :  { %1782 = vmatpush.bf16.msra.mxu0 %v4878_v45  ;;  %1795 = vmatpush.bf16.msrb.mxu1 %v4880_v18  ;;  %v1774_v52 = vpack.c.bf16 %v1597_v50, %v1597_v50  ;;  %v6376_v50 = vld [vmem:[#allocation31_spill] sm:$0xff] }
 0x28f   :  { %1808 = vmatpush.bf16.msra.mxu2 %v4884_v9  ;;  %1821 = vmatpush.bf16.msra.mxu3 %v4886_v6 }
 0x291   :  { %1783 = vmatmul.bf16.vlgmr.msra.gmra.mxu0 %v1774_v52  ;;  %1796 = vmatmul.bf16.vlgmr.msrb.gmra.mxu1 %v1774_v52 }
 0x292   :  { %1899 = vmatpush.bf16.msrb.mxu0 %v4385_v14  ;;  %1912 = vmatpush.bf16.msra.mxu1 %v4396_v22 }
 0x293   :  { %1809 = vmatmul.bf16.vlgmr.msra.gmra.mxu2 %v1774_v52  ;;  %1822 = vmatmul.bf16.vlgmr.msra.gmra.mxu3 %v1774_v52  ;;  %v6377_v52 = vld [vmem:[#allocation40_spill] sm:$0xff] }
 0x294   :  { %1925 = vmatpush.bf16.msrb.mxu2 %v6354_v35  ;;  %1938 = vmatpush.bf16.msrb.mxu3 %v6355_v0 }
 0x296   :  { %1900 = vmatpush.bf16.msrb.mxu0 %v6356_v8  ;;  %1913 = vmatpush.bf16.msra.mxu1 %v6357_v61 }
 0x298   :  { %1926 = vmatpush.bf16.msrb.mxu2 %v6358_v58  ;;  %1939 = vmatpush.bf16.msrb.mxu3 %v6359_v46 }
 0x29a   :  { %1901 = vmatpush.bf16.msrb.mxu0 %v6360_v28  ;;  %1914 = vmatpush.bf16.msra.mxu1 %v6361_v13  ;;  %v6421_v13 = vld [vmem:[#allocation56_spill] sm:$0xff] }
 0x29c   :  { %1927 = vmatpush.bf16.msrb.mxu2 %v6362_v62  ;;  %1940 = vmatpush.bf16.msrb.mxu3 %v6363_v26 }
 0x29e   :  { %1902 = vmatpush.bf16.msrb.mxu0 %v6364_v32  ;;  %1915 = vmatpush.bf16.msra.mxu1 %v6365_v63  ;;  %v6419_v63 = vld [vmem:[#allocation63_spill] sm:$0xff] }
 0x2a0   :  { %1928 = vmatpush.bf16.msrb.mxu2 %v6366_v38  ;;  %1941 = vmatpush.bf16.msrb.mxu3 %v6367_v48  ;;  %v6378_v48 = vld [vmem:[#allocation35_spill] sm:$0xff] }
 0x2a2   :  { %1903 = vmatpush.bf16.msrb.mxu0 %v6368_v25  ;;  %1916 = vmatpush.bf16.msra.mxu1 %v6369_v59  ;;  %v6379_v25 = vld [vmem:[#allocation37_spill] sm:$0xff]  ;;  %v6380_v59 = vld [vmem:[#allocation36_spill] sm:$0xff] }
 0x2a4   :  { %1929 = vmatpush.bf16.msrb.mxu2 %v6370_v60  ;;  %1942 = vmatpush.bf16.msrb.mxu3 %v6371_v3  ;;  %v6381_v60 = vld [vmem:[#allocation41_spill] sm:$0xff] }
 0x2a5   :  { %v6382_v3 = vld [vmem:[#allocation73_spill] sm:$0xff] }
 0x2a6   :  { %1904 = vmatpush.bf16.msrb.mxu0 %v6372_v42  ;;  %1917 = vmatpush.bf16.msra.mxu1 %v6373_v11  ;;  %v6383_v42 = vld [vmem:[#allocation74_spill] sm:$0xff] }
 0x2a7   :  { %v6384_v11 = vld [vmem:[#allocation38_spill] sm:$0xff] }
 0x2a8   :  { %1930 = vmatpush.bf16.msrb.mxu2 %v6374_v20  ;;  %1943 = vmatpush.bf16.msrb.mxu3 %v6375_v24  ;;  %v6385_v20 = vld [vmem:[#allocation39_spill] sm:$0xff] }
 0x2a9   :  { %v6386_v24 = vld [vmem:[#allocation75_spill] sm:$0xff] }
 0x2aa   :  { %1905 = vmatpush.bf16.msrb.mxu0 %v6376_v50  ;;  %1918 = vmatpush.bf16.msra.mxu1 %v6377_v52  ;;  %v6387_v50 = vld [vmem:[#allocation76_spill] sm:$0xff]  ;;  %v6388_v52 = vld [vmem:[#allocation77_spill] sm:$0xff] }
 0x2ac   :  { %1931 = vmatpush.bf16.msrb.mxu2 %v6378_v48  ;;  %1944 = vmatpush.bf16.msrb.mxu3 %v6379_v25  ;;  %v6389_v48 = vld [vmem:[#allocation78_spill] sm:$0xff]  ;;  %v6390_v25 = vld [vmem:[#allocation79_spill] sm:$0xff] }
 0x2ae   :  { %1906 = vmatpush.bf16.msrb.mxu0 %v6380_v59  ;;  %1919 = vmatpush.bf16.msra.mxu1 %v6381_v60  ;;  %v6391_v59 = vld [vmem:[#allocation80_spill] sm:$0xff]  ;;  %v6392_v60 = vld [vmem:[#allocation82_spill] sm:$0xff] }
 0x2b0   :  { %1932 = vmatpush.bf16.msrb.mxu2 %v6384_v11  ;;  %1945 = vmatpush.bf16.msrb.mxu3 %v6385_v20  ;;  %v6395_v11 = vld [vmem:[#allocation85_spill] sm:$0xff]  ;;  %v6396_v20 = vld [vmem:[#allocation86_spill] sm:$0xff] }
 0x2b2   :  { %2018 = vmatpush.bf16.msra.mxu0 %v6382_v3  ;;  %2031 = vmatpush.bf16.msrb.mxu1 %v6383_v42  ;;  %v6393_v3 = vld [vmem:[#allocation83_spill] sm:$0xff]  ;;  %v6394_v42 = vld [vmem:[#allocation84_spill] sm:$0xff] }
 0x2b4   :  { %2044 = vmatpush.bf16.msra.mxu2 %v6386_v24  ;;  %2057 = vmatpush.bf16.msra.mxu3 %v6387_v50  ;;  %v6397_v24 = vld [vmem:[#allocation87_spill] sm:$0xff]  ;;  %v6398_v50 = vld [vmem:[#allocation88_spill] sm:$0xff] }
 0x2b6   :  { %2019 = vmatpush.bf16.msra.mxu0 %v6388_v52  ;;  %2032 = vmatpush.bf16.msrb.mxu1 %v6389_v48  ;;  %v6399_v52 = vld [vmem:[#allocation89_spill] sm:$0xff]  ;;  %v6400_v48 = vld [vmem:[#allocation90_spill] sm:$0xff] }
 0x2b8   :  { %2045 = vmatpush.bf16.msra.mxu2 %v6390_v25  ;;  %2058 = vmatpush.bf16.msra.mxu3 %v6391_v59  ;;  %v6401_v25 = vld [vmem:[#allocation91_spill] sm:$0xff]  ;;  %v6402_v59 = vld [vmem:[#allocation92_spill] sm:$0xff] }
 0x2ba   :  { %2020 = vmatpush.bf16.msra.mxu0 %v6392_v60  ;;  %2033 = vmatpush.bf16.msrb.mxu1 %v6393_v3  ;;  %v6403_v60 = vld [vmem:[#allocation93_spill] sm:$0xff]  ;;  %v6404_v3 = vld [vmem:[#allocation94_spill] sm:$0xff] }
 0x2bc   :  { %2046 = vmatpush.bf16.msra.mxu2 %v6394_v42  ;;  %2059 = vmatpush.bf16.msra.mxu3 %v6395_v11  ;;  %v6405_v42 = vld [vmem:[#allocation95_spill] sm:$0xff]  ;;  %v6406_v11 = vld [vmem:[#allocation96_spill] sm:$0xff] }
 0x2be   :  { %2021 = vmatpush.bf16.msra.mxu0 %v6396_v20  ;;  %2034 = vmatpush.bf16.msrb.mxu1 %v6397_v24  ;;  %v6407_v20 = vld [vmem:[#allocation97_spill] sm:$0xff]  ;;  %v6408_v24 = vld [vmem:[#allocation98_spill] sm:$0xff] }
 0x2c0   :  { %2047 = vmatpush.bf16.msra.mxu2 %v6398_v50  ;;  %2060 = vmatpush.bf16.msra.mxu3 %v6399_v52  ;;  %v6409_v50 = vld [vmem:[#allocation99_spill] sm:$0xff]  ;;  %v6410_v52 = vld [vmem:[#allocation100_spill] sm:$0xff] }
 0x2c2   :  { %2022 = vmatpush.bf16.msra.mxu0 %v6400_v48  ;;  %2035 = vmatpush.bf16.msrb.mxu1 %v6401_v25  ;;  %v6411_v48 = vld [vmem:[#allocation101_spill] sm:$0xff]  ;;  %v6412_v25 = vld [vmem:[#allocation102_spill] sm:$0xff] }
 0x2c4   :  { %2048 = vmatpush.bf16.msra.mxu2 %v6402_v59  ;;  %2061 = vmatpush.bf16.msra.mxu3 %v6403_v60  ;;  %v6413_v59 = vld [vmem:[#allocation103_spill] sm:$0xff]  ;;  %v6414_v60 = vld [vmem:[#allocation104_spill] sm:$0xff] }
 0x2c6   :  { %2023 = vmatpush.bf16.msra.mxu0 %v6404_v3  ;;  %2036 = vmatpush.bf16.msrb.mxu1 %v6405_v42  ;;  %v6415_v3 = vld [vmem:[#allocation105_spill] sm:$0xff]  ;;  %v6416_v42 = vld [vmem:[#allocation42_spill] sm:$0xff] }
 0x2c8   :  { %2049 = vmatpush.bf16.msra.mxu2 %v6406_v11  ;;  %2062 = vmatpush.bf16.msra.mxu3 %v6407_v20  ;;  %v6417_v11 = vld [vmem:[#allocation53_spill] sm:$0xff]  ;;  %v6418_v20 = vld [vmem:[#allocation55_spill] sm:$0xff] }
 0x2c9   :  { %v167_v38 = vadd.f32 %v6417_v11, %v6416_v42 }
 0x2ca   :  { %2024 = vmatpush.bf16.msra.mxu0 %v6408_v24  ;;  %2037 = vmatpush.bf16.msrb.mxu1 %v6409_v50  ;;  %v196_v24 = vadd.f32 %v6419_v63, %v6418_v20 }
 0x2cc   :  { %2050 = vmatpush.bf16.msra.mxu2 %v6410_v52  ;;  %2063 = vmatpush.bf16.msra.mxu3 %v6411_v48 }
 0x2ce   :  { %2025 = vmatpush.bf16.msra.mxu0 %v6412_v25  ;;  %2038 = vmatpush.bf16.msrb.mxu1 %v6413_v59  ;;  %v6420_v25 = vld [vmem:[#allocation49_spill] sm:$0xff] }
 0x2cf   :  { %v225_v59 = vadd.f32 %v6421_v13, %v6420_v25  ;;  %v6422_v13 = vld [vmem:[#allocation50_spill] sm:$0xff] }
 0x2d0   :  { %2051 = vmatpush.bf16.msra.mxu2 %v6414_v60  ;;  %2064 = vmatpush.bf16.msra.mxu3 %v6415_v3 }
 0x2ed   :  { %v1612_v32 = vpop.f32.mrf.mxu0  ;;  %v1625_v50 = vpop.f32.mrf.mxu1 }
 0x2ee   :  { %v1655_v26 = vadd.f32 %v1612_v32, %v167_v38  ;;  %v1656_v52 = vadd.f32 %v1625_v50, %v196_v24 }
 0x2f0   :  { %v3787_v62 = vmul.f32 -1.442695, %v1655_v26  ;;  %v3788_v48 = vmul.f32 -1.442695, %v1656_v52 }
 0x2f2   :  { %4050 = vpow2.f32 %v3787_v62 }
 0x2f3   :  { %4052 = vpow2.f32 %v3788_v48  ;;  %v6423_v48 = vld [vmem:[#allocation57_spill] sm:$0xff] }
 0x2f4   :  { %v1638_v60 = vpop.f32.mrf.mxu2  ;;  %v1651_v28 = vpop.f32.mrf.mxu3  ;;  %v254_v50 = vadd.f32 %v6423_v48, %v6422_v13 }
 0x2f5   :  { %v1657_v3 = vadd.f32 %v1638_v60, %v225_v59  ;;  %v1614_v46 = vpop.f32.mrf.mxu0  ;;  %v1627_v58 = vpop.f32.mrf.mxu1 }
 0x2f6   :  { %v1658_v58 = vadd.f32 %v1651_v28, %v254_v50 }
 0x2f7   :  { %v3789_v11 = vmul.f32 -1.442695, %v1657_v3 }
 0x2f8   :  { %v4051_v42 = vpop.eup %4050 }
 0x2f9   :  { %v4053_v61 = vpop.eup %4052  ;;  %v1668_v63 = vadd.f32 1.0, %v4051_v42  ;;  %4054 = vpow2.f32 %v3789_v11 }
 0x2fa   :  { %v1669_v20 = vadd.f32 1.0, %v4053_v61 }
 0x2fb   :  { %4056 = vrcp.f32 %v1668_v63  ;;  %vm1676_vm4 = vweird.f32 %v1668_v63 }
 0x2fc   :  { %4058 = vrcp.f32 %v1669_v20  ;;  %v1640_v26 = vpop.f32.mrf.mxu2  ;;  %v1653_v32 = vpop.f32.mrf.mxu3  ;;  %v1697_v0 = vand.u32 2147483648, %v1669_v20  ;;  %v1695_v28 = vand.u32 2147483647, %v1669_v20  ;;  %vm1691_vm5 = vweird.f32 %v1669_v20 }
 0x2fd   :  { %v1731_v62 = vpop.f32.mrf.mxu0  ;;  %v1744_v38 = vpop.f32.mrf.mxu1  ;;  %v1682_v32 = vand.u32 2147483648, %v1668_v63 }
 0x2fe   :  { %vm1696_vm9 = vcmp.eq.f32.partialorder %v1695_v28, 8.507059e+37  ;;  %v1732_v45 = vadd.f32 %v1731_v62, %v4979_v53 }
 0x2ff   :  { %v4055_v24 = vpop.eup %4054  ;;  %v1683_v22 = vor.u32 1.1754944e-38, %v1682_v32 }
 0x300   :  { %v5274_v52 = vadd.f32 1.0, %v4055_v24  ;;  %v1680_v24 = vand.u32 2147483647, %v1668_v63 }
 0x301   :  { %v4057_v46 = vpop.eup %4056 }
 0x302   :  { %v4059_v59 = vpop.eup %4058  ;;  %v1672_v60 = vmul.f32 %v4057_v46, %v1668_v63  ;;  %4060 = vrcp.f32 %v5274_v52  ;;  %vm1677_vm2 = vweird.f32 %v4057_v46  ;;  %vm1681_vm8 = vcmp.eq.f32.partialorder %v1680_v24, 8.507059e+37 }
 0x303   :  { %v1687_v3 = vmul.f32 %v4059_v59, %v1669_v20  ;;  %4062 = vtanh.f32 %v1658_v58  ;;  %vm1692_vm3 = vweird.f32 %v4059_v59  ;;  %vm1678_vm6 = vmor %vm1676_vm4, %vm1677_vm2  ;;  %v1698_v58 = vor.u32 1.1754944e-38, %v1697_v0 }
 0x304   :  { %v1673_v61 = vsub.f32 1.0, %v1672_v60  ;;  %v1757_v42 = vpop.f32.mrf.mxu2  ;;  %v5277_v11 = vpop.f32.mrf.mxu3  ;;  %vm1693_vm7 = vmor %vm1691_vm5, %vm1692_vm3  ;;  %vm1706_vm11 = vweird.f32 %v5274_v52 }
 0x305   :  { %v1688_v26 = vsub.f32 1.0, %v1687_v3  ;;  %v1733_v25 = vpop.f32.mrf.mxu0  ;;  %v1746_v8 = vpop.f32.mrf.mxu1 }
 0x306   :  { %v1674_v48 = vmul.f32 %v4057_v46, %v1673_v61 }
 0x307   :  { %v1689_v13 = vmul.f32 %v4059_v59, %v1688_v26 }
 0x308   :  { %v4061_v50 = vpop.eup %4060  ;;  %v1675_v35 = vadd.f32 %v4057_v46, %v1674_v48 }
 0x309   :  { %v1702_v60 = vmul.f32 %v4061_v50, %v5274_v52  ;;  %v1690_v3 = vadd.f32 %v4059_v59, %v1689_v13  ;;  %v4063_v8 = vpop.eup %4062  ;;  %v1745_v13 = vadd.f32 %v1744_v38, %v4982_v49  ;;  %vm1707_vm10 = vweird.f32 %v4061_v50 }
 0x30a   :  { %v1679_v25 = vsel %vm1678_vm6, %v4057_v46, %v1675_v35  ;;  %vm1708_vm12 = vmor %vm1706_vm11, %vm1707_vm10 }
 0x30b   :  { %v1703_v61 = vsub.f32 1.0, %v1702_v60  ;;  %v1684_v14 = vsel %vm1681_vm8, %v1683_v22, %v1679_v25  ;;  %v1694_v6 = vsel %vm1693_vm7, %v4059_v59, %v1690_v3 }
 0x30c   :  { %v1699_v26 = vsel %vm1696_vm9, %v1698_v58, %v1694_v6  ;;  %v1718_v9 = vmul.f32 %v4063_v8, %v1684_v14  ;;  %v1759_v18 = vpop.f32.mrf.mxu2  ;;  %v1772_v48 = vpop.f32.mrf.mxu3  ;;  %v1712_v6 = vand.u32 2147483648, %v5274_v52 }
 0x30d   :  { %v1704_v63 = vmul.f32 %v4061_v50, %v1703_v61  ;;  %v1717_v20 = vmul.f32 %v1699_v26, %v5140_v37  ;;  %v1710_v37 = vand.u32 2147483647, %v5274_v52 }
 0x30e   :  { %v1784_v32 = vpop.f32.mrf.mxu0  ;;  %v1797_v0 = vpop.f32.mrf.mxu1 }
 0x30f   :  { %v5283_v35 = vadd.f32 %v1718_v9, %v1717_v20  ;;  %v1827_v46 = vadd.f32 %v1784_v32, %v1732_v45  ;;  %v1828_v24 = vadd.f32 %v1797_v0, %v1745_v13  ;;  %v1705_v22 = vadd.f32 %v4061_v50, %v1704_v63 }
 0x310   :  { %v1758_v9 = vadd.f32 %v1757_v42, %v4991_v39  ;;  %v1713_v45 = vor.u32 1.1754944e-38, %v1712_v6  ;;  %vm1711_vm13 = vcmp.eq.f32.partialorder %v1710_v37, 8.507059e+37  ;;  %v1771_v32 = vadd.f32 %v5277_v11, %v5003_v27 }
 0x311   :  { %4064 = vtanh.f32 %v5283_v35  ;;  %v3790_v14 = vmul.f32 -1.442695, %v1827_v46  ;;  %v3791_v18 = vmul.f32 -1.442695, %v1828_v24  ;;  %v1709_v62 = vsel %vm1708_vm12, %v4061_v50, %v1705_v22 }
 0x312   :  { %v1714_v25 = vsel %vm1711_vm13, %v1713_v45, %v1709_v62 }
 0x313   :  { %4066 = vpow2.f32 %v3790_v14 }
 0x314   :  { %4068 = vpow2.f32 %v3791_v18 }
 0x316   :  { %v1810_v38 = vpop.f32.mrf.mxu2  ;;  %v1823_v59 = vpop.f32.mrf.mxu3 }
 0x317   :  { %v1829_v28 = vadd.f32 %v1810_v38, %v1758_v9  ;;  %v1786_v60 = vpop.f32.mrf.mxu0  ;;  %v1799_v3 = vpop.f32.mrf.mxu1  ;;  %v1830_v24 = vadd.f32 %v1823_v59, %v1771_v32 }
 0x318   :  { %v4065_v58 = vpop.eup %4064 }
 0x319   :  { %v1721_v8 = vmul.f32 %v4065_v58, %v1714_v25  ;;  %v3792_v61 = vmul.f32 -1.442695, %v1829_v28  ;;  %v4067_v26 = vpop.eup %4066 }
 0x31a   :  { %v4069_v48 = vpop.eup %4068  ;;  %v1840_v63 = vadd.f32 1.0, %v4067_v26 }
 0x31b   :  { %v5290_v52 = vpack.c.bf16 %v1721_v8, %v1721_v8  ;;  %4070 = vpow2.f32 %v3792_v61  ;;  %v1841_v50 = vadd.f32 1.0, %v4069_v48 }
 0x31c   :  { %4072 = vrcp.f32 %v1840_v63  ;;  %v1854_v11 = vand.u32 2147483648, %v1840_v63  ;;  %v1852_v45 = vand.u32 2147483647, %v1840_v63  ;;  %vm1848_vm0 = vweird.f32 %v1840_v63 }
 0x31d   :  { %1907 = vmatmul.bf16.vlgmr.msrb.gmra.mxu0 %v5290_v52  ;;  %1920 = vmatmul.bf16.vlgmr.msra.gmra.mxu1 %v5290_v52  ;;  %4074 = vrcp.f32 %v1841_v50  ;;  %v1869_v62 = vand.u32 2147483648, %v1841_v50  ;;  %v1867_v59 = vand.u32 2147483647, %v1841_v50  ;;  %vm1863_vm2 = vweird.f32 %v1841_v50 }
 0x31e   :  { %v1812_v42 = vpop.f32.mrf.mxu2  ;;  %v1825_v20 = vpop.f32.mrf.mxu3  ;;  %1933 = vmatmul.bf16.vlgmr.msrb.gmra.mxu2 %v5290_v52  ;;  %1946 = vmatmul.bf16.vlgmr.msrb.gmra.mxu3 %v5290_v52  ;;  %v1855_v58 = vor.u32 1.1754944e-38, %v1854_v11  ;;  %vm1853_vm5 = vcmp.eq.f32.partialorder %v1852_v45, 8.507059e+37  ;;  %v6425_v11 = vld [vmem:[#allocation130_spill] sm:$0xff] }
 0x31f   :  { %2071 = vmatpush.bf16.msrb.mxu0 %v6278_v10  ;;  %2084 = vmatpush.bf16.msra.mxu1 %v6279_v41  ;;  %v1870_v8 = vor.u32 1.1754944e-38, %v1869_v62  ;;  %vm1868_vm6 = vcmp.eq.f32.partialorder %v1867_v59, 8.507059e+37  ;;  %v6426_v62 = vld [vmem:[#allocation131_spill] sm:$0xff] }
 0x320   :  { %2097 = vmatpush.bf16.msrb.mxu2 %v6280_v51  ;;  %2110 = vmatpush.bf16.msrb.mxu3 %v6281_v54  ;;  %v6429_v59 = vld [vmem:[#allocation11_spill] sm:$0xff] }
 0x321   :  { %v4071_v13 = vpop.eup %4070 }
 0x322   :  { %v5302_v0 = vadd.f32 1.0, %v4071_v13  ;;  %v4073_v46 = vpop.eup %4072 }
 0x323   :  { %2072 = vmatpush.bf16.msrb.mxu0 %v6282_v1  ;;  %2085 = vmatpush.bf16.msra.mxu1 %v6283_v12  ;;  %v4075_v22 = vpop.eup %4074  ;;  %v1844_v6 = vmul.f32 %v4073_v46, %v1840_v63  ;;  %vm1849_vm14 = vweird.f32 %v4073_v46 }
 0x324   :  { %4076 = vrcp.f32 %v5302_v0  ;;  %2098 = vmatpush.bf16.msrb.mxu2 %v6348_v29  ;;  %2111 = vmatpush.bf16.msrb.mxu3 %v6349_v33  ;;  %v1859_v14 = vmul.f32 %v4075_v22, %v1841_v50  ;;  %vm1864_vm15 = vweird.f32 %v4075_v22  ;;  %vm1850_vm3 = vmor %vm1848_vm0, %vm1849_vm14  ;;  %vm1878_vm8 = vweird.f32 %v5302_v0 }
 0x325   :  { %v1845_v18 = vsub.f32 1.0, %v1844_v6  ;;  %4078 = vtanh.f32 %v1830_v24  ;;  %vm1865_vm4 = vmor %vm1863_vm2, %vm1864_vm15 }
 0x326   :  { %v1860_v37 = vsub.f32 1.0, %v1859_v14 }
 0x327   :  { %2073 = vmatpush.bf16.msrb.mxu0 %v6350_v23  ;;  %2086 = vmatpush.bf16.msra.mxu1 %v6351_v31  ;;  %v1846_v9 = vmul.f32 %v4073_v46, %v1845_v18 }
 0x328   :  { %2099 = vmatpush.bf16.msrb.mxu2 %v6352_v56  ;;  %2112 = vmatpush.bf16.msrb.mxu3 %v6353_v17  ;;  %v1861_v38 = vmul.f32 %v4075_v22, %v1860_v37 }
 0x329   :  { %v1847_v60 = vadd.f32 %v4073_v46, %v1846_v9  ;;  %v6427_v9 = vld [vmem:[#allocation132_spill] sm:$0xff] }
 0x32a   :  { %v4077_v28 = vpop.eup %4076  ;;  %v1862_v25 = vadd.f32 %v4075_v22, %v1861_v38  ;;  %v6428_v38 = vld [vmem:[#allocation10_spill] sm:$0xff] }
 0x32b   :  { %v1874_v3 = vmul.f32 %v4077_v28, %v5302_v0  ;;  %2074 = vmatpush.bf16.msrb.mxu0 %v6289_v55  ;;  %2087 = vmatpush.bf16.msra.mxu1 %v6290_v47  ;;  %v1851_v61 = vsel %vm1850_vm3, %v4073_v46, %v1847_v60  ;;  %v4079_v26 = vpop.eup %4078  ;;  %vm1879_vm7 = vweird.f32 %v4077_v28  ;;  %v6431_v60 = vld [vmem:[#allocation14_spill] sm:$0xff] }
 0x32c   :  { %2100 = vmatpush.bf16.msrb.mxu2 %v6291_v36  ;;  %2113 = vmatpush.bf16.msrb.mxu3 %v6292_v57  ;;  %v1856_v63 = vsel %vm1853_vm5, %v1855_v58, %v1851_v61  ;;  %v1866_v50 = vsel %vm1865_vm4, %v4075_v22, %v1862_v25  ;;  %v1884_v22 = vand.u32 2147483648, %v5302_v0  ;;  %vm1880_vm9 = vmor %vm1878_vm8, %vm1879_vm7  ;;  %v6433_v58 = vld [vmem:[#allocation15_spill] sm:$0xff]  ;;  %v6434_v25 = vld [vmem:[#allocation16_spill] sm:$0xff] }
 0x32d   :  { %v1875_v48 = vsub.f32 1.0, %v1874_v3  ;;  %2026 = vmatmul.bf16.vlgmr.msra.gmra.mxu0 %v5290_v52  ;;  %2039 = vmatmul.bf16.vlgmr.msrb.gmra.mxu1 %v5290_v52  ;;  %v1871_v42 = vsel %vm1868_vm6, %v1870_v8, %v1866_v50  ;;  %v1890_v20 = vmul.f32 %v4079_v26, %v1856_v63  ;;  %v6432_v3 = vld [vmem:[#allocation13_spill] sm:$0xff]  ;;  %v6435_v8 = vld [vmem:[#allocation18_spill] sm:$0xff]  ;;  %v6437_v26 = vld [vmem:[#allocation19_spill] sm:$0xff] }
 0x32e   :  { %2052 = vmatmul.bf16.vlgmr.msra.gmra.mxu2 %v5290_v52  ;;  %2065 = vmatmul.bf16.vlgmr.msra.gmra.mxu3 %v5290_v52  ;;  %v1889_v32 = vmul.f32 %v1871_v42, %v5184_v43  ;;  %v1882_v43 = vand.u32 2147483647, %v5302_v0  ;;  %v1885_v6 = vor.u32 1.1754944e-38, %v1884_v22  ;;  %v6424_v0 = vld [vmem:[#allocation129_spill] sm:$0xff]  ;;  %v6439_v63 = vld [vmem:[#allocation22_spill] sm:$0xff]  ;;  %v6441_v42 = vld [vmem:[#allocation23_spill] sm:$0xff] }
 0x32f   :  { %v1876_v13 = vmul.f32 %v4077_v28, %v1875_v48  ;;  %2075 = vmatpush.bf16.msrb.mxu0 %v6293_v5  ;;  %2088 = vmatpush.bf16.msra.mxu1 %v6294_v30  ;;  %v6436_v61 = vld [vmem:[#allocation17_spill] sm:$0xff]  ;;  %v6438_v48 = vld [vmem:[#allocation20_spill] sm:$0xff] }
 0x330   :  { %2101 = vmatpush.bf16.msrb.mxu2 %v6295_v40  ;;  %2114 = vmatpush.bf16.msrb.mxu3 %v6296_v21  ;;  %v5327_v46 = vadd.f32 %v1890_v20, %v1889_v32  ;;  %vm1883_vm10 = vcmp.eq.f32.partialorder %v1882_v43, 8.507059e+37  ;;  %v6440_v50 = vld [vmem:[#allocation21_spill] sm:$0xff]  ;;  %v6442_v20 = vld [vmem:[#allocation24_spill] sm:$0xff] }
 0x331   :  { %v1877_v24 = vadd.f32 %v4077_v28, %v1876_v13  ;;  %v6443_v13 = vld [vmem:[#allocation26_spill] sm:$0xff]  ;;  %v6444_v32 = vld [vmem:[#allocation25_spill] sm:$0xff]  ;;  %v6446_v22 = vld [vmem:[#allocation28_spill] sm:$0xff] }
 0x332   :  { %4080 = vtanh.f32 %v5327_v46  ;;  %v6447_v43 = vld [vmem:[#allocation29_spill] sm:$0xff] }
 0x333   :  { %2076 = vmatpush.bf16.msrb.mxu0 %v6297_v7  ;;  %2089 = vmatpush.bf16.msra.mxu1 %v6298_v34  ;;  %v1881_v52 = vsel %vm1880_vm9, %v4077_v28, %v1877_v24  ;;  %v6430_v28 = vld [vmem:[#allocation12_spill] sm:$0xff]  ;;  %v6445_v24 = vld [vmem:[#allocation30_spill] sm:$0xff] }
 0x334   :  { %2102 = vmatpush.bf16.msrb.mxu2 %v4860_v19  ;;  %2115 = vmatpush.bf16.msrb.mxu3 %v4862_v44  ;;  %v1886_v18 = vsel %vm1883_vm10, %v1885_v6, %v1881_v52  ;;  %v6448_v52 = vld [vmem:[#allocation27_spill] sm:$0xff]  ;;  %v6449_v6 = vld [vmem:[#allocation34_spill] sm:$0xff] }
 0x337   :  { %2077 = vmatpush.bf16.msrb.mxu0 %v4866_v16  ;;  %2090 = vmatpush.bf16.msra.mxu1 %v4868_v15 }
 0x338   :  { %2103 = vmatpush.bf16.msrb.mxu2 %v4872_v2  ;;  %2116 = vmatpush.bf16.msrb.mxu3 %v4874_v4  ;;  %v4081_v14 = vpop.eup %4080 }
 0x339   :  { %v1893_v37 = vmul.f32 %v4081_v14, %v1886_v18  ;;  %v6450_v14 = vld [vmem:[#allocation32_spill] sm:$0xff]  ;;  %v6451_v18 = vld [vmem:[#allocation33_spill] sm:$0xff] }
 0x33b   :  { %2078 = vmatpush.bf16.msrb.mxu0 %v6424_v0  ;;  %2091 = vmatpush.bf16.msra.mxu1 %v6425_v11  ;;  %v2070_v45 = vpack.c.bf16 %v1893_v37, %v1893_v37  ;;  %v6452_v37 = vld [vmem:[#allocation31_spill] sm:$0xff] }
 0x33c   :  { %2104 = vmatpush.bf16.msrb.mxu2 %v6426_v62  ;;  %2117 = vmatpush.bf16.msrb.mxu3 %v6427_v9 }
 0x33e   :  { %2079 = vmatmul.bf16.vlgmr.msrb.gmra.mxu0 %v2070_v45  ;;  %2092 = vmatmul.bf16.vlgmr.msra.gmra.mxu1 %v2070_v45 }
 0x33f   :  { %2195 = vmatpush.bf16.msra.mxu0 %v6428_v38  ;;  %2208 = vmatpush.bf16.msrb.mxu1 %v6429_v59 }
 0x340   :  { %2105 = vmatmul.bf16.vlgmr.msrb.gmra.mxu2 %v2070_v45  ;;  %2118 = vmatmul.bf16.vlgmr.msrb.gmra.mxu3 %v2070_v45  ;;  %v6453_v45 = vld [vmem:[#allocation40_spill] sm:$0xff] }
 0x341   :  { %2221 = vmatpush.bf16.msra.mxu2 %v6430_v28  ;;  %2234 = vmatpush.bf16.msra.mxu3 %v6431_v60 }
 0x343   :  { %2196 = vmatpush.bf16.msra.mxu0 %v6432_v3  ;;  %2209 = vmatpush.bf16.msrb.mxu1 %v6433_v58 }
 0x345   :  { %2222 = vmatpush.bf16.msra.mxu2 %v6434_v25  ;;  %2235 = vmatpush.bf16.msra.mxu3 %v6435_v8 }
 0x347   :  { %2197 = vmatpush.bf16.msra.mxu0 %v6436_v61  ;;  %2210 = vmatpush.bf16.msrb.mxu1 %v6437_v26 }
 0x349   :  { %2223 = vmatpush.bf16.msra.mxu2 %v6438_v48  ;;  %2236 = vmatpush.bf16.msra.mxu3 %v6439_v63  ;;  %v6494_v63 = vld [vmem:[#allocation60_spill] sm:$0xff] }
 0x34b   :  { %2198 = vmatpush.bf16.msra.mxu0 %v6440_v50  ;;  %2211 = vmatpush.bf16.msrb.mxu1 %v6441_v42  ;;  %v6493_v42 = vld [vmem:[#allocation66_spill] sm:$0xff] }
 0x34d   :  { %2224 = vmatpush.bf16.msra.mxu2 %v6442_v20  ;;  %2237 = vmatpush.bf16.msra.mxu3 %v6443_v13  ;;  %v6454_v13 = vld [vmem:[#allocation35_spill] sm:$0xff]  ;;  %v6492_v20 = vld [vmem:[#allocation58_spill] sm:$0xff] }
 0x34f   :  { %2199 = vmatpush.bf16.msra.mxu0 %v6444_v32  ;;  %2212 = vmatpush.bf16.msrb.mxu1 %v6445_v24  ;;  %v6455_v32 = vld [vmem:[#allocation37_spill] sm:$0xff]  ;;  %v6456_v24 = vld [vmem:[#allocation36_spill] sm:$0xff] }
 0x351   :  { %2225 = vmatpush.bf16.msra.mxu2 %v6446_v22  ;;  %2238 = vmatpush.bf16.msra.mxu3 %v6447_v43  ;;  %v6457_v22 = vld [vmem:[#allocation41_spill] sm:$0xff] }
 0x352   :  { %v6458_v43 = vld [vmem:[#allocation73_spill] sm:$0xff] }
 0x353   :  { %2200 = vmatpush.bf16.msra.mxu0 %v6448_v52  ;;  %2213 = vmatpush.bf16.msrb.mxu1 %v6449_v6  ;;  %v6459_v52 = vld [vmem:[#allocation74_spill] sm:$0xff] }
 0x354   :  { %v6460_v6 = vld [vmem:[#allocation38_spill] sm:$0xff] }
 0x355   :  { %2226 = vmatpush.bf16.msra.mxu2 %v6450_v14  ;;  %2239 = vmatpush.bf16.msra.mxu3 %v6451_v18  ;;  %v6461_v14 = vld [vmem:[#allocation39_spill] sm:$0xff] }
 0x356   :  { %v6462_v18 = vld [vmem:[#allocation75_spill] sm:$0xff] }
 0x357   :  { %2201 = vmatpush.bf16.msra.mxu0 %v6452_v37  ;;  %2214 = vmatpush.bf16.msrb.mxu1 %v6453_v45  ;;  %v6463_v37 = vld [vmem:[#allocation76_spill] sm:$0xff]  ;;  %v6464_v45 = vld [vmem:[#allocation77_spill] sm:$0xff] }
 0x359   :  { %2227 = vmatpush.bf16.msra.mxu2 %v6454_v13  ;;  %2240 = vmatpush.bf16.msra.mxu3 %v6455_v32  ;;  %v6465_v13 = vld [vmem:[#allocation78_spill] sm:$0xff]  ;;  %v6466_v32 = vld [vmem:[#allocation79_spill] sm:$0xff] }
 0x35b   :  { %2202 = vmatpush.bf16.msra.mxu0 %v6456_v24  ;;  %2215 = vmatpush.bf16.msrb.mxu1 %v6457_v22  ;;  %v6467_v24 = vld [vmem:[#allocation80_spill] sm:$0xff]  ;;  %v6468_v22 = vld [vmem:[#allocation82_spill] sm:$0xff] }
 0x35d   :  { %2228 = vmatpush.bf16.msra.mxu2 %v6460_v6  ;;  %2241 = vmatpush.bf16.msra.mxu3 %v6461_v14  ;;  %v6471_v6 = vld [vmem:[#allocation85_spill] sm:$0xff]  ;;  %v6472_v14 = vld [vmem:[#allocation86_spill] sm:$0xff] }
 0x35f   :  { %2314 = vmatpush.bf16.msrb.mxu0 %v6458_v43  ;;  %2327 = vmatpush.bf16.msra.mxu1 %v6459_v52  ;;  %v6469_v43 = vld [vmem:[#allocation83_spill] sm:$0xff]  ;;  %v6470_v52 = vld [vmem:[#allocation84_spill] sm:$0xff] }
 0x361   :  { %2340 = vmatpush.bf16.msrb.mxu2 %v6462_v18  ;;  %2353 = vmatpush.bf16.msrb.mxu3 %v6463_v37  ;;  %v6473_v18 = vld [vmem:[#allocation87_spill] sm:$0xff]  ;;  %v6474_v37 = vld [vmem:[#allocation88_spill] sm:$0xff] }
 0x363   :  { %2315 = vmatpush.bf16.msrb.mxu0 %v6464_v45  ;;  %2328 = vmatpush.bf16.msra.mxu1 %v6465_v13  ;;  %v6475_v45 = vld [vmem:[#allocation89_spill] sm:$0xff]  ;;  %v6476_v13 = vld [vmem:[#allocation90_spill] sm:$0xff] }
 0x365   :  { %2341 = vmatpush.bf16.msrb.mxu2 %v6466_v32  ;;  %2354 = vmatpush.bf16.msrb.mxu3 %v6467_v24  ;;  %v6477_v32 = vld [vmem:[#allocation91_spill] sm:$0xff]  ;;  %v6478_v24 = vld [vmem:[#allocation92_spill] sm:$0xff] }
 0x367   :  { %2316 = vmatpush.bf16.msrb.mxu0 %v6468_v22  ;;  %2329 = vmatpush.bf16.msra.mxu1 %v6469_v43  ;;  %v6479_v22 = vld [vmem:[#allocation93_spill] sm:$0xff]  ;;  %v6480_v43 = vld [vmem:[#allocation94_spill] sm:$0xff] }
 0x369   :  { %2342 = vmatpush.bf16.msrb.mxu2 %v6470_v52  ;;  %2355 = vmatpush.bf16.msrb.mxu3 %v6471_v6  ;;  %v6481_v52 = vld [vmem:[#allocation95_spill] sm:$0xff]  ;;  %v6482_v6 = vld [vmem:[#allocation96_spill] sm:$0xff] }
 0x36b   :  { %2317 = vmatpush.bf16.msrb.mxu0 %v6472_v14  ;;  %2330 = vmatpush.bf16.msra.mxu1 %v6473_v18  ;;  %v6483_v14 = vld [vmem:[#allocation97_spill] sm:$0xff]  ;;  %v6484_v18 = vld [vmem:[#allocation98_spill] sm:$0xff] }
 0x36d   :  { %2343 = vmatpush.bf16.msrb.mxu2 %v6474_v37  ;;  %2356 = vmatpush.bf16.msrb.mxu3 %v6475_v45  ;;  %v6485_v37 = vld [vmem:[#allocation99_spill] sm:$0xff]  ;;  %v6486_v45 = vld [vmem:[#allocation100_spill] sm:$0xff] }
 0x36f   :  { %2318 = vmatpush.bf16.msrb.mxu0 %v6476_v13  ;;  %2331 = vmatpush.bf16.msra.mxu1 %v6477_v32  ;;  %v6487_v13 = vld [vmem:[#allocation101_spill] sm:$0xff]  ;;  %v6488_v32 = vld [vmem:[#allocation102_spill] sm:$0xff] }
 0x371   :  { %2344 = vmatpush.bf16.msrb.mxu2 %v6478_v24  ;;  %2357 = vmatpush.bf16.msrb.mxu3 %v6479_v22  ;;  %v6489_v24 = vld [vmem:[#allocation103_spill] sm:$0xff]  ;;  %v6490_v22 = vld [vmem:[#allocation104_spill] sm:$0xff] }
 0x373   :  { %2319 = vmatpush.bf16.msrb.mxu0 %v6480_v43  ;;  %2332 = vmatpush.bf16.msra.mxu1 %v6481_v52  ;;  %v6491_v43 = vld [vmem:[#allocation105_spill] sm:$0xff] }
 0x375   :  { %2345 = vmatpush.bf16.msrb.mxu2 %v6482_v6  ;;  %2358 = vmatpush.bf16.msrb.mxu3 %v6483_v14 }
 0x377   :  { %2320 = vmatpush.bf16.msrb.mxu0 %v6484_v18  ;;  %2333 = vmatpush.bf16.msra.mxu1 %v6485_v37 }
 0x379   :  { %2346 = vmatpush.bf16.msrb.mxu2 %v6486_v45  ;;  %2359 = vmatpush.bf16.msrb.mxu3 %v6487_v13 }
 0x37b   :  { %2321 = vmatpush.bf16.msrb.mxu0 %v6488_v32  ;;  %2334 = vmatpush.bf16.msra.mxu1 %v6489_v24 }
 0x37d   :  { %2347 = vmatpush.bf16.msrb.mxu2 %v6490_v22  ;;  %2360 = vmatpush.bf16.msrb.mxu3 %v6491_v43 }
 0x39a   :  { %v1908_v52 = vpop.f32.mrf.mxu0  ;;  %v1921_v6 = vpop.f32.mrf.mxu1 }
 0x39b   :  { %v1951_v14 = vadd.f32 %v1908_v52, %v6492_v20  ;;  %v1952_v18 = vadd.f32 %v1921_v6, %v6493_v42 }
 0x39d   :  { %v3793_v50 = vmul.f32 -1.442695, %v1951_v14  ;;  %v3794_v37 = vmul.f32 -1.442695, %v1952_v18 }
 0x39f   :  { %4082 = vpow2.f32 %v3793_v50 }
 0x3a0   :  { %4084 = vpow2.f32 %v3794_v37  ;;  %v6495_v37 = vld [vmem:[#allocation61_spill] sm:$0xff] }
 0x3a1   :  { %v1934_v45 = vpop.f32.mrf.mxu2  ;;  %v1947_v13 = vpop.f32.mrf.mxu3 }
 0x3a2   :  { %v1953_v32 = vadd.f32 %v1934_v45, %v6494_v63  ;;  %v1910_v48 = vpop.f32.mrf.mxu0  ;;  %v1923_v24 = vpop.f32.mrf.mxu1  ;;  %v1954_v63 = vadd.f32 %v1947_v13, %v6495_v37 }
 0x3a4   :  { %v3795_v26 = vmul.f32 -1.442695, %v1953_v32 }
 0x3a5   :  { %v4083_v22 = vpop.eup %4082 }
 0x3a6   :  { %v4085_v61 = vpop.eup %4084  ;;  %v1964_v43 = vadd.f32 1.0, %v4083_v22  ;;  %4086 = vpow2.f32 %v3795_v26 }
 0x3a7   :  { %v1965_v8 = vadd.f32 1.0, %v4085_v61 }
 0x3a8   :  { %4088 = vrcp.f32 %v1964_v43  ;;  %v1976_v3 = vand.u32 2147483647, %v1964_v43  ;;  %vm1972_vm13 = vweird.f32 %v1964_v43 }
 0x3a9   :  { %4090 = vrcp.f32 %v1965_v8  ;;  %v1936_v20 = vpop.f32.mrf.mxu2  ;;  %v1949_v42 = vpop.f32.mrf.mxu3  ;;  %v1993_v58 = vand.u32 2147483648, %v1965_v8  ;;  %v1991_v13 = vand.u32 2147483647, %v1965_v8  ;;  %vm1987_vm14 = vweird.f32 %v1965_v8 }
 0x3aa   :  { %v2027_v52 = vpop.f32.mrf.mxu0  ;;  %v2040_v6 = vpop.f32.mrf.mxu1  ;;  %v1978_v20 = vand.u32 2147483648, %v1964_v43  ;;  %vm1977_vm2 = vcmp.eq.f32.partialorder %v1976_v3, 8.507059e+37 }
 0x3ab   :  { %vm1992_vm3 = vcmp.eq.f32.partialorder %v1991_v13, 8.507059e+37  ;;  %v2028_v0 = vadd.f32 %v2027_v52, %v4979_v53 }
 0x3ac   :  { %v4087_v50 = vpop.eup %4086  ;;  %v1979_v59 = vor.u32 1.1754944e-38, %v1978_v20 }
 0x3ad   :  { %v5412_v14 = vadd.f32 1.0, %v4087_v50 }
 0x3ae   :  { %v4089_v18 = vpop.eup %4088 }
 0x3af   :  { %v4091_v48 = vpop.eup %4090  ;;  %v1968_v24 = vmul.f32 %v4089_v18, %v1964_v43  ;;  %4092 = vrcp.f32 %v5412_v14  ;;  %vm1973_vm11 = vweird.f32 %v4089_v18  ;;  %vm2002_vm5 = vweird.f32 %v5412_v14 }
 0x3b0   :  { %v1983_v32 = vmul.f32 %v4091_v48, %v1965_v8  ;;  %4094 = vtanh.f32 %v1954_v63  ;;  %vm1988_vm12 = vweird.f32 %v4091_v48  ;;  %vm1974_vm15 = vmor %vm1972_vm13, %vm1973_vm11  ;;  %v1994_v63 = vor.u32 1.1754944e-38, %v1993_v58 }
 0x3b1   :  { %v1969_v22 = vsub.f32 1.0, %v1968_v24  ;;  %v2053_v26 = vpop.f32.mrf.mxu2  ;;  %v5416_v61 = vpop.f32.mrf.mxu3  ;;  %vm1989_vm0 = vmor %vm1987_vm14, %vm1988_vm12 }
 0x3b2   :  { %v1984_v45 = vsub.f32 1.0, %v1983_v32  ;;  %v2029_v42 = vpop.f32.mrf.mxu0  ;;  %v2042_v25 = vpop.f32.mrf.mxu1 }
 0x3b3   :  { %v1970_v50 = vmul.f32 %v4089_v18, %v1969_v22 }
 0x3b4   :  { %v1985_v60 = vmul.f32 %v4091_v48, %v1984_v45 }
 0x3b5   :  { %v4093_v37 = vpop.eup %4092  ;;  %v1971_v28 = vadd.f32 %v4089_v18, %v1970_v50 }
 0x3b6   :  { %v1998_v24 = vmul.f32 %v4093_v37, %v5412_v14  ;;  %v1986_v32 = vadd.f32 %v4091_v48, %v1985_v60  ;;  %v4095_v25 = vpop.eup %4094  ;;  %v2041_v60 = vadd.f32 %v2040_v6, %v4982_v49  ;;  %vm2003_vm4 = vweird.f32 %v4093_v37 }
 0x3b7   :  { %v1975_v42 = vsel %vm1974_vm15, %v4089_v18, %v1971_v28  ;;  %vm2004_vm6 = vmor %vm2002_vm5, %vm2003_vm4 }
 0x3b8   :  { %v1999_v22 = vsub.f32 1.0, %v1998_v24  ;;  %v1980_v38 = vsel %vm1977_vm2, %v1979_v59, %v1975_v42  ;;  %v1990_v9 = vsel %vm1989_vm0, %v4091_v48, %v1986_v32 }
 0x3b9   :  { %v1995_v45 = vsel %vm1992_vm3, %v1994_v63, %v1990_v9  ;;  %v2014_v62 = vmul.f32 %v4095_v25, %v1980_v38  ;;  %v2055_v11 = vpop.f32.mrf.mxu2  ;;  %v2068_v50 = vpop.f32.mrf.mxu3  ;;  %v2008_v9 = vand.u32 2147483648, %v5412_v14 }
 0x3ba   :  { %v2000_v43 = vmul.f32 %v4093_v37, %v1999_v22  ;;  %v2013_v8 = vmul.f32 %v1995_v45, %v5283_v35  ;;  %v2006_v35 = vand.u32 2147483647, %v5412_v14 }
 0x3bb   :  { %v2080_v20 = vpop.f32.mrf.mxu0  ;;  %v2093_v58 = vpop.f32.mrf.mxu1 }
 0x3bc   :  { %v5422_v28 = vadd.f32 %v2014_v62, %v2013_v8  ;;  %v2123_v3 = vadd.f32 %v2080_v20, %v2028_v0  ;;  %v2124_v18 = vadd.f32 %v2093_v58, %v2041_v60  ;;  %v2001_v59 = vadd.f32 %v4093_v37, %v2000_v43 }
 0x3bd   :  { %v2054_v62 = vadd.f32 %v2053_v26, %v4991_v39  ;;  %v2009_v0 = vor.u32 1.1754944e-38, %v2008_v9  ;;  %vm2007_vm7 = vcmp.eq.f32.partialorder %v2006_v35, 8.507059e+37  ;;  %v2067_v20 = vadd.f32 %v5416_v61, %v5003_v27 }
 0x3be   :  { %4096 = vtanh.f32 %v5422_v28  ;;  %v3796_v11 = vmul.f32 -1.442695, %v2123_v3  ;;  %v3797_v38 = vmul.f32 -1.442695, %v2124_v18  ;;  %v2005_v52 = vsel %vm2004_vm6, %v4093_v37, %v2001_v59 }
 0x3bf   :  { %v2010_v42 = vsel %vm2007_vm7, %v2009_v0, %v2005_v52 }
 0x3c0   :  { %4098 = vpow2.f32 %v3796_v11 }
 0x3c1   :  { %4100 = vpow2.f32 %v3797_v38 }
 0x3c3   :  { %v2106_v6 = vpop.f32.mrf.mxu2  ;;  %v2119_v48 = vpop.f32.mrf.mxu3 }
 0x3c4   :  { %v2125_v13 = vadd.f32 %v2106_v6, %v2054_v62  ;;  %v2082_v24 = vpop.f32.mrf.mxu0  ;;  %v2095_v32 = vpop.f32.mrf.mxu1  ;;  %v2126_v18 = vadd.f32 %v2119_v48, %v2067_v20 }
 0x3c5   :  { %v4097_v63 = vpop.eup %4096 }
 0x3c6   :  { %v2017_v25 = vmul.f32 %v4097_v63, %v2010_v42  ;;  %v3798_v22 = vmul.f32 -1.442695, %v2125_v13  ;;  %v4099_v45 = vpop.eup %4098 }
 0x3c7   :  { %v4101_v50 = vpop.eup %4100  ;;  %v2136_v43 = vadd.f32 1.0, %v4099_v45 }
 0x3c8   :  { %v5429_v14 = vpack.c.bf16 %v2017_v25, %v2017_v25  ;;  %4102 = vpow2.f32 %v3798_v22  ;;  %v2137_v37 = vadd.f32 1.0, %v4101_v50 }
 0x3c9   :  { %4104 = vrcp.f32 %v2136_v43  ;;  %v2150_v61 = vand.u32 2147483648, %v2136_v43  ;;  %v2148_v0 = vand.u32 2147483647, %v2136_v43  ;;  %vm2144_vm10 = vweird.f32 %v2136_v43 }
 0x3ca   :  { %2203 = vmatmul.bf16.vlgmr.msra.gmra.mxu0 %v5429_v14  ;;  %2216 = vmatmul.bf16.vlgmr.msrb.gmra.mxu1 %v5429_v14  ;;  %4106 = vrcp.f32 %v2137_v37  ;;  %v2165_v52 = vand.u32 2147483648, %v2137_v37  ;;  %v2163_v48 = vand.u32 2147483647, %v2137_v37  ;;  %vm2159_vm11 = vweird.f32 %v2137_v37 }
 0x3cb   :  { %v2108_v26 = vpop.f32.mrf.mxu2  ;;  %v2121_v8 = vpop.f32.mrf.mxu3  ;;  %2229 = vmatmul.bf16.vlgmr.msra.gmra.mxu2 %v5429_v14  ;;  %2242 = vmatmul.bf16.vlgmr.msra.gmra.mxu3 %v5429_v14  ;;  %v2151_v63 = vor.u32 1.1754944e-38, %v2150_v61  ;;  %vm2149_vm14 = vcmp.eq.f32.partialorder %v2148_v0, 8.507059e+37  ;;  %v6497_v61 = vld [vmem:[#allocation130_spill] sm:$0xff] }
 0x3cc   :  { %2367 = vmatpush.bf16.msra.mxu0 %v6278_v10  ;;  %2380 = vmatpush.bf16.msrb.mxu1 %v6279_v41  ;;  %v2166_v25 = vor.u32 1.1754944e-38, %v2165_v52  ;;  %vm2164_vm15 = vcmp.eq.f32.partialorder %v2163_v48, 8.507059e+37  ;;  %v6498_v52 = vld [vmem:[#allocation131_spill] sm:$0xff] }
 0x3cd   :  { %2393 = vmatpush.bf16.msra.mxu2 %v6280_v51  ;;  %2406 = vmatpush.bf16.msra.mxu3 %v6281_v54  ;;  %v6501_v48 = vld [vmem:[#allocation11_spill] sm:$0xff] }
 0x3ce   :  { %v4103_v60 = vpop.eup %4102 }
 0x3cf   :  { %v5441_v58 = vadd.f32 1.0, %v4103_v60  ;;  %v4105_v3 = vpop.eup %4104 }
 0x3d0   :  { %2368 = vmatpush.bf16.msra.mxu0 %v6282_v1  ;;  %2381 = vmatpush.bf16.msrb.mxu1 %v6283_v12  ;;  %v4107_v59 = vpop.eup %4106  ;;  %v2140_v9 = vmul.f32 %v4105_v3, %v2136_v43  ;;  %vm2145_vm8 = vweird.f32 %v4105_v3 }
 0x3d1   :  { %4108 = vrcp.f32 %v5441_v58  ;;  %2394 = vmatpush.bf16.msra.mxu2 %v6348_v29  ;;  %2407 = vmatpush.bf16.msra.mxu3 %v6349_v33  ;;  %v2155_v11 = vmul.f32 %v4107_v59, %v2137_v37  ;;  %vm2160_vm9 = vweird.f32 %v4107_v59  ;;  %vm2146_vm12 = vmor %vm2144_vm10, %vm2145_vm8  ;;  %vm2174_vm2 = vweird.f32 %v5441_v58 }
 0x3d2   :  { %v2141_v38 = vsub.f32 1.0, %v2140_v9  ;;  %4110 = vtanh.f32 %v2126_v18  ;;  %vm2161_vm13 = vmor %vm2159_vm11, %vm2160_vm9 }
 0x3d3   :  { %v2156_v35 = vsub.f32 1.0, %v2155_v11 }
 0x3d4   :  { %2369 = vmatpush.bf16.msra.mxu0 %v6350_v23  ;;  %2382 = vmatpush.bf16.msrb.mxu1 %v6351_v31  ;;  %v2142_v62 = vmul.f32 %v4105_v3, %v2141_v38 }
 0x3d5   :  { %2395 = vmatpush.bf16.msra.mxu2 %v6352_v56  ;;  %2408 = vmatpush.bf16.msra.mxu3 %v6353_v17  ;;  %v2157_v6 = vmul.f32 %v4107_v59, %v2156_v35 }
 0x3d6   :  { %v2143_v24 = vadd.f32 %v4105_v3, %v2142_v62  ;;  %v6499_v62 = vld [vmem:[#allocation132_spill] sm:$0xff] }
 0x3d7   :  { %v4109_v13 = vpop.eup %4108  ;;  %v2158_v42 = vadd.f32 %v4107_v59, %v2157_v6  ;;  %v6500_v6 = vld [vmem:[#allocation10_spill] sm:$0xff] }
 0x3d8   :  { %v2170_v32 = vmul.f32 %v4109_v13, %v5441_v58  ;;  %2370 = vmatpush.bf16.msra.mxu0 %v6289_v55  ;;  %2383 = vmatpush.bf16.msrb.mxu1 %v6290_v47  ;;  %v2147_v22 = vsel %vm2146_vm12, %v4105_v3, %v2143_v24  ;;  %v4111_v45 = vpop.eup %4110  ;;  %vm2175_vm0 = vweird.f32 %v4109_v13  ;;  %v6503_v24 = vld [vmem:[#allocation14_spill] sm:$0xff] }
 0x3d9   :  { %2396 = vmatpush.bf16.msra.mxu2 %v6291_v36  ;;  %2409 = vmatpush.bf16.msra.mxu3 %v6292_v57  ;;  %v2152_v43 = vsel %vm2149_vm14, %v2151_v63, %v2147_v22  ;;  %v2162_v37 = vsel %vm2161_vm13, %v4107_v59, %v2158_v42  ;;  %v2180_v59 = vand.u32 2147483648, %v5441_v58  ;;  %vm2176_vm3 = vmor %vm2174_vm2, %vm2175_vm0  ;;  %v6505_v63 = vld [vmem:[#allocation15_spill] sm:$0xff]  ;;  %v6506_v42 = vld [vmem:[#allocation16_spill] sm:$0xff] }
 0x3da   :  { %v2171_v50 = vsub.f32 1.0, %v2170_v32  ;;  %2322 = vmatmul.bf16.vlgmr.msrb.gmra.mxu0 %v5429_v14  ;;  %2335 = vmatmul.bf16.vlgmr.msra.gmra.mxu1 %v5429_v14  ;;  %v2167_v26 = vsel %vm2164_vm15, %v2166_v25, %v2162_v37  ;;  %v2186_v8 = vmul.f32 %v4111_v45, %v2152_v43  ;;  %v6504_v32 = vld [vmem:[#allocation13_spill] sm:$0xff]  ;;  %v6507_v25 = vld [vmem:[#allocation18_spill] sm:$0xff]  ;;  %v6509_v45 = vld [vmem:[#allocation19_spill] sm:$0xff] }
 0x3db   :  { %2348 = vmatmul.bf16.vlgmr.msrb.gmra.mxu2 %v5429_v14  ;;  %2361 = vmatmul.bf16.vlgmr.msrb.gmra.mxu3 %v5429_v14  ;;  %v2185_v20 = vmul.f32 %v2167_v26, %v5327_v46  ;;  %v2178_v46 = vand.u32 2147483647, %v5441_v58  ;;  %v2181_v9 = vor.u32 1.1754944e-38, %v2180_v59  ;;  %v6496_v58 = vld [vmem:[#allocation129_spill] sm:$0xff]  ;;  %v6511_v43 = vld [vmem:[#allocation22_spill] sm:$0xff]  ;;  %v6513_v26 = vld [vmem:[#allocation23_spill] sm:$0xff] }
 0x3dc   :  { %v2172_v60 = vmul.f32 %v4109_v13, %v2171_v50  ;;  %2371 = vmatpush.bf16.msra.mxu0 %v6293_v5  ;;  %2384 = vmatpush.bf16.msrb.mxu1 %v6294_v30  ;;  %v6508_v22 = vld [vmem:[#allocation17_spill] sm:$0xff]  ;;  %v6510_v50 = vld [vmem:[#allocation20_spill] sm:$0xff] }
 0x3dd   :  { %2397 = vmatpush.bf16.msra.mxu2 %v6295_v40  ;;  %2410 = vmatpush.bf16.msra.mxu3 %v6296_v21  ;;  %v5466_v3 = vadd.f32 %v2186_v8, %v2185_v20  ;;  %vm2179_vm4 = vcmp.eq.f32.partialorder %v2178_v46, 8.507059e+37  ;;  %v6512_v37 = vld [vmem:[#allocation21_spill] sm:$0xff]  ;;  %v6514_v8 = vld [vmem:[#allocation24_spill] sm:$0xff] }
 0x3de   :  { %v2173_v18 = vadd.f32 %v4109_v13, %v2172_v60  ;;  %v6515_v60 = vld [vmem:[#allocation26_spill] sm:$0xff]  ;;  %v6516_v20 = vld [vmem:[#allocation25_spill] sm:$0xff]  ;;  %v6518_v59 = vld [vmem:[#allocation28_spill] sm:$0xff] }
 0x3df   :  { %4112 = vtanh.f32 %v5466_v3  ;;  %v6519_v46 = vld [vmem:[#allocation29_spill] sm:$0xff] }
 0x3e0   :  { %2372 = vmatpush.bf16.msra.mxu0 %v6297_v7  ;;  %2385 = vmatpush.bf16.msrb.mxu1 %v6298_v34  ;;  %v2177_v14 = vsel %vm2176_vm3, %v4109_v13, %v2173_v18  ;;  %v6502_v13 = vld [vmem:[#allocation12_spill] sm:$0xff]  ;;  %v6517_v18 = vld [vmem:[#allocation30_spill] sm:$0xff] }
 0x3e1   :  { %2398 = vmatpush.bf16.msra.mxu2 %v4860_v19  ;;  %2411 = vmatpush.bf16.msra.mxu3 %v4862_v44  ;;  %v2182_v38 = vsel %vm2179_vm4, %v2181_v9, %v2177_v14  ;;  %v6520_v14 = vld [vmem:[#allocation27_spill] sm:$0xff]  ;;  %v6521_v9 = vld [vmem:[#allocation34_spill] sm:$0xff] }
 0x3e4   :  { %2373 = vmatpush.bf16.msra.mxu0 %v4866_v16  ;;  %2386 = vmatpush.bf16.msrb.mxu1 %v4868_v15 }
 0x3e5   :  { %2399 = vmatpush.bf16.msra.mxu2 %v4872_v2  ;;  %2412 = vmatpush.bf16.msra.mxu3 %v4874_v4  ;;  %v4113_v11 = vpop.eup %4112 }
 0x3e6   :  { %v2189_v35 = vmul.f32 %v4113_v11, %v2182_v38  ;;  %v6522_v11 = vld [vmem:[#allocation32_spill] sm:$0xff]  ;;  %v6523_v38 = vld [vmem:[#allocation33_spill] sm:$0xff] }
 0x3e8   :  { %2374 = vmatpush.bf16.msra.mxu0 %v6496_v58  ;;  %2387 = vmatpush.bf16.msrb.mxu1 %v6497_v61  ;;  %v2366_v0 = vpack.c.bf16 %v2189_v35, %v2189_v35  ;;  %v6524_v35 = vld [vmem:[#allocation31_spill] sm:$0xff] }
 0x3e9   :  { %2400 = vmatpush.bf16.msra.mxu2 %v6498_v52  ;;  %2413 = vmatpush.bf16.msra.mxu3 %v6499_v62 }
 0x3eb   :  { %2375 = vmatmul.bf16.vlgmr.msra.gmra.mxu0 %v2366_v0  ;;  %2388 = vmatmul.bf16.vlgmr.msrb.gmra.mxu1 %v2366_v0 }
 0x3ec   :  { %2491 = vmatpush.bf16.msrb.mxu0 %v6500_v6  ;;  %2504 = vmatpush.bf16.msra.mxu1 %v6501_v48 }
 0x3ed   :  { %2401 = vmatmul.bf16.vlgmr.msra.gmra.mxu2 %v2366_v0  ;;  %2414 = vmatmul.bf16.vlgmr.msra.gmra.mxu3 %v2366_v0  ;;  %v6525_v0 = vld [vmem:[#allocation40_spill] sm:$0xff] }
 0x3ee   :  { %2517 = vmatpush.bf16.msrb.mxu2 %v6502_v13  ;;  %2530 = vmatpush.bf16.msrb.mxu3 %v6503_v24 }
 0x3f0   :  { %2492 = vmatpush.bf16.msrb.mxu0 %v6504_v32  ;;  %2505 = vmatpush.bf16.msra.mxu1 %v6505_v63 }
 0x3f2   :  { %2518 = vmatpush.bf16.msrb.mxu2 %v6506_v42  ;;  %2531 = vmatpush.bf16.msrb.mxu3 %v6507_v25 }
 0x3f4   :  { %2493 = vmatpush.bf16.msrb.mxu0 %v6508_v22  ;;  %2506 = vmatpush.bf16.msra.mxu1 %v6509_v45  ;;  %v6569_v45 = vld [vmem:[#allocation64_spill] sm:$0xff] }
 0x3f6   :  { %2519 = vmatpush.bf16.msrb.mxu2 %v6510_v50  ;;  %2532 = vmatpush.bf16.msrb.mxu3 %v6511_v43 }
 0x3f8   :  { %2494 = vmatpush.bf16.msrb.mxu0 %v6512_v37  ;;  %2507 = vmatpush.bf16.msra.mxu1 %v6513_v26  ;;  %v6567_v26 = vld [vmem:[#allocation69_spill] sm:$0xff] }
 0x3fa   :  { %2520 = vmatpush.bf16.msrb.mxu2 %v6514_v8  ;;  %2533 = vmatpush.bf16.msrb.mxu3 %v6515_v60  ;;  %v6526_v60 = vld [vmem:[#allocation35_spill] sm:$0xff] }
 0x3fc   :  { %2495 = vmatpush.bf16.msrb.mxu0 %v6516_v20  ;;  %2508 = vmatpush.bf16.msra.mxu1 %v6517_v18  ;;  %v6527_v20 = vld [vmem:[#allocation37_spill] sm:$0xff]  ;;  %v6528_v18 = vld [vmem:[#allocation36_spill] sm:$0xff] }
 0x3fe   :  { %2521 = vmatpush.bf16.msrb.mxu2 %v6518_v59  ;;  %2534 = vmatpush.bf16.msrb.mxu3 %v6519_v46  ;;  %v6529_v59 = vld [vmem:[#allocation41_spill] sm:$0xff] }
 0x3ff   :  { %v6530_v46 = vld [vmem:[#allocation73_spill] sm:$0xff] }
 0x400   :  { %2496 = vmatpush.bf16.msrb.mxu0 %v6520_v14  ;;  %2509 = vmatpush.bf16.msra.mxu1 %v6521_v9  ;;  %v6531_v14 = vld [vmem:[#allocation74_spill] sm:$0xff] }
 0x401   :  { %v6532_v9 = vld [vmem:[#allocation38_spill] sm:$0xff] }
 0x402   :  { %2522 = vmatpush.bf16.msrb.mxu2 %v6522_v11  ;;  %2535 = vmatpush.bf16.msrb.mxu3 %v6523_v38  ;;  %v6533_v11 = vld [vmem:[#allocation39_spill] sm:$0xff] }
 0x403   :  { %v6534_v38 = vld [vmem:[#allocation75_spill] sm:$0xff] }
 0x404   :  { %2497 = vmatpush.bf16.msrb.mxu0 %v6524_v35  ;;  %2510 = vmatpush.bf16.msra.mxu1 %v6525_v0  ;;  %v6535_v35 = vld [vmem:[#allocation76_spill] sm:$0xff]  ;;  %v6536_v0 = vld [vmem:[#allocation77_spill] sm:$0xff] }
 0x406   :  { %2523 = vmatpush.bf16.msrb.mxu2 %v6526_v60  ;;  %2536 = vmatpush.bf16.msrb.mxu3 %v6527_v20  ;;  %v6537_v60 = vld [vmem:[#allocation78_spill] sm:$0xff]  ;;  %v6538_v20 = vld [vmem:[#allocation79_spill] sm:$0xff] }
 0x408   :  { %2498 = vmatpush.bf16.msrb.mxu0 %v6528_v18  ;;  %2511 = vmatpush.bf16.msra.mxu1 %v6529_v59  ;;  %v6539_v18 = vld [vmem:[#allocation80_spill] sm:$0xff]  ;;  %v6540_v59 = vld [vmem:[#allocation82_spill] sm:$0xff] }
 0x40a   :  { %2524 = vmatpush.bf16.msrb.mxu2 %v6532_v9  ;;  %2537 = vmatpush.bf16.msrb.mxu3 %v6533_v11  ;;  %v6543_v9 = vld [vmem:[#allocation85_spill] sm:$0xff]  ;;  %v6544_v11 = vld [vmem:[#allocation86_spill] sm:$0xff] }
 0x40c   :  { %2610 = vmatpush.bf16.msra.mxu0 %v6530_v46  ;;  %2623 = vmatpush.bf16.msrb.mxu1 %v6531_v14  ;;  %v6541_v46 = vld [vmem:[#allocation83_spill] sm:$0xff]  ;;  %v6542_v14 = vld [vmem:[#allocation84_spill] sm:$0xff] }
 0x40e   :  { %2636 = vmatpush.bf16.msra.mxu2 %v6534_v38  ;;  %2649 = vmatpush.bf16.msra.mxu3 %v6535_v35  ;;  %v6545_v38 = vld [vmem:[#allocation87_spill] sm:$0xff]  ;;  %v6546_v35 = vld [vmem:[#allocation88_spill] sm:$0xff] }
 0x410   :  { %2611 = vmatpush.bf16.msra.mxu0 %v6536_v0  ;;  %2624 = vmatpush.bf16.msrb.mxu1 %v6537_v60  ;;  %v6547_v0 = vld [vmem:[#allocation89_spill] sm:$0xff]  ;;  %v6548_v60 = vld [vmem:[#allocation90_spill] sm:$0xff] }
 0x412   :  { %2637 = vmatpush.bf16.msra.mxu2 %v6538_v20  ;;  %2650 = vmatpush.bf16.msra.mxu3 %v6539_v18  ;;  %v6549_v20 = vld [vmem:[#allocation91_spill] sm:$0xff]  ;;  %v6550_v18 = vld [vmem:[#allocation92_spill] sm:$0xff] }
 0x414   :  { %2612 = vmatpush.bf16.msra.mxu0 %v6540_v59  ;;  %2625 = vmatpush.bf16.msrb.mxu1 %v6541_v46  ;;  %v6551_v59 = vld [vmem:[#allocation93_spill] sm:$0xff]  ;;  %v6552_v46 = vld [vmem:[#allocation94_spill] sm:$0xff] }
 0x416   :  { %2638 = vmatpush.bf16.msra.mxu2 %v6542_v14  ;;  %2651 = vmatpush.bf16.msra.mxu3 %v6543_v9  ;;  %v6553_v14 = vld [vmem:[#allocation95_spill] sm:$0xff]  ;;  %v6554_v9 = vld [vmem:[#allocation96_spill] sm:$0xff] }
 0x418   :  { %2613 = vmatpush.bf16.msra.mxu0 %v6544_v11  ;;  %2626 = vmatpush.bf16.msrb.mxu1 %v6545_v38  ;;  %v6555_v11 = vld [vmem:[#allocation97_spill] sm:$0xff]  ;;  %v6556_v38 = vld [vmem:[#allocation98_spill] sm:$0xff] }
 0x41a   :  { %2639 = vmatpush.bf16.msra.mxu2 %v6546_v35  ;;  %2652 = vmatpush.bf16.msra.mxu3 %v6547_v0  ;;  %v6557_v35 = vld [vmem:[#allocation99_spill] sm:$0xff]  ;;  %v6558_v0 = vld [vmem:[#allocation100_spill] sm:$0xff] }
 0x41c   :  { %2614 = vmatpush.bf16.msra.mxu0 %v6548_v60  ;;  %2627 = vmatpush.bf16.msrb.mxu1 %v6549_v20  ;;  %v6559_v60 = vld [vmem:[#allocation101_spill] sm:$0xff]  ;;  %v6560_v20 = vld [vmem:[#allocation102_spill] sm:$0xff] }
 0x41e   :  { %2640 = vmatpush.bf16.msra.mxu2 %v6550_v18  ;;  %2653 = vmatpush.bf16.msra.mxu3 %v6551_v59  ;;  %v6561_v18 = vld [vmem:[#allocation103_spill] sm:$0xff]  ;;  %v6562_v59 = vld [vmem:[#allocation104_spill] sm:$0xff] }
 0x420   :  { %2615 = vmatpush.bf16.msra.mxu0 %v6552_v46  ;;  %2628 = vmatpush.bf16.msrb.mxu1 %v6553_v14  ;;  %v6563_v46 = vld [vmem:[#allocation105_spill] sm:$0xff]  ;;  %v6564_v14 = vld [vmem:[#allocation42_spill] sm:$0xff] }
 0x422   :  { %2641 = vmatpush.bf16.msra.mxu2 %v6554_v9  ;;  %2654 = vmatpush.bf16.msra.mxu3 %v6555_v11  ;;  %v6565_v9 = vld [vmem:[#allocation62_spill] sm:$0xff]  ;;  %v6566_v11 = vld [vmem:[#allocation55_spill] sm:$0xff] }
 0x423   :  { %v172_v8 = vadd.f32 %v6565_v9, %v6564_v14 }
 0x424   :  { %2616 = vmatpush.bf16.msra.mxu0 %v6556_v38  ;;  %2629 = vmatpush.bf16.msrb.mxu1 %v6557_v35  ;;  %v201_v38 = vadd.f32 %v6567_v26, %v6566_v11 }
 0x426   :  { %2642 = vmatpush.bf16.msra.mxu2 %v6558_v0  ;;  %2655 = vmatpush.bf16.msra.mxu3 %v6559_v60 }
 0x428   :  { %2617 = vmatpush.bf16.msra.mxu0 %v6560_v20  ;;  %2630 = vmatpush.bf16.msrb.mxu1 %v6561_v18  ;;  %v6568_v20 = vld [vmem:[#allocation49_spill] sm:$0xff] }
 0x429   :  { %v230_v18 = vadd.f32 %v6569_v45, %v6568_v20  ;;  %v6570_v45 = vld [vmem:[#allocation50_spill] sm:$0xff] }
 0x42a   :  { %2643 = vmatpush.bf16.msra.mxu2 %v6562_v59  ;;  %2656 = vmatpush.bf16.msra.mxu3 %v6563_v46 }
 0x447   :  { %v2204_v37 = vpop.f32.mrf.mxu0  ;;  %v2217_v35 = vpop.f32.mrf.mxu1 }
 0x448   :  { %v2247_v43 = vadd.f32 %v2204_v37, %v172_v8  ;;  %v2248_v0 = vadd.f32 %v2217_v35, %v201_v38 }
 0x44a   :  { %v3799_v50 = vmul.f32 -1.442695, %v2247_v43  ;;  %v3800_v60 = vmul.f32 -1.442695, %v2248_v0 }
 0x44c   :  { %4114 = vpow2.f32 %v3799_v50 }
 0x44d   :  { %4116 = vpow2.f32 %v3800_v60  ;;  %v6571_v60 = vld [vmem:[#allocation65_spill] sm:$0xff] }
 0x44e   :  { %v2230_v59 = vpop.f32.mrf.mxu2  ;;  %v2243_v22 = vpop.f32.mrf.mxu3  ;;  %v259_v35 = vadd.f32 %v6571_v60, %v6570_v45 }
 0x44f   :  { %v2249_v46 = vadd.f32 %v2230_v59, %v230_v18  ;;  %v2206_v25 = vpop.f32.mrf.mxu0  ;;  %v2219_v42 = vpop.f32.mrf.mxu1 }
 0x450   :  { %v2250_v42 = vadd.f32 %v2243_v22, %v259_v35 }
 0x451   :  { %v3801_v9 = vmul.f32 -1.442695, %v2249_v46 }
 0x452   :  { %v4115_v14 = vpop.eup %4114 }
 0x453   :  { %v4117_v63 = vpop.eup %4116  ;;  %v2260_v26 = vadd.f32 1.0, %v4115_v14  ;;  %4118 = vpow2.f32 %v3801_v9 }
 0x454   :  { %v2261_v11 = vadd.f32 1.0, %v4117_v63 }
 0x455   :  { %4120 = vrcp.f32 %v2260_v26  ;;  %vm2268_vm7 = vweird.f32 %v2260_v26 }
 0x456   :  { %4122 = vrcp.f32 %v2261_v11  ;;  %v2232_v43 = vpop.f32.mrf.mxu2  ;;  %v2245_v37 = vpop.f32.mrf.mxu3  ;;  %v2289_v24 = vand.u32 2147483648, %v2261_v11  ;;  %v2287_v22 = vand.u32 2147483647, %v2261_v11  ;;  %vm2283_vm8 = vweird.f32 %v2261_v11 }
 0x457   :  { %v2323_v50 = vpop.f32.mrf.mxu0  ;;  %v2336_v8 = vpop.f32.mrf.mxu1  ;;  %v2274_v37 = vand.u32 2147483648, %v2260_v26 }
 0x458   :  { %vm2288_vm12 = vcmp.eq.f32.partialorder %v2287_v22, 8.507059e+37  ;;  %v2324_v58 = vadd.f32 %v2323_v50, %v4979_v53 }
 0x459   :  { %v4119_v38 = vpop.eup %4118  ;;  %v2275_v48 = vor.u32 1.1754944e-38, %v2274_v37 }
 0x45a   :  { %v5556_v0 = vadd.f32 1.0, %v4119_v38  ;;  %v2272_v38 = vand.u32 2147483647, %v2260_v26 }
 0x45b   :  { %v4121_v25 = vpop.eup %4120 }
 0x45c   :  { %v4123_v18 = vpop.eup %4122  ;;  %v2264_v59 = vmul.f32 %v4121_v25, %v2260_v26  ;;  %4124 = vrcp.f32 %v5556_v0  ;;  %vm2269_vm5 = vweird.f32 %v4121_v25  ;;  %vm2273_vm11 = vcmp.eq.f32.partialorder %v2272_v38, 8.507059e+37 }
 0x45d   :  { %v2279_v46 = vmul.f32 %v4123_v18, %v2261_v11  ;;  %4126 = vtanh.f32 %v2250_v42  ;;  %vm2284_vm6 = vweird.f32 %v4123_v18  ;;  %vm2270_vm9 = vmor %vm2268_vm7, %vm2269_vm5  ;;  %v2290_v42 = vor.u32 1.1754944e-38, %v2289_v24 }
 0x45e   :  { %v2265_v63 = vsub.f32 1.0, %v2264_v59  ;;  %v2349_v14 = vpop.f32.mrf.mxu2  ;;  %v5559_v9 = vpop.f32.mrf.mxu3  ;;  %vm2285_vm10 = vmor %vm2283_vm8, %vm2284_vm6  ;;  %vm2298_vm14 = vweird.f32 %v5556_v0 }
 0x45f   :  { %v2280_v43 = vsub.f32 1.0, %v2279_v46  ;;  %v2325_v20 = vpop.f32.mrf.mxu0  ;;  %v2338_v32 = vpop.f32.mrf.mxu1 }
 0x460   :  { %v2266_v60 = vmul.f32 %v4121_v25, %v2265_v63 }
 0x461   :  { %v2281_v45 = vmul.f32 %v4123_v18, %v2280_v43 }
 0x462   :  { %v4125_v35 = vpop.eup %4124  ;;  %v2267_v13 = vadd.f32 %v4121_v25, %v2266_v60 }
 0x463   :  { %v2294_v59 = vmul.f32 %v4125_v35, %v5556_v0  ;;  %v2282_v46 = vadd.f32 %v4123_v18, %v2281_v45  ;;  %v4127_v32 = vpop.eup %4126  ;;  %v2337_v45 = vadd.f32 %v2336_v8, %v4982_v49  ;;  %vm2299_vm13 = vweird.f32 %v4125_v35 }
 0x464   :  { %v2271_v20 = vsel %vm2270_vm9, %v4121_v25, %v2267_v13  ;;  %vm2300_vm15 = vmor %vm2298_vm14, %vm2299_vm13 }
 0x465   :  { %v2295_v63 = vsub.f32 1.0, %v2294_v59  ;;  %v2276_v6 = vsel %vm2273_vm11, %v2275_v48, %v2271_v20  ;;  %v2286_v62 = vsel %vm2285_vm10, %v4123_v18, %v2282_v46 }
 0x466   :  { %v2291_v43 = vsel %vm2288_vm12, %v2290_v42, %v2286_v62  ;;  %v2310_v52 = vmul.f32 %v4127_v32, %v2276_v6  ;;  %v2351_v61 = vpop.f32.mrf.mxu2  ;;  %v2364_v60 = vpop.f32.mrf.mxu3  ;;  %v2304_v62 = vand.u32 2147483648, %v5556_v0 }
 0x467   :  { %v2296_v26 = vmul.f32 %v4125_v35, %v2295_v63  ;;  %v2309_v11 = vmul.f32 %v2291_v43, %v5422_v28  ;;  %v2302_v28 = vand.u32 2147483647, %v5556_v0 }
 0x468   :  { %v2376_v37 = vpop.f32.mrf.mxu0  ;;  %v2389_v24 = vpop.f32.mrf.mxu1 }
 0x469   :  { %v5565_v13 = vadd.f32 %v2310_v52, %v2309_v11  ;;  %v2419_v25 = vadd.f32 %v2376_v37, %v2324_v58  ;;  %v2420_v38 = vadd.f32 %v2389_v24, %v2337_v45  ;;  %v2297_v48 = vadd.f32 %v4125_v35, %v2296_v26 }
 0x46a   :  { %v2350_v52 = vadd.f32 %v2349_v14, %v4991_v39  ;;  %v2305_v58 = vor.u32 1.1754944e-38, %v2304_v62  ;;  %vm2303_vm0 = vcmp.eq.f32.partialorder %v2302_v28, 8.507059e+37  ;;  %v2363_v37 = vadd.f32 %v5559_v9, %v5003_v27 }
 0x46b   :  { %4128 = vtanh.f32 %v5565_v13  ;;  %v3802_v61 = vmul.f32 -1.442695, %v2419_v25  ;;  %v3803_v6 = vmul.f32 -1.442695, %v2420_v38  ;;  %v2301_v50 = vsel %vm2300_vm15, %v4125_v35, %v2297_v48 }
 0x46c   :  { %v2306_v20 = vsel %vm2303_vm0, %v2305_v58, %v2301_v50 }
 0x46d   :  { %4130 = vpow2.f32 %v3802_v61 }
 0x46e   :  { %4132 = vpow2.f32 %v3803_v6 }
 0x470   :  { %v2402_v8 = vpop.f32.mrf.mxu2  ;;  %v2415_v18 = vpop.f32.mrf.mxu3 }
 0x471   :  { %v2421_v22 = vadd.f32 %v2402_v8, %v2350_v52  ;;  %v2378_v59 = vpop.f32.mrf.mxu0  ;;  %v2391_v46 = vpop.f32.mrf.mxu1  ;;  %v2422_v38 = vadd.f32 %v2415_v18, %v2363_v37 }
 0x472   :  { %v4129_v42 = vpop.eup %4128 }
 0x473   :  { %v2313_v32 = vmul.f32 %v4129_v42, %v2306_v20  ;;  %v3804_v63 = vmul.f32 -1.442695, %v2421_v22  ;;  %v4131_v43 = vpop.eup %4130 }
 0x474   :  { %v4133_v60 = vpop.eup %4132  ;;  %v2432_v26 = vadd.f32 1.0, %v4131_v43 }
 0x475   :  { %v5572_v0 = vpack.c.bf16 %v2313_v32, %v2313_v32  ;;  %4134 = vpow2.f32 %v3804_v63  ;;  %v2433_v35 = vadd.f32 1.0, %v4133_v60 }
 0x476   :  { %4136 = vrcp.f32 %v2432_v26  ;;  %v2446_v9 = vand.u32 2147483648, %v2432_v26  ;;  %v2444_v58 = vand.u32 2147483647, %v2432_v26  ;;  %vm2440_vm4 = vweird.f32 %v2432_v26 }
 0x477   :  { %2499 = vmatmul.bf16.vlgmr.msrb.gmra.mxu0 %v5572_v0  ;;  %2512 = vmatmul.bf16.vlgmr.msra.gmra.mxu1 %v5572_v0  ;;  %4138 = vrcp.f32 %v2433_v35  ;;  %v2461_v50 = vand.u32 2147483648, %v2433_v35  ;;  %v2459_v18 = vand.u32 2147483647, %v2433_v35  ;;  %vm2455_vm5 = vweird.f32 %v2433_v35 }
 0x478   :  { %v2404_v14 = vpop.f32.mrf.mxu2  ;;  %v2417_v11 = vpop.f32.mrf.mxu3  ;;  %2525 = vmatmul.bf16.vlgmr.msrb.gmra.mxu2 %v5572_v0  ;;  %2538 = vmatmul.bf16.vlgmr.msrb.gmra.mxu3 %v5572_v0  ;;  %v2447_v42 = vor.u32 1.1754944e-38, %v2446_v9  ;;  %vm2445_vm8 = vcmp.eq.f32.partialorder %v2444_v58, 8.507059e+37  ;;  %v6573_v9 = vld [vmem:[#allocation130_spill] sm:$0xff] }
 0x479   :  { %2663 = vmatpush.bf16.msrb.mxu0 %v6278_v10  ;;  %2676 = vmatpush.bf16.msra.mxu1 %v6279_v41  ;;  %v2462_v32 = vor.u32 1.1754944e-38, %v2461_v50  ;;  %vm2460_vm9 = vcmp.eq.f32.partialorder %v2459_v18, 8.507059e+37  ;;  %v6574_v50 = vld [vmem:[#allocation131_spill] sm:$0xff] }
 0x47a   :  { %2689 = vmatpush.bf16.msrb.mxu2 %v6280_v51  ;;  %2702 = vmatpush.bf16.msrb.mxu3 %v6281_v54  ;;  %v6577_v18 = vld [vmem:[#allocation11_spill] sm:$0xff] }
 0x47b   :  { %v4135_v45 = vpop.eup %4134 }
 0x47c   :  { %v5584_v24 = vadd.f32 1.0, %v4135_v45  ;;  %v4137_v25 = vpop.eup %4136 }
 0x47d   :  { %2664 = vmatpush.bf16.msrb.mxu0 %v6282_v1  ;;  %2677 = vmatpush.bf16.msra.mxu1 %v6283_v12  ;;  %v4139_v48 = vpop.eup %4138  ;;  %v2436_v62 = vmul.f32 %v4137_v25, %v2432_v26  ;;  %vm2441_vm2 = vweird.f32 %v4137_v25 }
 0x47e   :  { %4140 = vrcp.f32 %v5584_v24  ;;  %2690 = vmatpush.bf16.msrb.mxu2 %v6348_v29  ;;  %2703 = vmatpush.bf16.msrb.mxu3 %v6349_v33  ;;  %v2451_v61 = vmul.f32 %v4139_v48, %v2433_v35  ;;  %vm2456_vm3 = vweird.f32 %v4139_v48  ;;  %vm2442_vm6 = vmor %vm2440_vm4, %vm2441_vm2  ;;  %vm2470_vm11 = vweird.f32 %v5584_v24 }
 0x47f   :  { %v2437_v6 = vsub.f32 1.0, %v2436_v62  ;;  %4142 = vtanh.f32 %v2422_v38  ;;  %vm2457_vm7 = vmor %vm2455_vm5, %vm2456_vm3 }
 0x480   :  { %v2452_v28 = vsub.f32 1.0, %v2451_v61 }
 0x481   :  { %2665 = vmatpush.bf16.msrb.mxu0 %v6350_v23  ;;  %2678 = vmatpush.bf16.msra.mxu1 %v6351_v31  ;;  %v2438_v52 = vmul.f32 %v4137_v25, %v2437_v6 }
 0x482   :  { %2691 = vmatpush.bf16.msrb.mxu2 %v6352_v56  ;;  %2704 = vmatpush.bf16.msrb.mxu3 %v6353_v17  ;;  %v2453_v8 = vmul.f32 %v4139_v48, %v2452_v28 }
 0x483   :  { %v2439_v59 = vadd.f32 %v4137_v25, %v2438_v52  ;;  %v6575_v52 = vld [vmem:[#allocation132_spill] sm:$0xff] }
 0x484   :  { %v4141_v22 = vpop.eup %4140  ;;  %v2454_v20 = vadd.f32 %v4139_v48, %v2453_v8  ;;  %v6576_v8 = vld [vmem:[#allocation10_spill] sm:$0xff] }
 0x485   :  { %v2466_v46 = vmul.f32 %v4141_v22, %v5584_v24  ;;  %2666 = vmatpush.bf16.msrb.mxu0 %v6289_v55  ;;  %2679 = vmatpush.bf16.msra.mxu1 %v6290_v47  ;;  %v2443_v63 = vsel %vm2442_vm6, %v4137_v25, %v2439_v59  ;;  %v4143_v43 = vpop.eup %4142  ;;  %vm2471_vm10 = vweird.f32 %v4141_v22  ;;  %v6579_v59 = vld [vmem:[#allocation14_spill] sm:$0xff] }
 0x486   :  { %2692 = vmatpush.bf16.msrb.mxu2 %v6291_v36  ;;  %2705 = vmatpush.bf16.msrb.mxu3 %v6292_v57  ;;  %v2448_v26 = vsel %vm2445_vm8, %v2447_v42, %v2443_v63  ;;  %v2458_v35 = vsel %vm2457_vm7, %v4139_v48, %v2454_v20  ;;  %v2476_v48 = vand.u32 2147483648, %v5584_v24  ;;  %vm2472_vm12 = vmor %vm2470_vm11, %vm2471_vm10  ;;  %v6581_v42 = vld [vmem:[#allocation15_spill] sm:$0xff]  ;;  %v6582_v20 = vld [vmem:[#allocation16_spill] sm:$0xff] }
 0x487   :  { %v2467_v60 = vsub.f32 1.0, %v2466_v46  ;;  %2618 = vmatmul.bf16.vlgmr.msra.gmra.mxu0 %v5572_v0  ;;  %2631 = vmatmul.bf16.vlgmr.msrb.gmra.mxu1 %v5572_v0  ;;  %v2463_v14 = vsel %vm2460_vm9, %v2462_v32, %v2458_v35  ;;  %v2482_v11 = vmul.f32 %v4143_v43, %v2448_v26  ;;  %v6580_v46 = vld [vmem:[#allocation13_spill] sm:$0xff]  ;;  %v6583_v32 = vld [vmem:[#allocation18_spill] sm:$0xff]  ;;  %v6585_v43 = vld [vmem:[#allocation19_spill] sm:$0xff] }
 0x488   :  { %2644 = vmatmul.bf16.vlgmr.msra.gmra.mxu2 %v5572_v0  ;;  %2657 = vmatmul.bf16.vlgmr.msra.gmra.mxu3 %v5572_v0  ;;  %v2481_v37 = vmul.f32 %v2463_v14, %v5466_v3  ;;  %v2474_v3 = vand.u32 2147483647, %v5584_v24  ;;  %v2477_v62 = vor.u32 1.1754944e-38, %v2476_v48  ;;  %v6572_v24 = vld [vmem:[#allocation129_spill] sm:$0xff]  ;;  %v6587_v26 = vld [vmem:[#allocation22_spill] sm:$0xff]  ;;  %v6589_v14 = vld [vmem:[#allocation23_spill] sm:$0xff] }
 0x489   :  { %v2468_v45 = vmul.f32 %v4141_v22, %v2467_v60  ;;  %2667 = vmatpush.bf16.msrb.mxu0 %v6293_v5  ;;  %2680 = vmatpush.bf16.msra.mxu1 %v6294_v30  ;;  %v6584_v63 = vld [vmem:[#allocation17_spill] sm:$0xff]  ;;  %v6586_v60 = vld [vmem:[#allocation20_spill] sm:$0xff] }
 0x48a   :  { %2693 = vmatpush.bf16.msrb.mxu2 %v6295_v40  ;;  %2706 = vmatpush.bf16.msrb.mxu3 %v6296_v21  ;;  %v5609_v25 = vadd.f32 %v2482_v11, %v2481_v37  ;;  %vm2475_vm13 = vcmp.eq.f32.partialorder %v2474_v3, 8.507059e+37  ;;  %v6588_v35 = vld [vmem:[#allocation21_spill] sm:$0xff]  ;;  %v6590_v11 = vld [vmem:[#allocation24_spill] sm:$0xff] }
 0x48b   :  { %v2469_v38 = vadd.f32 %v4141_v22, %v2468_v45  ;;  %v6591_v45 = vld [vmem:[#allocation26_spill] sm:$0xff]  ;;  %v6592_v37 = vld [vmem:[#allocation25_spill] sm:$0xff]  ;;  %v6594_v48 = vld [vmem:[#allocation28_spill] sm:$0xff] }
 0x48c   :  { %4144 = vtanh.f32 %v5609_v25  ;;  %v6595_v3 = vld [vmem:[#allocation29_spill] sm:$0xff] }
 0x48d   :  { %2668 = vmatpush.bf16.msrb.mxu0 %v6297_v7  ;;  %2681 = vmatpush.bf16.msra.mxu1 %v6298_v34  ;;  %v2473_v0 = vsel %vm2472_vm12, %v4141_v22, %v2469_v38  ;;  %v6578_v22 = vld [vmem:[#allocation12_spill] sm:$0xff]  ;;  %v6593_v38 = vld [vmem:[#allocation30_spill] sm:$0xff] }
 0x48e   :  { %2694 = vmatpush.bf16.msrb.mxu2 %v4860_v19  ;;  %2707 = vmatpush.bf16.msrb.mxu3 %v4862_v44  ;;  %v2478_v6 = vsel %vm2475_vm13, %v2477_v62, %v2473_v0  ;;  %v6596_v0 = vld [vmem:[#allocation27_spill] sm:$0xff]  ;;  %v6597_v62 = vld [vmem:[#allocation34_spill] sm:$0xff] }
 0x491   :  { %2669 = vmatpush.bf16.msrb.mxu0 %v4866_v16  ;;  %2682 = vmatpush.bf16.msra.mxu1 %v4868_v15 }
 0x492   :  { %2695 = vmatpush.bf16.msrb.mxu2 %v4872_v2  ;;  %2708 = vmatpush.bf16.msrb.mxu3 %v4874_v4  ;;  %v4145_v61 = vpop.eup %4144 }
 0x493   :  { %v2485_v28 = vmul.f32 %v4145_v61, %v2478_v6  ;;  %v6598_v61 = vld [vmem:[#allocation32_spill] sm:$0xff]  ;;  %v6599_v6 = vld [vmem:[#allocation33_spill] sm:$0xff] }
 0x495   :  { %2670 = vmatpush.bf16.msrb.mxu0 %v6572_v24  ;;  %2683 = vmatpush.bf16.msra.mxu1 %v6573_v9  ;;  %v2662_v58 = vpack.c.bf16 %v2485_v28, %v2485_v28  ;;  %v6600_v28 = vld [vmem:[#allocation31_spill] sm:$0xff] }
 0x496   :  { %2696 = vmatpush.bf16.msrb.mxu2 %v6574_v50  ;;  %2709 = vmatpush.bf16.msrb.mxu3 %v6575_v52 }
 0x498   :  { %2671 = vmatmul.bf16.vlgmr.msrb.gmra.mxu0 %v2662_v58  ;;  %2684 = vmatmul.bf16.vlgmr.msra.gmra.mxu1 %v2662_v58 }
 0x499   :  { %2787 = vmatpush.bf16.msra.mxu0 %v6576_v8  ;;  %2800 = vmatpush.bf16.msrb.mxu1 %v6577_v18  ;;  %v6602_v8 = vld [vmem:[#allocation35_spill] sm:$0xff]  ;;  %v6603_v18 = vld [vmem:[#allocation37_spill] sm:$0xff] }
 0x49a   :  { %2697 = vmatmul.bf16.vlgmr.msrb.gmra.mxu2 %v2662_v58  ;;  %2710 = vmatmul.bf16.vlgmr.msrb.gmra.mxu3 %v2662_v58  ;;  %v6601_v58 = vld [vmem:[#allocation40_spill] sm:$0xff] }
 0x49b   :  { %2813 = vmatpush.bf16.msra.mxu2 %v6578_v22  ;;  %2826 = vmatpush.bf16.msra.mxu3 %v6579_v59  ;;  %v6604_v22 = vld [vmem:[#allocation36_spill] sm:$0xff]  ;;  %v6605_v59 = vld [vmem:[#allocation41_spill] sm:$0xff] }
 0x49d   :  { %2788 = vmatpush.bf16.msra.mxu0 %v6580_v46  ;;  %2801 = vmatpush.bf16.msrb.mxu1 %v6581_v42  ;;  %v6606_v46 = vld [vmem:[#allocation73_spill] sm:$0xff]  ;;  %v6607_v42 = vld [vmem:[#allocation74_spill] sm:$0xff] }
 0x49f   :  { %2814 = vmatpush.bf16.msra.mxu2 %v6582_v20  ;;  %2827 = vmatpush.bf16.msra.mxu3 %v6583_v32  ;;  %v6608_v20 = vld [vmem:[#allocation38_spill] sm:$0xff]  ;;  %v6609_v32 = vld [vmem:[#allocation39_spill] sm:$0xff] }
 0x4a1   :  { %2789 = vmatpush.bf16.msra.mxu0 %v6584_v63  ;;  %2802 = vmatpush.bf16.msrb.mxu1 %v6585_v43  ;;  %v6610_v63 = vld [vmem:[#allocation75_spill] sm:$0xff]  ;;  %v6611_v43 = vld [vmem:[#allocation76_spill] sm:$0xff] }
 0x4a3   :  { %2815 = vmatpush.bf16.msra.mxu2 %v6586_v60  ;;  %2828 = vmatpush.bf16.msra.mxu3 %v6587_v26  ;;  %v6612_v60 = vld [vmem:[#allocation77_spill] sm:$0xff]  ;;  %v6613_v26 = vld [vmem:[#allocation78_spill] sm:$0xff] }
 0x4a5   :  { %2790 = vmatpush.bf16.msra.mxu0 %v6588_v35  ;;  %2803 = vmatpush.bf16.msrb.mxu1 %v6589_v14  ;;  %v6614_v35 = vld [vmem:[#allocation79_spill] sm:$0xff]  ;;  %v6615_v14 = vld [vmem:[#allocation80_spill] sm:$0xff] }
 0x4a7   :  { %2816 = vmatpush.bf16.msra.mxu2 %v6590_v11  ;;  %2829 = vmatpush.bf16.msra.mxu3 %v6591_v45  ;;  %v6616_v11 = vld [vmem:[#allocation82_spill] sm:$0xff]  ;;  %v6617_v45 = vld [vmem:[#allocation83_spill] sm:$0xff] }
 0x4a9   :  { %2791 = vmatpush.bf16.msra.mxu0 %v6592_v37  ;;  %2804 = vmatpush.bf16.msrb.mxu1 %v6593_v38  ;;  %v6618_v37 = vld [vmem:[#allocation84_spill] sm:$0xff]  ;;  %v6619_v38 = vld [vmem:[#allocation85_spill] sm:$0xff] }
 0x4ab   :  { %2817 = vmatpush.bf16.msra.mxu2 %v6594_v48  ;;  %2830 = vmatpush.bf16.msra.mxu3 %v6595_v3  ;;  %v6620_v48 = vld [vmem:[#allocation86_spill] sm:$0xff]  ;;  %v6621_v3 = vld [vmem:[#allocation87_spill] sm:$0xff] }
 0x4ad   :  { %2792 = vmatpush.bf16.msra.mxu0 %v6596_v0  ;;  %2805 = vmatpush.bf16.msrb.mxu1 %v6597_v62  ;;  %v6622_v0 = vld [vmem:[#allocation88_spill] sm:$0xff]  ;;  %v6623_v62 = vld [vmem:[#allocation89_spill] sm:$0xff] }
 0x4af   :  { %2818 = vmatpush.bf16.msra.mxu2 %v6598_v61  ;;  %2831 = vmatpush.bf16.msra.mxu3 %v6599_v6  ;;  %v6624_v61 = vld [vmem:[#allocation90_spill] sm:$0xff]  ;;  %v6625_v6 = vld [vmem:[#allocation91_spill] sm:$0xff] }
 0x4b1   :  { %2793 = vmatpush.bf16.msra.mxu0 %v6600_v28  ;;  %2806 = vmatpush.bf16.msrb.mxu1 %v6601_v58  ;;  %v6626_v28 = vld [vmem:[#allocation92_spill] sm:$0xff]  ;;  %v6627_v58 = vld [vmem:[#allocation93_spill] sm:$0xff] }
 0x4b3   :  { %2819 = vmatpush.bf16.msra.mxu2 %v6602_v8  ;;  %2832 = vmatpush.bf16.msra.mxu3 %v6603_v18  ;;  %v6628_v8 = vld [vmem:[#allocation94_spill] sm:$0xff]  ;;  %v6629_v18 = vld [vmem:[#allocation95_spill] sm:$0xff] }
 0x4b5   :  { %2794 = vmatpush.bf16.msra.mxu0 %v6604_v22  ;;  %2807 = vmatpush.bf16.msrb.mxu1 %v6605_v59  ;;  %v6630_v22 = vld [vmem:[#allocation96_spill] sm:$0xff]  ;;  %v6631_v59 = vld [vmem:[#allocation97_spill] sm:$0xff] }
 0x4b7   :  { %2820 = vmatpush.bf16.msra.mxu2 %v6608_v20  ;;  %2833 = vmatpush.bf16.msra.mxu3 %v6609_v32  ;;  %v6632_v20 = vld [vmem:[#allocation98_spill] sm:$0xff]  ;;  %v6633_v32 = vld [vmem:[#allocation99_spill] sm:$0xff] }
 0x4b9   :  { %2906 = vmatpush.bf16.msrb.mxu0 %v6606_v46  ;;  %2919 = vmatpush.bf16.msra.mxu1 %v6607_v42 }
 0x4bb   :  { %2932 = vmatpush.bf16.msrb.mxu2 %v6610_v63  ;;  %2945 = vmatpush.bf16.msrb.mxu3 %v6611_v43 }
 0x4bd   :  { %2907 = vmatpush.bf16.msrb.mxu0 %v6612_v60  ;;  %2920 = vmatpush.bf16.msra.mxu1 %v6613_v26 }
 0x4bf   :  { %2933 = vmatpush.bf16.msrb.mxu2 %v6614_v35  ;;  %2946 = vmatpush.bf16.msrb.mxu3 %v6615_v14 }
 0x4c1   :  { %2908 = vmatpush.bf16.msrb.mxu0 %v6616_v11  ;;  %2921 = vmatpush.bf16.msra.mxu1 %v6617_v45 }
 0x4c3   :  { %2934 = vmatpush.bf16.msrb.mxu2 %v6618_v37  ;;  %2947 = vmatpush.bf16.msrb.mxu3 %v6619_v38  ;;  %v6642_v38 = vld [vmem:[#allocation67_spill] sm:$0xff] }
 0x4c5   :  { %2909 = vmatpush.bf16.msrb.mxu0 %v6620_v48  ;;  %2922 = vmatpush.bf16.msra.mxu1 %v6621_v3  ;;  %v6641_v3 = vld [vmem:[#allocation72_spill] sm:$0xff] }
 0x4c7   :  { %2935 = vmatpush.bf16.msrb.mxu2 %v6622_v0  ;;  %2948 = vmatpush.bf16.msrb.mxu3 %v6623_v62  ;;  %v6634_v62 = vld [vmem:[#allocation100_spill] sm:$0xff]  ;;  %v6640_v0 = vld [vmem:[#allocation43_spill] sm:$0xff] }
 0x4c9   :  { %2910 = vmatpush.bf16.msrb.mxu0 %v6624_v61  ;;  %2923 = vmatpush.bf16.msra.mxu1 %v6625_v6  ;;  %v6635_v61 = vld [vmem:[#allocation101_spill] sm:$0xff]  ;;  %v6636_v6 = vld [vmem:[#allocation102_spill] sm:$0xff] }
 0x4cb   :  { %2936 = vmatpush.bf16.msrb.mxu2 %v6626_v28  ;;  %2949 = vmatpush.bf16.msrb.mxu3 %v6627_v58  ;;  %v6637_v28 = vld [vmem:[#allocation103_spill] sm:$0xff]  ;;  %v6638_v58 = vld [vmem:[#allocation104_spill] sm:$0xff] }
 0x4cd   :  { %2911 = vmatpush.bf16.msrb.mxu0 %v6628_v8  ;;  %2924 = vmatpush.bf16.msra.mxu1 %v6629_v18  ;;  %v6639_v8 = vld [vmem:[#allocation105_spill] sm:$0xff] }
 0x4cf   :  { %2937 = vmatpush.bf16.msrb.mxu2 %v6630_v22  ;;  %2950 = vmatpush.bf16.msrb.mxu3 %v6631_v59 }
 0x4d1   :  { %2912 = vmatpush.bf16.msrb.mxu0 %v6632_v20  ;;  %2925 = vmatpush.bf16.msra.mxu1 %v6633_v32 }
 0x4d3   :  { %2938 = vmatpush.bf16.msrb.mxu2 %v6634_v62  ;;  %2951 = vmatpush.bf16.msrb.mxu3 %v6635_v61 }
 0x4d5   :  { %2913 = vmatpush.bf16.msrb.mxu0 %v6636_v6  ;;  %2926 = vmatpush.bf16.msra.mxu1 %v6637_v28 }
 0x4d7   :  { %2939 = vmatpush.bf16.msrb.mxu2 %v6638_v58  ;;  %2952 = vmatpush.bf16.msrb.mxu3 %v6639_v8 }
 0x4f4   :  { %v2500_v18 = vpop.f32.mrf.mxu0  ;;  %v2513_v22 = vpop.f32.mrf.mxu1 }
 0x4f5   :  { %v2543_v59 = vadd.f32 %v2500_v18, %v6640_v0  ;;  %v2544_v20 = vadd.f32 %v2513_v22, %v6641_v3 }
 0x4f7   :  { %v3805_v48 = vmul.f32 -1.442695, %v2543_v59  ;;  %v3806_v32 = vmul.f32 -1.442695, %v2544_v20 }
 0x4f9   :  { %4146 = vpow2.f32 %v3805_v48 }
 0x4fa   :  { %4148 = vpow2.f32 %v3806_v32  ;;  %v6643_v32 = vld [vmem:[#allocation68_spill] sm:$0xff] }
 0x4fb   :  { %v2526_v62 = vpop.f32.mrf.mxu2  ;;  %v2539_v61 = vpop.f32.mrf.mxu3 }
 0x4fc   :  { %v2545_v6 = vadd.f32 %v2526_v62, %v6642_v38  ;;  %v2502_v37 = vpop.f32.mrf.mxu0  ;;  %v2515_v28 = vpop.f32.mrf.mxu1  ;;  %v2546_v38 = vadd.f32 %v2539_v61, %v6643_v32 }
 0x4fe   :  { %v3807_v45 = vmul.f32 -1.442695, %v2545_v6 }
 0x4ff   :  { %v4147_v58 = vpop.eup %4146 }
 0x500   :  { %v4149_v11 = vpop.eup %4148  ;;  %v2556_v8 = vadd.f32 1.0, %v4147_v58  ;;  %4150 = vpow2.f32 %v3807_v45 }
 0x501   :  { %v2557_v14 = vadd.f32 1.0, %v4149_v11 }
 0x502   :  { %4152 = vrcp.f32 %v2556_v8  ;;  %v2568_v60 = vand.u32 2147483647, %v2556_v8  ;;  %vm2564_vm0 = vweird.f32 %v2556_v8 }
 0x503   :  { %4154 = vrcp.f32 %v2557_v14  ;;  %v2528_v0 = vpop.f32.mrf.mxu2  ;;  %v2541_v3 = vpop.f32.mrf.mxu3  ;;  %v2585_v26 = vand.u32 2147483648, %v2557_v14  ;;  %v2583_v61 = vand.u32 2147483647, %v2557_v14  ;;  %vm2579_vm2 = vweird.f32 %v2557_v14 }
 0x504   :  { %v2619_v18 = vpop.f32.mrf.mxu0  ;;  %v2632_v22 = vpop.f32.mrf.mxu1  ;;  %v2570_v0 = vand.u32 2147483648, %v2556_v8  ;;  %vm2569_vm5 = vcmp.eq.f32.partialorder %v2568_v60, 8.507059e+37 }
 0x505   :  { %vm2584_vm6 = vcmp.eq.f32.partialorder %v2583_v61, 8.507059e+37  ;;  %v2620_v24 = vadd.f32 %v2619_v18, %v4979_v53 }
 0x506   :  { %v4151_v48 = vpop.eup %4150  ;;  %v2571_v42 = vor.u32 1.1754944e-38, %v2570_v0 }
 0x507   :  { %v5694_v59 = vadd.f32 1.0, %v4151_v48 }
 0x508   :  { %v4153_v20 = vpop.eup %4152 }
 0x509   :  { %v4155_v37 = vpop.eup %4154  ;;  %v2560_v62 = vmul.f32 %v4153_v20, %v2556_v8  ;;  %4156 = vrcp.f32 %v5694_v59  ;;  %vm2565_vm14 = vweird.f32 %v4153_v20  ;;  %vm2594_vm8 = vweird.f32 %v5694_v59 }
 0x50a   :  { %v2575_v6 = vmul.f32 %v4155_v37, %v2557_v14  ;;  %4158 = vtanh.f32 %v2546_v38  ;;  %vm2580_vm15 = vweird.f32 %v4155_v37  ;;  %vm2566_vm3 = vmor %vm2564_vm0, %vm2565_vm14  ;;  %v2586_v38 = vor.u32 1.1754944e-38, %v2585_v26 }
 0x50b   :  { %v2561_v28 = vsub.f32 1.0, %v2560_v62  ;;  %v2645_v45 = vpop.f32.mrf.mxu2  ;;  %v5698_v11 = vpop.f32.mrf.mxu3  ;;  %vm2581_vm4 = vmor %vm2579_vm2, %vm2580_vm15 }
 0x50c   :  { %v2576_v58 = vsub.f32 1.0, %v2575_v6  ;;  %v2621_v3 = vpop.f32.mrf.mxu0  ;;  %v2634_v35 = vpop.f32.mrf.mxu1 }
 0x50d   :  { %v2562_v48 = vmul.f32 %v4153_v20, %v2561_v28 }
 0x50e   :  { %v2577_v43 = vmul.f32 %v4155_v37, %v2576_v58 }
 0x50f   :  { %v4157_v32 = vpop.eup %4156  ;;  %v2563_v63 = vadd.f32 %v4153_v20, %v2562_v48 }
 0x510   :  { %v2590_v62 = vmul.f32 %v4157_v32, %v5694_v59  ;;  %v2578_v6 = vadd.f32 %v4155_v37, %v2577_v43  ;;  %v4159_v35 = vpop.eup %4158  ;;  %v2633_v43 = vadd.f32 %v2632_v22, %v4982_v49  ;;  %vm2595_vm7 = vweird.f32 %v4157_v32 }
 0x511   :  { %v2567_v3 = vsel %vm2566_vm3, %v4153_v20, %v2563_v63  ;;  %vm2596_vm9 = vmor %vm2594_vm8, %vm2595_vm7 }
 0x512   :  { %v2591_v28 = vsub.f32 1.0, %v2590_v62  ;;  %v2572_v46 = vsel %vm2569_vm5, %v2571_v42, %v2567_v3  ;;  %v2582_v52 = vsel %vm2581_vm4, %v4155_v37, %v2578_v6 }
 0x513   :  { %v2587_v58 = vsel %vm2584_vm6, %v2586_v38, %v2582_v52  ;;  %v2606_v50 = vmul.f32 %v4159_v35, %v2572_v46  ;;  %v2647_v9 = vpop.f32.mrf.mxu2  ;;  %v2660_v48 = vpop.f32.mrf.mxu3  ;;  %v2600_v52 = vand.u32 2147483648, %v5694_v59 }
 0x514   :  { %v2592_v8 = vmul.f32 %v4157_v32, %v2591_v28  ;;  %v2605_v14 = vmul.f32 %v2587_v58, %v5565_v13  ;;  %v2598_v13 = vand.u32 2147483647, %v5694_v59 }
 0x515   :  { %v2672_v0 = vpop.f32.mrf.mxu0  ;;  %v2685_v26 = vpop.f32.mrf.mxu1 }
 0x516   :  { %v5704_v63 = vadd.f32 %v2606_v50, %v2605_v14  ;;  %v2715_v60 = vadd.f32 %v2672_v0, %v2620_v24  ;;  %v2716_v20 = vadd.f32 %v2685_v26, %v2633_v43  ;;  %v2593_v42 = vadd.f32 %v4157_v32, %v2592_v8 }
 0x517   :  { %v2646_v50 = vadd.f32 %v2645_v45, %v4991_v39  ;;  %v2601_v24 = vor.u32 1.1754944e-38, %v2600_v52  ;;  %vm2599_vm10 = vcmp.eq.f32.partialorder %v2598_v13, 8.507059e+37  ;;  %v2659_v0 = vadd.f32 %v5698_v11, %v5003_v27 }
 0x518   :  { %4160 = vtanh.f32 %v5704_v63  ;;  %v3808_v9 = vmul.f32 -1.442695, %v2715_v60  ;;  %v3809_v46 = vmul.f32 -1.442695, %v2716_v20  ;;  %v2597_v18 = vsel %vm2596_vm9, %v4157_v32, %v2593_v42 }
 0x519   :  { %v2602_v3 = vsel %vm2599_vm10, %v2601_v24, %v2597_v18 }
 0x51a   :  { %4162 = vpow2.f32 %v3808_v9 }
 0x51b   :  { %4164 = vpow2.f32 %v3809_v46 }
 0x51d   :  { %v2698_v22 = vpop.f32.mrf.mxu2  ;;  %v2711_v37 = vpop.f32.mrf.mxu3 }
 0x51e   :  { %v2717_v61 = vadd.f32 %v2698_v22, %v2646_v50  ;;  %v2674_v62 = vpop.f32.mrf.mxu0  ;;  %v2687_v6 = vpop.f32.mrf.mxu1  ;;  %v2718_v20 = vadd.f32 %v2711_v37, %v2659_v0 }
 0x51f   :  { %v4161_v38 = vpop.eup %4160 }
 0x520   :  { %v2609_v35 = vmul.f32 %v4161_v38, %v2602_v3  ;;  %v3810_v28 = vmul.f32 -1.442695, %v2717_v61  ;;  %v4163_v58 = vpop.eup %4162 }
 0x521   :  { %v4165_v48 = vpop.eup %4164  ;;  %v2728_v8 = vadd.f32 1.0, %v4163_v58 }
 0x522   :  { %v5711_v59 = vpack.c.bf16 %v2609_v35, %v2609_v35  ;;  %4166 = vpow2.f32 %v3810_v28  ;;  %v2729_v32 = vadd.f32 1.0, %v4165_v48 }
 0x523   :  { %4168 = vrcp.f32 %v2728_v8  ;;  %v2742_v11 = vand.u32 2147483648, %v2728_v8  ;;  %v2740_v24 = vand.u32 2147483647, %v2728_v8  ;;  %vm2736_vm13 = vweird.f32 %v2728_v8 }
 0x524   :  { %2795 = vmatmul.bf16.vlgmr.msra.gmra.mxu0 %v5711_v59  ;;  %2808 = vmatmul.bf16.vlgmr.msrb.gmra.mxu1 %v5711_v59  ;;  %4170 = vrcp.f32 %v2729_v32  ;;  %v2757_v18 = vand.u32 2147483648, %v2729_v32  ;;  %v2755_v37 = vand.u32 2147483647, %v2729_v32  ;;  %vm2751_vm14 = vweird.f32 %v2729_v32 }
 0x525   :  { %v2700_v45 = vpop.f32.mrf.mxu2  ;;  %v2713_v14 = vpop.f32.mrf.mxu3  ;;  %2821 = vmatmul.bf16.vlgmr.msra.gmra.mxu2 %v5711_v59  ;;  %2834 = vmatmul.bf16.vlgmr.msra.gmra.mxu3 %v5711_v59  ;;  %v2743_v38 = vor.u32 1.1754944e-38, %v2742_v11  ;;  %vm2741_vm2 = vcmp.eq.f32.partialorder %v2740_v24, 8.507059e+37  ;;  %v6645_v11 = vld [vmem:[#allocation130_spill] sm:$0xff] }
 0x526   :  { %2959 = vmatpush.bf16.msra.mxu0 %v6278_v10  ;;  %2972 = vmatpush.bf16.msrb.mxu1 %v6279_v41  ;;  %v2758_v35 = vor.u32 1.1754944e-38, %v2757_v18  ;;  %vm2756_vm3 = vcmp.eq.f32.partialorder %v2755_v37, 8.507059e+37  ;;  %v6646_v18 = vld [vmem:[#allocation131_spill] sm:$0xff]  ;;  %v6649_v37 = vld [vmem:[#allocation74_spill] sm:$0xff] }
 0x527   :  { %2985 = vmatpush.bf16.msra.mxu2 %v6280_v51  ;;  %2998 = vmatpush.bf16.msra.mxu3 %v6281_v54 }
 0x528   :  { %v4167_v43 = vpop.eup %4166 }
 0x529   :  { %v5723_v26 = vadd.f32 1.0, %v4167_v43  ;;  %v4169_v60 = vpop.eup %4168 }
 0x52a   :  { %2960 = vmatpush.bf16.msra.mxu0 %v6282_v1  ;;  %2973 = vmatpush.bf16.msrb.mxu1 %v6283_v12  ;;  %v4171_v42 = vpop.eup %4170  ;;  %v2732_v52 = vmul.f32 %v4169_v60, %v2728_v8  ;;  %vm2737_vm11 = vweird.f32 %v4169_v60 }
 0x52b   :  { %4172 = vrcp.f32 %v5723_v26  ;;  %2986 = vmatpush.bf16.msra.mxu2 %v6348_v29  ;;  %2999 = vmatpush.bf16.msra.mxu3 %v6349_v33  ;;  %v2747_v9 = vmul.f32 %v4171_v42, %v2729_v32  ;;  %vm2752_vm12 = vweird.f32 %v4171_v42  ;;  %vm2738_vm15 = vmor %vm2736_vm13, %vm2737_vm11  ;;  %vm2766_vm5 = vweird.f32 %v5723_v26 }
 0x52c   :  { %v2733_v46 = vsub.f32 1.0, %v2732_v52  ;;  %4174 = vtanh.f32 %v2718_v20  ;;  %vm2753_vm0 = vmor %vm2751_vm14, %vm2752_vm12 }
 0x52d   :  { %v2748_v13 = vsub.f32 1.0, %v2747_v9 }
 0x52e   :  { %2961 = vmatpush.bf16.msra.mxu0 %v6350_v23  ;;  %2974 = vmatpush.bf16.msrb.mxu1 %v6351_v31  ;;  %v2734_v50 = vmul.f32 %v4169_v60, %v2733_v46 }
 0x52f   :  { %2987 = vmatpush.bf16.msra.mxu2 %v6352_v56  ;;  %3000 = vmatpush.bf16.msra.mxu3 %v6353_v17  ;;  %v2749_v22 = vmul.f32 %v4171_v42, %v2748_v13 }
 0x530   :  { %v2735_v62 = vadd.f32 %v4169_v60, %v2734_v50  ;;  %v6647_v50 = vld [vmem:[#allocation132_spill] sm:$0xff] }
 0x531   :  { %v4173_v61 = vpop.eup %4172  ;;  %v2750_v3 = vadd.f32 %v4171_v42, %v2749_v22  ;;  %v6648_v22 = vld [vmem:[#allocation73_spill] sm:$0xff] }
 0x532   :  { %v2762_v6 = vmul.f32 %v4173_v61, %v5723_v26  ;;  %2962 = vmatpush.bf16.msra.mxu0 %v6289_v55  ;;  %2975 = vmatpush.bf16.msrb.mxu1 %v6290_v47  ;;  %v2739_v28 = vsel %vm2738_vm15, %v4169_v60, %v2735_v62  ;;  %v4175_v58 = vpop.eup %4174  ;;  %vm2767_vm4 = vweird.f32 %v4173_v61  ;;  %v6651_v62 = vld [vmem:[#allocation76_spill] sm:$0xff] }
 0x533   :  { %2988 = vmatpush.bf16.msra.mxu2 %v6291_v36  ;;  %3001 = vmatpush.bf16.msra.mxu3 %v6292_v57  ;;  %v2744_v8 = vsel %vm2741_vm2, %v2743_v38, %v2739_v28  ;;  %v2754_v32 = vsel %vm2753_vm0, %v4171_v42, %v2750_v3  ;;  %v2772_v42 = vand.u32 2147483648, %v5723_v26  ;;  %vm2768_vm6 = vmor %vm2766_vm5, %vm2767_vm4  ;;  %v6653_v38 = vld [vmem:[#allocation78_spill] sm:$0xff]  ;;  %v6654_v3 = vld [vmem:[#allocation79_spill] sm:$0xff] }
 0x534   :  { %v2763_v48 = vsub.f32 1.0, %v2762_v6  ;;  %2914 = vmatmul.bf16.vlgmr.msrb.gmra.mxu0 %v5711_v59  ;;  %2927 = vmatmul.bf16.vlgmr.msra.gmra.mxu1 %v5711_v59  ;;  %v2759_v45 = vsel %vm2756_vm3, %v2758_v35, %v2754_v32  ;;  %v2778_v14 = vmul.f32 %v4175_v58, %v2744_v8  ;;  %v6652_v6 = vld [vmem:[#allocation77_spill] sm:$0xff]  ;;  %v6655_v35 = vld [vmem:[#allocation80_spill] sm:$0xff]  ;;  %v6656_v28 = vld [vmem:[#allocation82_spill] sm:$0xff] }
 0x535   :  { %2940 = vmatmul.bf16.vlgmr.msrb.gmra.mxu2 %v5711_v59  ;;  %2953 = vmatmul.bf16.vlgmr.msrb.gmra.mxu3 %v5711_v59  ;;  %v2777_v0 = vmul.f32 %v2759_v45, %v5609_v25  ;;  %v2770_v25 = vand.u32 2147483647, %v5723_v26  ;;  %v2773_v52 = vor.u32 1.1754944e-38, %v2772_v42  ;;  %v6644_v26 = vld [vmem:[#allocation129_spill] sm:$0xff]  ;;  %v6657_v58 = vld [vmem:[#allocation83_spill] sm:$0xff]  ;;  %v6660_v32 = vld [vmem:[#allocation86_spill] sm:$0xff] }
 0x536   :  { %v2764_v43 = vmul.f32 %v4173_v61, %v2763_v48  ;;  %2963 = vmatpush.bf16.msra.mxu0 %v6293_v5  ;;  %2976 = vmatpush.bf16.msrb.mxu1 %v6294_v30  ;;  %v6658_v48 = vld [vmem:[#allocation84_spill] sm:$0xff]  ;;  %v6659_v8 = vld [vmem:[#allocation85_spill] sm:$0xff]  ;;  %v6661_v45 = vld [vmem:[#allocation87_spill] sm:$0xff] }
 0x537   :  { %2989 = vmatpush.bf16.msra.mxu2 %v6295_v40  ;;  %3002 = vmatpush.bf16.msra.mxu3 %v6296_v21  ;;  %v5748_v60 = vadd.f32 %v2778_v14, %v2777_v0  ;;  %vm2771_vm7 = vcmp.eq.f32.partialorder %v2770_v25, 8.507059e+37  ;;  %v6662_v14 = vld [vmem:[#allocation88_spill] sm:$0xff]  ;;  %v6664_v0 = vld [vmem:[#allocation90_spill] sm:$0xff]  ;;  %v6667_v25 = vld [vmem:[#allocation93_spill] sm:$0xff] }
 0x538   :  { %v2765_v20 = vadd.f32 %v4173_v61, %v2764_v43  ;;  %v6663_v43 = vld [vmem:[#allocation89_spill] sm:$0xff]  ;;  %v6666_v42 = vld [vmem:[#allocation92_spill] sm:$0xff] }
 0x539   :  { %4176 = vtanh.f32 %v5748_v60 }
 0x53a   :  { %2964 = vmatpush.bf16.msra.mxu0 %v6297_v7  ;;  %2977 = vmatpush.bf16.msrb.mxu1 %v6298_v34  ;;  %v2769_v59 = vsel %vm2768_vm6, %v4173_v61, %v2765_v20  ;;  %v6650_v61 = vld [vmem:[#allocation75_spill] sm:$0xff] }
 0x53b   :  { %2990 = vmatpush.bf16.msra.mxu2 %v4860_v19  ;;  %3003 = vmatpush.bf16.msra.mxu3 %v4862_v44  ;;  %v2774_v46 = vsel %vm2771_vm7, %v2773_v52, %v2769_v59  ;;  %v6665_v20 = vld [vmem:[#allocation91_spill] sm:$0xff]  ;;  %v6668_v59 = vld [vmem:[#allocation94_spill] sm:$0xff] }
 0x53c   :  { %v6669_v52 = vld [vmem:[#allocation95_spill] sm:$0xff] }
 0x53e   :  { %2965 = vmatpush.bf16.msra.mxu0 %v4866_v16  ;;  %2978 = vmatpush.bf16.msrb.mxu1 %v4868_v15 }
 0x53f   :  { %2991 = vmatpush.bf16.msra.mxu2 %v4872_v2  ;;  %3004 = vmatpush.bf16.msra.mxu3 %v4874_v4  ;;  %v4177_v9 = vpop.eup %4176 }
 0x540   :  { %v2781_v13 = vmul.f32 %v4177_v9, %v2774_v46  ;;  %v6670_v9 = vld [vmem:[#allocation96_spill] sm:$0xff]  ;;  %v6671_v46 = vld [vmem:[#allocation97_spill] sm:$0xff] }
 0x542   :  { %2966 = vmatpush.bf16.msra.mxu0 %v6644_v26  ;;  %2979 = vmatpush.bf16.msrb.mxu1 %v6645_v11  ;;  %v2958_v24 = vpack.c.bf16 %v2781_v13, %v2781_v13  ;;  %v6672_v13 = vld [vmem:[#allocation98_spill] sm:$0xff] }
 0x543   :  { %2992 = vmatpush.bf16.msra.mxu2 %v6646_v18  ;;  %3005 = vmatpush.bf16.msra.mxu3 %v6647_v50 }
 0x545   :  { %2967 = vmatmul.bf16.vlgmr.msra.gmra.mxu0 %v2958_v24  ;;  %2980 = vmatmul.bf16.vlgmr.msrb.gmra.mxu1 %v2958_v24 }
 0x546   :  { %3079 = vmatpush.bf16.msrb.mxu0 %v6648_v22  ;;  %3092 = vmatpush.bf16.msra.mxu1 %v6649_v37  ;;  %v6674_v22 = vld [vmem:[#allocation100_spill] sm:$0xff]  ;;  %v6675_v37 = vld [vmem:[#allocation101_spill] sm:$0xff] }
 0x547   :  { %2993 = vmatmul.bf16.vlgmr.msra.gmra.mxu2 %v2958_v24  ;;  %3006 = vmatmul.bf16.vlgmr.msra.gmra.mxu3 %v2958_v24  ;;  %v6673_v24 = vld [vmem:[#allocation99_spill] sm:$0xff] }
 0x548   :  { %3105 = vmatpush.bf16.msrb.mxu2 %v6650_v61  ;;  %3118 = vmatpush.bf16.msrb.mxu3 %v6651_v62  ;;  %v6676_v61 = vld [vmem:[#allocation102_spill] sm:$0xff]  ;;  %v6677_v62 = vld [vmem:[#allocation103_spill] sm:$0xff] }
 0x54a   :  { %3080 = vmatpush.bf16.msrb.mxu0 %v6652_v6  ;;  %3093 = vmatpush.bf16.msra.mxu1 %v6653_v38  ;;  %v6678_v6 = vld [vmem:[#allocation104_spill] sm:$0xff]  ;;  %v6679_v38 = vld [vmem:[#allocation105_spill] sm:$0xff] }
 0x54c   :  { %3106 = vmatpush.bf16.msrb.mxu2 %v6654_v3  ;;  %3119 = vmatpush.bf16.msrb.mxu3 %v6655_v35 }
 0x54e   :  { %3081 = vmatpush.bf16.msrb.mxu0 %v6656_v28  ;;  %3094 = vmatpush.bf16.msra.mxu1 %v6657_v58 }
 0x550   :  { %3107 = vmatpush.bf16.msrb.mxu2 %v6658_v48  ;;  %3120 = vmatpush.bf16.msrb.mxu3 %v6659_v8 }
 0x552   :  { %3082 = vmatpush.bf16.msrb.mxu0 %v6660_v32  ;;  %3095 = vmatpush.bf16.msra.mxu1 %v6661_v45 }
 0x554   :  { %3108 = vmatpush.bf16.msrb.mxu2 %v6662_v14  ;;  %3121 = vmatpush.bf16.msrb.mxu3 %v6663_v43 }
 0x556   :  { %3083 = vmatpush.bf16.msrb.mxu0 %v6664_v0  ;;  %3096 = vmatpush.bf16.msra.mxu1 %v6665_v20 }
 0x558   :  { %3109 = vmatpush.bf16.msrb.mxu2 %v6666_v42  ;;  %3122 = vmatpush.bf16.msrb.mxu3 %v6667_v25 }
 0x55a   :  { %3084 = vmatpush.bf16.msrb.mxu0 %v6668_v59  ;;  %3097 = vmatpush.bf16.msra.mxu1 %v6669_v52 }
 0x55c   :  { %3110 = vmatpush.bf16.msrb.mxu2 %v6670_v9  ;;  %3123 = vmatpush.bf16.msrb.mxu3 %v6671_v46 }
 0x55e   :  { %3085 = vmatpush.bf16.msrb.mxu0 %v6672_v13  ;;  %3098 = vmatpush.bf16.msra.mxu1 %v6673_v24 }
 0x560   :  { %3111 = vmatpush.bf16.msrb.mxu2 %v6674_v22  ;;  %3124 = vmatpush.bf16.msrb.mxu3 %v6675_v37 }
 0x562   :  { %3086 = vmatpush.bf16.msrb.mxu0 %v6676_v61  ;;  %3099 = vmatpush.bf16.msra.mxu1 %v6677_v62 }
 0x564   :  { %3112 = vmatpush.bf16.msrb.mxu2 %v6678_v6  ;;  %3125 = vmatpush.bf16.msrb.mxu3 %v6679_v38 }
 0x566   :  { %3132 = vmatpush.bf16.msra.mxu0 %v6278_v10  ;;  %3145 = vmatpush.bf16.msrb.mxu1 %v6279_v41  ;;  %v6680_v10 = vld [vmem:[#allocation42_spill] sm:$0xff] }
 0x568   :  { %3158 = vmatpush.bf16.msra.mxu2 %v6280_v51  ;;  %3171 = vmatpush.bf16.msra.mxu3 %v6281_v54  ;;  %v6683_v51 = vld [vmem:[#allocation81_spill] sm:$0xff] }
 0x56a   :  { %3133 = vmatpush.bf16.msra.mxu0 %v6282_v1  ;;  %3146 = vmatpush.bf16.msrb.mxu1 %v6283_v12 }
 0x56c   :  { %3159 = vmatpush.bf16.msra.mxu2 %v6348_v29  ;;  %3172 = vmatpush.bf16.msra.mxu3 %v6349_v33 }
 0x56e   :  { %3134 = vmatpush.bf16.msra.mxu0 %v6350_v23  ;;  %3147 = vmatpush.bf16.msrb.mxu1 %v6351_v31 }
 0x570   :  { %3160 = vmatpush.bf16.msra.mxu2 %v6352_v56  ;;  %3173 = vmatpush.bf16.msra.mxu3 %v6353_v17 }
 0x572   :  { %3135 = vmatpush.bf16.msra.mxu0 %v6289_v55  ;;  %3148 = vmatpush.bf16.msrb.mxu1 %v6290_v47  ;;  %v6684_v47 = vld [vmem:[#allocation49_spill] sm:$0xff]  ;;  %v6685_v55 = vld [vmem:[#allocation70_spill] sm:$0xff] }
 0x574   :  { %3161 = vmatpush.bf16.msra.mxu2 %v6291_v36  ;;  %3174 = vmatpush.bf16.msra.mxu3 %v6292_v57  ;;  %v235_v36 = vadd.f32 %v6685_v55, %v6684_v47 }
 0x576   :  { %3136 = vmatpush.bf16.msra.mxu0 %v6293_v5  ;;  %3149 = vmatpush.bf16.msrb.mxu1 %v6294_v30 }
 0x578   :  { %3162 = vmatpush.bf16.msra.mxu2 %v6295_v40  ;;  %3175 = vmatpush.bf16.msra.mxu3 %v6296_v21 }
 0x57a   :  { %3137 = vmatpush.bf16.msra.mxu0 %v6297_v7  ;;  %3150 = vmatpush.bf16.msrb.mxu1 %v6298_v34 }
 0x57c   :  { %3163 = vmatpush.bf16.msra.mxu2 %v4860_v19  ;;  %3176 = vmatpush.bf16.msra.mxu3 %v4862_v44  ;;  %v6681_v19 = vld [vmem:[#allocation45_spill] sm:$0xff]  ;;  %v6682_v44 = vld [vmem:[#allocation55_spill] sm:$0xff] }
 0x57d   :  { %v177_v41 = vadd.f32 %v6681_v19, %v6680_v10 }
 0x57e   :  { %3138 = vmatpush.bf16.msra.mxu0 %v4866_v16  ;;  %3151 = vmatpush.bf16.msrb.mxu1 %v4868_v15  ;;  %v206_v16 = vadd.f32 %v6683_v51, %v6682_v44 }
 0x580   :  { %3164 = vmatpush.bf16.msra.mxu2 %v4872_v2  ;;  %3177 = vmatpush.bf16.msra.mxu3 %v4874_v4 }
 0x582   :  { %3139 = vmatpush.bf16.msra.mxu0 %v6644_v26  ;;  %3152 = vmatpush.bf16.msrb.mxu1 %v6645_v11 }
 0x584   :  { %3165 = vmatpush.bf16.msra.mxu2 %v6646_v18  ;;  %3178 = vmatpush.bf16.msra.mxu3 %v6647_v50  ;;  %v6686_v18 = vld [vmem:[#allocation50_spill] sm:$0xff]  ;;  %v6687_v50 = vld [vmem:[#allocation71_spill] sm:$0xff] }
 0x585   :  { %v264_v3 = vadd.f32 %v6687_v50, %v6686_v18 }
 0x5a1   :  { %v2796_v54 = vpop.f32.mrf.mxu0  ;;  %v2809_v15 = vpop.f32.mrf.mxu1 }
 0x5a2   :  { %v2839_v1 = vadd.f32 %v2796_v54, %v177_v41  ;;  %v2840_v2 = vadd.f32 %v2809_v15, %v206_v16 }
 0x5a4   :  { %v3811_v12 = vmul.f32 -1.442695, %v2839_v1  ;;  %v3812_v4 = vmul.f32 -1.442695, %v2840_v2 }
 0x5a6   :  { %4178 = vpow2.f32 %v3811_v12 }
 0x5a7   :  { %4180 = vpow2.f32 %v3812_v4 }
 0x5a8   :  { %v2822_v57 = vpop.f32.mrf.mxu2  ;;  %v2835_v5 = vpop.f32.mrf.mxu3 }
 0x5a9   :  { %v2841_v30 = vadd.f32 %v2822_v57, %v235_v36  ;;  %v2798_v40 = vpop.f32.mrf.mxu0  ;;  %v2811_v21 = vpop.f32.mrf.mxu1  ;;  %v2842_v58 = vadd.f32 %v2835_v5, %v264_v3 }
 0x5ab   :  { %v3813_v7 = vmul.f32 -1.442695, %v2841_v30 }
 0x5ac   :  { %v4179_v34 = vpop.eup %4178 }
 0x5ad   :  { %v4181_v29 = vpop.eup %4180  ;;  %v2852_v33 = vadd.f32 1.0, %v4179_v34  ;;  %4182 = vpow2.f32 %v3813_v7 }
 0x5ae   :  { %v2853_v23 = vadd.f32 1.0, %v4181_v29 }
 0x5af   :  { %4184 = vrcp.f32 %v2852_v33  ;;  %v2866_v20 = vand.u32 2147483648, %v2852_v33  ;;  %v2864_v9 = vand.u32 2147483647, %v2852_v33  ;;  %vm2860_vm10 = vweird.f32 %v2852_v33 }
 0x5b0   :  { %4186 = vrcp.f32 %v2853_v23  ;;  %v2824_v31 = vpop.f32.mrf.mxu2  ;;  %v2837_v56 = vpop.f32.mrf.mxu3  ;;  %v2881_v59 = vand.u32 2147483648, %v2853_v23  ;;  %v2879_v13 = vand.u32 2147483647, %v2853_v23  ;;  %vm2875_vm11 = vweird.f32 %v2853_v23 }
 0x5b1   :  { %v2915_v17 = vpop.f32.mrf.mxu0  ;;  %v2928_v26 = vpop.f32.mrf.mxu1  ;;  %v2867_v61 = vor.u32 1.1754944e-38, %v2866_v20  ;;  %vm2865_vm14 = vcmp.eq.f32.partialorder %v2864_v9, 8.507059e+37 }
 0x5b2   :  { %v2882_v6 = vor.u32 1.1754944e-38, %v2881_v59  ;;  %vm2880_vm15 = vcmp.eq.f32.partialorder %v2879_v13, 8.507059e+37  ;;  %v2916_v12 = vadd.f32 %v2915_v17, %v4979_v53  ;;  %v2929_v4 = vadd.f32 %v2928_v26, %v4982_v49 }
 0x5b3   :  { %v4183_v11 = vpop.eup %4182 }
 0x5b4   :  { %v5838_v35 = vadd.f32 1.0, %v4183_v11 }
 0x5b5   :  { %v4185_v28 = vpop.eup %4184 }
 0x5b6   :  { %v4187_v48 = vpop.eup %4186  ;;  %v2856_v8 = vmul.f32 %v4185_v28, %v2852_v33  ;;  %4188 = vrcp.f32 %v5838_v35  ;;  %vm2861_vm8 = vweird.f32 %v4185_v28  ;;  %v2896_v40 = vand.u32 2147483648, %v5838_v35 }
 0x5b7   :  { %v2871_v32 = vmul.f32 %v4187_v48, %v2853_v23  ;;  %4190 = vtanh.f32 %v2842_v58  ;;  %vm2876_vm9 = vweird.f32 %v4187_v48  ;;  %vm2862_vm12 = vmor %vm2860_vm10, %vm2861_vm8  ;;  %vm2890_vm2 = vweird.f32 %v5838_v35 }
 0x5b8   :  { %v2857_v45 = vsub.f32 1.0, %v2856_v8  ;;  %v2941_v14 = vpop.f32.mrf.mxu2  ;;  %v5841_v43 = vpop.f32.mrf.mxu3  ;;  %vm2877_vm13 = vmor %vm2875_vm11, %vm2876_vm9  ;;  %v2894_v7 = vand.u32 2147483647, %v5838_v35  ;;  %v2897_v33 = vor.u32 1.1754944e-38, %v2896_v40 }
 0x5b9   :  { %v2872_v0 = vsub.f32 1.0, %v2871_v32  ;;  %v2917_v42 = vpop.f32.mrf.mxu0  ;;  %v2930_v25 = vpop.f32.mrf.mxu1  ;;  %v2942_v29 = vadd.f32 %v2941_v14, %v4991_v39 }
 0x5ba   :  { %v2858_v52 = vmul.f32 %v4185_v28, %v2857_v45  ;;  %vm2895_vm4 = vcmp.eq.f32.partialorder %v2894_v7, 8.507059e+37 }
 0x5bb   :  { %v2873_v46 = vmul.f32 %v4187_v48, %v2872_v0  ;;  %v2955_v0 = vadd.f32 %v5841_v43, %v5003_v27 }
 0x5bc   :  { %v4189_v24 = vpop.eup %4188  ;;  %v2859_v22 = vadd.f32 %v4185_v28, %v2858_v52 }
 0x5bd   :  { %v2886_v37 = vmul.f32 %v4189_v24, %v5838_v35  ;;  %v2874_v62 = vadd.f32 %v4187_v48, %v2873_v46  ;;  %v4191_v10 = vpop.eup %4190  ;;  %vm2891_vm0 = vweird.f32 %v4189_v24 }
 0x5be   :  { %v2863_v38 = vsel %vm2862_vm12, %v4185_v28, %v2859_v22  ;;  %vm2892_vm3 = vmor %vm2890_vm2, %vm2891_vm0 }
 0x5bf   :  { %v2887_v19 = vsub.f32 1.0, %v2886_v37  ;;  %v2868_v41 = vsel %vm2865_vm14, %v2867_v61, %v2863_v38  ;;  %v2878_v44 = vsel %vm2877_vm13, %v4187_v48, %v2874_v62 }
 0x5c0   :  { %v2883_v51 = vsel %vm2880_vm15, %v2882_v6, %v2878_v44  ;;  %v2902_v16 = vmul.f32 %v4191_v10, %v2868_v41  ;;  %v2943_v54 = vpop.f32.mrf.mxu2  ;;  %v2956_v15 = vpop.f32.mrf.mxu3 }
 0x5c1   :  { %v2888_v1 = vmul.f32 %v4189_v24, %v2887_v19  ;;  %v2901_v2 = vmul.f32 %v2883_v51, %v5704_v63 }
 0x5c2   :  { %v2968_v47 = vpop.f32.mrf.mxu0  ;;  %v2981_v55 = vpop.f32.mrf.mxu1 }
 0x5c3   :  { %v2903_v36 = vadd.f32 %v2902_v16, %v2901_v2  ;;  %v3011_v57 = vadd.f32 %v2968_v47, %v2916_v12  ;;  %v3012_v5 = vadd.f32 %v2981_v55, %v2929_v4  ;;  %v2889_v30 = vadd.f32 %v4189_v24, %v2888_v1 }
 0x5c5   :  { %4192 = vtanh.f32 %v2903_v36  ;;  %3337 = vst [vmem:[%s5926_s11] sm:$0xff] %v2903_v36  ;;  %v3814_v21 = vmul.f32 -1.442695, %v3011_v57  ;;  %v3815_v63 = vmul.f32 -1.442695, %v3012_v5  ;;  %v2893_v34 = vsel %vm2892_vm3, %v4189_v24, %v2889_v30 }
 0x5c6   :  { %v2898_v18 = vsel %vm2895_vm4, %v2897_v33, %v2893_v34 }
 0x5c7   :  { %4194 = vpow2.f32 %v3814_v21 }
 0x5c8   :  { %4196 = vpow2.f32 %v3815_v63 }
 0x5ca   :  { %v2994_v23 = vpop.f32.mrf.mxu2  ;;  %v3007_v31 = vpop.f32.mrf.mxu3 }
 0x5cb   :  { %v3013_v56 = vadd.f32 %v2994_v23, %v2942_v29  ;;  %v2970_v17 = vpop.f32.mrf.mxu0  ;;  %v2983_v26 = vpop.f32.mrf.mxu1  ;;  %v3014_v25 = vadd.f32 %v3007_v31, %v2955_v0 }
 0x5cc   :  { %v4193_v11 = vpop.eup %4192 }
 0x5cd   :  { %v3816_v50 = vmul.f32 -1.442695, %v3013_v56  ;;  %v5854_v3 = vmul.f32 %v4193_v11, %v2898_v18  ;;  %v4195_v28 = vpop.eup %4194  ;;  %v3961_v11 = vld [vmem:[%s5922_s7 + $0x38] sm:$0xff]  ;;  %v3960_v18 = vld [vmem:[%s5922_s7 + $0x30] sm:$0xff] }
 0x5ce   :  { %v4197_v35 = vpop.eup %4196  ;;  %v3024_v58 = vadd.f32 1.0, %v4195_v28  ;;  %v3958_v28 = vld [vmem:[%s5922_s7 + $0x20] sm:$0xff] }
 0x5cf   :  { %4198 = vpow2.f32 %v3816_v50  ;;  %v3078_v48 = vpack.c.bf16 %v5854_v3, %v5854_v3  ;;  %3336 = vst [vmem:[%s5925_s10] sm:$0xff] %v5854_v3  ;;  %v3025_v8 = vadd.f32 1.0, %v4197_v35  ;;  %v3959_v50 = vld [vmem:[%s5922_s7 + $0x28] sm:$0xff] }
 0x5d0   :  { %4200 = vrcp.f32 %v3024_v58  ;;  %v3038_v24 = vand.u32 2147483648, %v3024_v58  ;;  %v3036_v61 = vand.u32 2147483647, %v3024_v58  ;;  %vm3032_vm7 = vweird.f32 %v3024_v58 }
 0x5d1   :  { %3087 = vmatmul.bf16.vlgmr.msrb.gmra.mxu0 %v3078_v48  ;;  %3100 = vmatmul.bf16.vlgmr.msra.gmra.mxu1 %v3078_v48  ;;  %4202 = vrcp.f32 %v3025_v8  ;;  %v3053_v22 = vand.u32 2147483648, %v3025_v8  ;;  %v3051_v6 = vand.u32 2147483647, %v3025_v8  ;;  %vm3047_vm8 = vweird.f32 %v3025_v8 }
 0x5d2   :  { %v2996_v32 = vpop.f32.mrf.mxu2  ;;  %v3009_v45 = vpop.f32.mrf.mxu3  ;;  %3113 = vmatmul.bf16.vlgmr.msrb.gmra.mxu2 %v3078_v48  ;;  %3126 = vmatmul.bf16.vlgmr.msrb.gmra.mxu3 %v3078_v48  ;;  %v3039_v19 = vor.u32 1.1754944e-38, %v3038_v24  ;;  %vm3037_vm11 = vcmp.eq.f32.partialorder %v3036_v61, 8.507059e+37  ;;  %v3957_v48 = vld [vmem:[%s5922_s7 + $0x18] sm:$0xff] }
 0x5d3   :  { %v3054_v44 = vor.u32 1.1754944e-38, %v3053_v22  ;;  %vm3052_vm12 = vcmp.eq.f32.partialorder %v3051_v6, 8.507059e+37  ;;  %3320 = vmatpush.bf16.msrb.mxu0 %v3961_v11 }
 0x5d5   :  { %v4199_v14 = vpop.eup %4198 }
 0x5d6   :  { %v3026_v20 = vadd.f32 1.0, %v4199_v14  ;;  %v4201_v42 = vpop.eup %4200 }
 0x5d7   :  { %v4203_v59 = vpop.eup %4202  ;;  %v3028_v52 = vmul.f32 %v4201_v42, %v3024_v58  ;;  %vm3033_vm5 = vweird.f32 %v4201_v42  ;;  %3321 = vmatpush.bf16.msrb.mxu0 %v3960_v18 }
 0x5d8   :  { %4204 = vrcp.f32 %v3026_v20  ;;  %v3043_v9 = vmul.f32 %v4203_v59, %v3025_v8  ;;  %vm3048_vm6 = vweird.f32 %v4203_v59  ;;  %vm3034_vm9 = vmor %vm3032_vm7, %vm3033_vm5  ;;  %v3068_v57 = vand.u32 2147483648, %v3026_v20 }
 0x5d9   :  { %v3029_v46 = vsub.f32 1.0, %v3028_v52  ;;  %4206 = vtanh.f32 %v3014_v25  ;;  %vm3049_vm10 = vmor %vm3047_vm8, %vm3048_vm6  ;;  %vm3062_vm14 = vweird.f32 %v3026_v20  ;;  %v3066_v5 = vand.u32 2147483647, %v3026_v20 }
 0x5da   :  { %v3044_v13 = vsub.f32 1.0, %v3043_v9  ;;  %v3069_v40 = vor.u32 1.1754944e-38, %v3068_v57 }
 0x5db   :  { %v3030_v37 = vmul.f32 %v4201_v42, %v3029_v46  ;;  %vm3067_vm0 = vcmp.eq.f32.partialorder %v3066_v5, 8.507059e+37  ;;  %3322 = vmatpush.bf16.msrb.mxu0 %v3959_v50 }
 0x5dc   :  { %v3045_v62 = vmul.f32 %v4203_v59, %v3044_v13  ;;  %v3954_v13 = vld [vmem:[%s5922_s7] sm:$0xff] }
 0x5dd   :  { %v3031_v43 = vadd.f32 %v4201_v42, %v3030_v37 }
 0x5de   :  { %v4205_v38 = vpop.eup %4204  ;;  %v3046_v41 = vadd.f32 %v4203_v59, %v3045_v62 }
 0x5df   :  { %v3058_v10 = vmul.f32 %v4205_v38, %v3026_v20  ;;  %v3035_v51 = vsel %vm3034_vm9, %v4201_v42, %v3031_v43  ;;  %v4207_v16 = vpop.eup %4206  ;;  %vm3063_vm13 = vweird.f32 %v4205_v38  ;;  %3323 = vmatpush.bf16.msrb.mxu0 %v3958_v28  ;;  %v3956_v42 = vld [vmem:[%s5922_s7 + $0x10] sm:$0xff] }
 0x5e0   :  { %v3040_v15 = vsel %vm3037_vm11, %v3039_v19, %v3035_v51  ;;  %v3050_v1 = vsel %vm3049_vm10, %v4203_v59, %v3046_v41  ;;  %vm3064_vm15 = vmor %vm3062_vm14, %vm3063_vm13 }
 0x5e1   :  { %v3059_v54 = vsub.f32 1.0, %v3058_v10  ;;  %v3055_v2 = vsel %vm3052_vm12, %v3054_v44, %v3050_v1  ;;  %v3074_v12 = vmul.f32 %v4207_v16, %v3040_v15 }
 0x5e2   :  { %v3073_v47 = vmul.f32 %v3055_v2, %v5748_v60 }
 0x5e3   :  { %v3060_v4 = vmul.f32 %v4205_v38, %v3059_v54  ;;  %3324 = vmatpush.bf16.msrb.mxu0 %v3957_v48 }
 0x5e4   :  { %v5865_v55 = vadd.f32 %v3074_v12, %v3073_v47 }
 0x5e5   :  { %v3061_v36 = vadd.f32 %v4205_v38, %v3060_v4 }
 0x5e6   :  { %4208 = vtanh.f32 %v5865_v55 }
 0x5e7   :  { %v3065_v30 = vsel %vm3064_vm15, %v4205_v38, %v3061_v36  ;;  %3325 = vmatpush.bf16.msrb.mxu0 %v3956_v42 }
 0x5e8   :  { %v3070_v63 = vsel %vm3067_vm0, %v3069_v40, %v3065_v30 }
 0x5ec   :  { %v4209_v21 = vpop.eup %4208 }
 0x5ed   :  { %v3077_v7 = vmul.f32 %v4209_v21, %v3070_v63 }
 0x5ef   :  { %v3131_v34 = vpack.c.bf16 %v3077_v7, %v3077_v7 }
 0x5f1   :  { %3140 = vmatmul.bf16.vlgmr.msra.gmra.mxu0 %v3131_v34  ;;  %3153 = vmatmul.bf16.vlgmr.msrb.gmra.mxu1 %v3131_v34 }
 0x5f2   :  { %3166 = vmatmul.bf16.vlgmr.msra.gmra.mxu2 %v3131_v34  ;;  %3179 = vmatmul.bf16.vlgmr.msra.gmra.mxu3 %v3131_v34 }
 0x64e   :  { %v3088_v60 = vpop.f32.mrf.mxu0  ;;  %v3101_v29 = vpop.f32.mrf.mxu1 }
 0x64f   :  { %v3089_v35 = vadd.f32 %v3088_v60, %v4979_v53  ;;  %v3102_v58 = vadd.f32 %v3101_v29, %v4982_v49  ;;  %v3955_v53 = vld [vmem:[%s5922_s7 + $0x8] sm:$0xff] }
 0x650   :  { %3326 = vmatpush.bf16.msrb.mxu0 %v3955_v53 }
 0x654   :  { %3327 = vmatpush.bf16.msrb.mxu0 %v3954_v13 }
 0x655   :  { %v3114_v33 = vpop.f32.mrf.mxu2  ;;  %v3127_v23 = vpop.f32.mrf.mxu3 }
 0x656   :  { %v3090_v31 = vpop.f32.mrf.mxu0  ;;  %v3103_v56 = vpop.f32.mrf.mxu1  ;;  %v3115_v49 = vadd.f32 %v3114_v33, %v4991_v39  ;;  %v3128_v43 = vadd.f32 %v3127_v23, %v5003_v27 }
 0x65d   :  { %v3116_v17 = vpop.f32.mrf.mxu2  ;;  %v3129_v26 = vpop.f32.mrf.mxu3 }
 0x66e   :  { %v3141_v8 = vpop.f32.mrf.mxu0  ;;  %v3154_v32 = vpop.f32.mrf.mxu1 }
 0x66f   :  { %v3184_v45 = vadd.f32 %v3141_v8, %v3089_v35  ;;  %v3185_v14 = vadd.f32 %v3154_v32, %v3102_v58  ;;  %v3969_v8 = vld [vmem:[%s5923_s8] ss:$0 sm:$0xff] }
 0x671   :  { %v3817_v0 = vmul.f32 -1.442695, %v3184_v45  ;;  %v3818_v20 = vmul.f32 -1.442695, %v3185_v14 }
 0x673   :  { %4210 = vpow2.f32 %v3817_v0 }
 0x674   :  { %4212 = vpow2.f32 %v3818_v20 }
 0x675   :  { %v3167_v25 = vpop.f32.mrf.mxu2  ;;  %v3180_v59 = vpop.f32.mrf.mxu3 }
 0x676   :  { %v3186_v52 = vadd.f32 %v3167_v25, %v3115_v49  ;;  %v3143_v9 = vpop.f32.mrf.mxu0  ;;  %v3156_v46 = vpop.f32.mrf.mxu1  ;;  %v3187_v41 = vadd.f32 %v3180_v59, %v3128_v43 }
 0x678   :  { %v3819_v24 = vmul.f32 -1.442695, %v3186_v52 }
 0x679   :  { %v4211_v22 = vpop.eup %4210 }
 0x67a   :  { %v4213_v37 = vpop.eup %4212  ;;  %v3197_v61 = vadd.f32 1.0, %v4211_v22  ;;  %4214 = vpow2.f32 %v3819_v24 }
 0x67b   :  { %v3198_v62 = vadd.f32 1.0, %v4213_v37 }
 0x67c   :  { %4216 = vrcp.f32 %v3197_v61  ;;  %v3211_v1 = vand.u32 2147483648, %v3197_v61  ;;  %v3209_v4 = vand.u32 2147483647, %v3197_v61  ;;  %vm3205_vm4 = vweird.f32 %v3197_v61 }
 0x67d   :  { %4218 = vrcp.f32 %v3198_v62  ;;  %v3169_v39 = vpop.f32.mrf.mxu2  ;;  %v3182_v6 = vpop.f32.mrf.mxu3  ;;  %v3226_v2 = vand.u32 2147483648, %v3198_v62  ;;  %v3224_v36 = vand.u32 2147483647, %v3198_v62  ;;  %vm3220_vm5 = vweird.f32 %v3198_v62 }
 0x67e   :  { %v3212_v30 = vor.u32 1.1754944e-38, %v3211_v1  ;;  %vm3210_vm8 = vcmp.eq.f32.partialorder %v3209_v4, 8.507059e+37 }
 0x67f   :  { %v3227_v21 = vor.u32 1.1754944e-38, %v3226_v2  ;;  %vm3225_vm9 = vcmp.eq.f32.partialorder %v3224_v36, 8.507059e+37 }
 0x680   :  { %v4215_v38 = vpop.eup %4214 }
 0x681   :  { %v3199_v10 = vadd.f32 1.0, %v4215_v38 }
 0x682   :  { %v4217_v19 = vpop.eup %4216 }
 0x683   :  { %v4219_v44 = vpop.eup %4218  ;;  %v3201_v51 = vmul.f32 %v4217_v19, %v3197_v61  ;;  %4220 = vrcp.f32 %v3199_v10  ;;  %vm3206_vm2 = vweird.f32 %v4217_v19  ;;  %v3241_v11 = vand.u32 2147483648, %v3199_v10 }
 0x684   :  { %v3216_v16 = vmul.f32 %v4219_v44, %v3198_v62  ;;  %4222 = vtanh.f32 %v3187_v41  ;;  %vm3221_vm3 = vweird.f32 %v4219_v44  ;;  %vm3207_vm6 = vmor %vm3205_vm4, %vm3206_vm2  ;;  %vm3235_vm11 = vweird.f32 %v3199_v10 }
 0x685   :  { %v3202_v54 = vsub.f32 1.0, %v3201_v51  ;;  %vm3222_vm7 = vmor %vm3220_vm5, %vm3221_vm3  ;;  %v3239_v18 = vand.u32 2147483647, %v3199_v10  ;;  %v3242_v28 = vor.u32 1.1754944e-38, %v3241_v11 }
 0x686   :  { %v3217_v15 = vsub.f32 1.0, %v3216_v16 }
 0x687   :  { %v3203_v12 = vmul.f32 %v4217_v19, %v3202_v54  ;;  %vm3240_vm13 = vcmp.eq.f32.partialorder %v3239_v18, 8.507059e+37 }
 0x688   :  { %v3218_v47 = vmul.f32 %v4219_v44, %v3217_v15 }
 0x689   :  { %v4221_v57 = vpop.eup %4220  ;;  %v3204_v27 = vadd.f32 %v4217_v19, %v3203_v12 }
 0x68a   :  { %v3231_v5 = vmul.f32 %v4221_v57, %v3199_v10  ;;  %v3219_v40 = vadd.f32 %v4219_v44, %v3218_v47  ;;  %v4223_v7 = vpop.eup %4222  ;;  %vm3236_vm10 = vweird.f32 %v4221_v57 }
 0x68b   :  { %v3208_v63 = vsel %vm3207_vm6, %v4217_v19, %v3204_v27  ;;  %vm3237_vm12 = vmor %vm3235_vm11, %vm3236_vm10 }
 0x68c   :  { %v3232_v34 = vsub.f32 1.0, %v3231_v5  ;;  %v3213_v60 = vsel %vm3210_vm8, %v3212_v30, %v3208_v63  ;;  %v3223_v29 = vsel %vm3222_vm7, %v4219_v44, %v3219_v40 }
 0x68d   :  { %v3228_v33 = vsel %vm3225_vm9, %v3227_v21, %v3223_v29  ;;  %v3247_v23 = vmul.f32 %v4223_v7, %v3213_v60 }
 0x68e   :  { %v3233_v31 = vmul.f32 %v4221_v57, %v3232_v34  ;;  %v3246_v56 = vmul.f32 %v3228_v33, %v5865_v55 }
 0x690   :  { %v3248_v17 = vadd.f32 %v3247_v23, %v3246_v56  ;;  %v3234_v26 = vadd.f32 %v4221_v57, %v3233_v31 }
 0x692   :  { %4224 = vtanh.f32 %v3248_v17  ;;  %3853 = vst [vmem:[%s5926_s11 + $0x8] sm:$0xff] %v3248_v17  ;;  %v3238_v50 = vsel %vm3237_vm12, %v4221_v57, %v3234_v26 }
 0x693   :  { %v3243_v58 = vsel %vm3240_vm13, %v3242_v28, %v3238_v50 }
 0x698   :  { %v4225_v35 = vpop.eup %4224 }
 0x699   :  { %v3250_v48 = vmul.f32 %v4225_v35, %v3243_v58 }
 0x69b   :  { %v3251_v55 = vpack.c.bf16 %v3250_v48, %v5854_v3  ;;  %3852 = vst [vmem:[%s5925_s10 + $0x8] sm:$0xff] %v3250_v48 }
 0x69d   :  { %3328 = vmatmul.bf16.vlgmr.msrb.gmra.mxu0 %v3251_v55 }
 0x71a   :  { %v3329_v32 = vpop.f32.mrf.mxu0 }
 0x71b   :  { %v3330_v45 = vadd.f32 %v3969_v8, %v3329_v32 }
 0x71d   :  { %3334 = vst.msk [vmem:[%s5924_s9] sm:$0xff] %vm128_vm1, %v3330_v45 }
 0x722   :  { %v3331_v14 = vpop.f32.mrf.mxu0 }
 0x723   :  { %v3332_v0 = vadd.f32 %v3969_v8, %v3331_v14 }
 0x725   :  { %3335 = vst.msk [vmem:[%s5924_s9 + $0x8] sm:$0xff] %vm128_vm1, %v3332_v0 }
 0x726   :  { %3354 = vsyncpa [#allocation4], 1 }
 0x727   :  { %3355 = vsyncpa [#allocation6], 1 }

</bundles_post_ra>
